<compile_context>
chip_gen: v5e
topology: v5e:2x2
jax: 0.10.0
libtpu: 0.0.40
codegen_flags: <defaults>
</compile_context>

<pallas_src>
import numpy as np
import jax
import jax.numpy as jnp
from jax.experimental import pallas as pl
from jax.experimental.pallas import tpu as pltpu

# ----------------------------- configuration --------------------------------
B = 2            # batch
T = 8            # num_tokens (no head token)
D = 32           # in_dim
LATENT = 32      # latent_dim = round(in_dim * latent_dim_ratio), ratio = 1.0
NUM_LAYERS = 4
EPS = 1e-5       # PyTorch LayerNorm default eps
BT = B * T

PARAM_ORDER = [
    "tok_w1", "tok_b1", "tok_w2", "tok_b2", "tok_ln_g", "tok_ln_b",
    "ch_w1", "ch_b1", "ch_w2", "ch_b2", "ch_ln_g", "ch_ln_b",
    "head_ln_g", "head_ln_b",
]


# ------------------------------ kernel helpers -------------------------------
def _layernorm(x, g, b):
    # g, b arrive pre-broadcast to x.shape -> no broadcast_in_dim in the body.
    mu = jnp.mean(x, axis=-1, keepdims=True)
    var = jnp.mean((x - mu) ** 2, axis=-1, keepdims=True)
    return (x - mu) * jax.lax.rsqrt(var + EPS) * g + b


def _gelu(x):
    # exact (erf) GELU, matching torch.nn.GELU()
    return 0.5 * x * (1.0 + jax.lax.erf(x * 0.7071067811865476))


# --------------------------------- kernel ------------------------------------
def mixer_kernel(
    x_ref,
    tw1_ref, tb1_ref, tw2_ref, tb2_ref, tg_ref, tbeta_ref,
    cw1_ref, cb1_ref, cw2_ref, cb2_ref, cg_ref, cbeta_ref,
    hg_ref, hb_ref,
    out_ref,
):
    """Single invocation (no grid): the whole batch through all layers.

    Activations live as a lane-dense (B*T, D) f32 slab. Token mixing uses
    host-built block-diagonal bf16 weights, so both mixers are plain
    row-major matmuls with f32 accumulation and no transposes / concats.
    """
    x = x_ref[...]                                            # (BT, D) f32

    for l in range(NUM_LAYERS):                               # static unroll
        # --- token mixing (pre-norm): block-diag W1t / W2t over the batch ---
        y = _layernorm(x, tg_ref[l], tbeta_ref[l])            # (BT, D) f32
        h = _gelu(
            jnp.dot(tw1_ref[l], y.astype(jnp.bfloat16),
                    preferred_element_type=jnp.float32)
            + tb1_ref[l])                                     # (B*LATENT, D)
        tok = (jnp.dot(tw2_ref[l], h.astype(jnp.bfloat16),
                       preferred_element_type=jnp.float32)
               + tb2_ref[l])                                  # (BT, D)
        x = x + tok                                           # residual

        # --- channel mixing (pre-norm), fused over all BT rows ---
        z = _layernorm(x, cg_ref[l], cbeta_ref[l])            # (BT, D) f32
        h = _gelu(
            jnp.dot(z.astype(jnp.bfloat16), cw1_ref[l],
                    preferred_element_type=jnp.float32)
            + cb1_ref[l])                                     # (BT, LATENT)
        ch = (jnp.dot(h.astype(jnp.bfloat16), cw2_ref[l],
                      preferred_element_type=jnp.float32)
              + cb2_ref[l])                                   # (BT, D)
        x = x + ch                                            # residual

    # --- head: PreNorm(LayerNorm) + mean over tokens per batch element ---
    xn = _layernorm(x, hg_ref[...], hb_ref[...])              # (BT, D) f32
    out_ref[...] = jnp.mean(xn.reshape(B, T, D), axis=1)      # (B, D) f32


# --------------------------------- wrapper ------------------------------------
def mixed_stacked_encoder(x, params):
    assert x.shape == (B, T, D)

    # ---- one-time host-side parameter prep (outside the kernel) ----
    #  * token-mix weights transposed and expanded to block-diagonal form over
    #    the batch -> one matmul per mixer, no in-kernel transpose/concat
    #  * all biases / LayerNorm affines pre-broadcast to full row x lane shape
    #  * matmul weights cast to bf16 (kernel accumulates in f32)
    eye_b = jnp.eye(B, dtype=jnp.float32)
    tw1_bd = jnp.stack([jnp.kron(eye_b, params["tok_w1"][l].T)
                        for l in range(NUM_LAYERS)]).astype(jnp.bfloat16)   # (L, B*LATENT, BT)
    tw2_bd = jnp.stack([jnp.kron(eye_b, params["tok_w2"][l].T)
                        for l in range(NUM_LAYERS)]).astype(jnp.bfloat16)   # (L, BT, B*LATENT)

    tb1 = jnp.swapaxes(params["tok_b1"], 1, 2)                 # (L, LATENT, 1)
    tb1 = jnp.broadcast_to(jnp.tile(tb1, (1, B, 1)),
                           (NUM_LAYERS, B * LATENT, D)).astype(jnp.float32)
    tb2 = jnp.swapaxes(params["tok_b2"], 1, 2)                 # (L, T, 1)
    tb2 = jnp.broadcast_to(jnp.tile(tb2, (1, B, 1)),
                           (NUM_LAYERS, BT, D)).astype(jnp.float32)

    prepped = {
        "tok_w1": tw1_bd,
        "tok_b1": tb1,
        "tok_w2": tw2_bd,
        "tok_b2": tb2,
        "tok_ln_g": jnp.broadcast_to(params["tok_ln_g"], (NUM_LAYERS, BT, D)),
        "tok_ln_b": jnp.broadcast_to(params["tok_ln_b"], (NUM_LAYERS, BT, D)),
        "ch_w1": params["ch_w1"].astype(jnp.bfloat16),          # (L, D, LATENT)
        "ch_b1": jnp.broadcast_to(params["ch_b1"], (NUM_LAYERS, BT, LATENT)),
        "ch_w2": params["ch_w2"].astype(jnp.bfloat16),          # (L, LATENT, D)
        "ch_b2": jnp.broadcast_to(params["ch_b2"], (NUM_LAYERS, BT, D)),
        "ch_ln_g": jnp.broadcast_to(params["ch_ln_g"], (NUM_LAYERS, BT, D)),
        "ch_ln_b": jnp.broadcast_to(params["ch_ln_b"], (NUM_LAYERS, BT, D)),
        "head_ln_g": jnp.broadcast_to(params["head_ln_g"], (BT, D)),
        "head_ln_b": jnp.broadcast_to(params["head_ln_b"], (BT, D)),
    }

    # lane-dense 2-D activation slab; no in-kernel reshape needed for x.
    x2 = x.reshape(BT, D)

    vmem = pl.BlockSpec(memory_space=pltpu.MemorySpace.VMEM)
    n_in = 1 + len(PARAM_ORDER)

    # No grid: a single kernel invocation with everything VMEM-resident.
    out = pl.pallas_call(
        mixer_kernel,
        out_shape=jax.ShapeDtypeStruct((B, D), jnp.float32),
        in_specs=[vmem] * n_in,
        out_specs=vmem,
    )(x2, *[prepped[k] for k in PARAM_ORDER])

    return out                                                 # (B, D)


# --------------------------- pure-JAX reference -------------------------------
def reference(x, p):
    def ln(v, g, b):
        mu = v.mean(-1, keepdims=True)
        var = ((v - mu) ** 2).mean(-1, keepdims=True)
        return (v - mu) / jnp.sqrt(var + EPS) * g + b

    for l in range(NUM_LAYERS):
        y = ln(x, p["tok_ln_g"][l], p["tok_ln_b"][l])
        yt = jnp.swapaxes(y, 1, 2)
        h = _gelu(yt @ p["tok_w1"][l] + p["tok_b1"][l])
        yt = h @ p["tok_w2"][l] + p["tok_b2"][l]
        x = x + jnp.swapaxes(yt, 1, 2)

        z = ln(x, p["ch_ln_g"][l], p["ch_ln_b"][l])
        h = _gelu(z @ p["ch_w1"][l] + p["ch_b1"][l])
        z = h @ p["ch_w2"][l] + p["ch_b2"][l]
        x = x + z

    xn = ln(x, p["head_ln_g"], p["head_ln_b"])
    return xn.mean(axis=1)


# ------------------------- deterministic parameters ---------------------------
def make_params(key):
    # Linear weights: trunc_normal(std=0.02); bounds are ~100 sigma so a plain
    # normal * 0.02 is equivalent.  Biases = 0, LayerNorm weight = 1 / bias = 0
    # (matching MixedStackedEncoder._init_weights).
    ks = jax.random.split(key, 4 * NUM_LAYERS)
    tw1 = jnp.stack([0.02 * jax.random.normal(ks[4 * l + 0], (T, LATENT)) for l in range(NUM_LAYERS)])
    tw2 = jnp.stack([0.02 * jax.random.normal(ks[4 * l + 1], (LATENT, T)) for l in range(NUM_LAYERS)])
    cw1 = jnp.stack([0.02 * jax.random.normal(ks[4 * l + 2], (D, LATENT)) for l in range(NUM_LAYERS)])
    cw2 = jnp.stack([0.02 * jax.random.normal(ks[4 * l + 3], (LATENT, D)) for l in range(NUM_LAYERS)])
    return {
        "tok_w1": tw1.astype(jnp.float32),
        "tok_b1": jnp.zeros((NUM_LAYERS, 1, LATENT), jnp.float32),
        "tok_w2": tw2.astype(jnp.float32),
        "tok_b2": jnp.zeros((NUM_LAYERS, 1, T), jnp.float32),
        "tok_ln_g": jnp.ones((NUM_LAYERS, 1, D), jnp.float32),
        "tok_ln_b": jnp.zeros((NUM_LAYERS, 1, D), jnp.float32),
        "ch_w1": cw1.astype(jnp.float32),
        "ch_b1": jnp.zeros((NUM_LAYERS, 1, LATENT), jnp.float32),
        "ch_w2": cw2.astype(jnp.float32),
        "ch_b2": jnp.zeros((NUM_LAYERS, 1, D), jnp.float32),
        "ch_ln_g": jnp.ones((NUM_LAYERS, 1, D), jnp.float32),
        "ch_ln_b": jnp.zeros((NUM_LAYERS, 1, D), jnp.float32),
        "head_ln_g": jnp.ones((1, D), jnp.float32),
        "head_ln_b": jnp.zeros((1, D), jnp.float32),
    }


# ----------------------------------- main -------------------------------------
if __name__ == "__main__":
    key = jax.random.PRNGKey(0)
    k_x, k_p = jax.random.split(key)
    x = jax.random.normal(k_x, (B, T, D), dtype=jnp.float32)
    params = make_params(k_p)

    out = jax.block_until_ready(mixed_stacked_encoder(x, params))
    ref = jax.block_until_ready(reference(x, params))

    assert out.shape == (B, D), out.shape
    max_err = np.max(np.abs(np.asarray(out) - np.asarray(ref)))
    assert np.allclose(np.asarray(out), np.asarray(ref), atol=2e-3, rtol=2e-3), max_err
    print("KERNEL_OK")
</pallas_src>

<mosaic_0001>
module attributes {stable_mosaic.version = 11 : i64} {
  func.func @mixer_kernel(%arg0: memref<16x32xf32, #tpu.memory_space<vmem>>, %arg1: memref<4x64x16xbf16, #tpu.memory_space<vmem>>, %arg2: memref<4x64x32xf32, #tpu.memory_space<vmem>>, %arg3: memref<4x16x64xbf16, #tpu.memory_space<vmem>>, %arg4: memref<4x16x32xf32, #tpu.memory_space<vmem>>, %arg5: memref<4x16x32xf32, #tpu.memory_space<vmem>>, %arg6: memref<4x16x32xf32, #tpu.memory_space<vmem>>, %arg7: memref<4x32x32xbf16, #tpu.memory_space<vmem>>, %arg8: memref<4x16x32xf32, #tpu.memory_space<vmem>>, %arg9: memref<4x32x32xbf16, #tpu.memory_space<vmem>>, %arg10: memref<4x16x32xf32, #tpu.memory_space<vmem>>, %arg11: memref<4x16x32xf32, #tpu.memory_space<vmem>>, %arg12: memref<4x16x32xf32, #tpu.memory_space<vmem>>, %arg13: memref<16x32xf32, #tpu.memory_space<vmem>>, %arg14: memref<16x32xf32, #tpu.memory_space<vmem>>, %arg15: memref<2x32xf32, #tpu.memory_space<vmem>>) attributes {dimension_semantics = [], scalar_prefetch = 0 : i64, scratch_operands = 0 : i64, tpu.core_type = #tpu.core_type<tc>} {
    %c0 = arith.constant 0 : index
    %c0_0 = arith.constant 0 : index
    %0 = vector.load %arg0[%c0, %c0_0] : memref<16x32xf32, #tpu.memory_space<vmem>>, vector<16x32xf32>
    %c0_1 = arith.constant 0 : index
    %c0_2 = arith.constant 0 : index
    %c0_3 = arith.constant 0 : index
    %1 = vector.load %arg5[%c0_1, %c0_2, %c0_3] : memref<4x16x32xf32, #tpu.memory_space<vmem>>, vector<1x16x32xf32>
    %2 = vector.shape_cast %1 : vector<1x16x32xf32> to vector<16x32xf32>
    %c0_4 = arith.constant 0 : index
    %c0_5 = arith.constant 0 : index
    %c0_6 = arith.constant 0 : index
    %3 = vector.load %arg6[%c0_4, %c0_5, %c0_6] : memref<4x16x32xf32, #tpu.memory_space<vmem>>, vector<1x16x32xf32>
    %4 = vector.shape_cast %3 : vector<1x16x32xf32> to vector<16x32xf32>
    %cst = arith.constant dense<0.000000e+00> : vector<16xf32>
    %5 = vector.multi_reduction <add>, %0, %cst [1] : vector<16x32xf32> to vector<16xf32>
    %6 = vector.shape_cast %5 : vector<16xf32> to vector<16x1xf32>
    %cst_7 = arith.constant 3.200000e+01 : f32
    %7 = vector.broadcast %cst_7 : f32 to vector<16x1xf32>
    %8 = arith.divf %6, %7 : vector<16x1xf32>
    %9 = vector.broadcast %8 : vector<16x1xf32> to vector<16x32xf32>
    %10 = arith.subf %0, %9 : vector<16x32xf32>
    %11 = arith.mulf %10, %10 : vector<16x32xf32>
    %cst_8 = arith.constant dense<0.000000e+00> : vector<16xf32>
    %12 = vector.multi_reduction <add>, %11, %cst_8 [1] : vector<16x32xf32> to vector<16xf32>
    %13 = vector.shape_cast %12 : vector<16xf32> to vector<16x1xf32>
    %cst_9 = arith.constant 3.200000e+01 : f32
    %14 = vector.broadcast %cst_9 : f32 to vector<16x1xf32>
    %15 = arith.divf %13, %14 : vector<16x1xf32>
    %16 = vector.broadcast %8 : vector<16x1xf32> to vector<16x32xf32>
    %17 = arith.subf %0, %16 : vector<16x32xf32>
    %cst_10 = arith.constant 9.99999974E-6 : f32
    %18 = vector.broadcast %cst_10 : f32 to vector<16x1xf32>
    %19 = arith.addf %15, %18 : vector<16x1xf32>
    %20 = math.rsqrt %19 : vector<16x1xf32>
    %21 = vector.broadcast %20 : vector<16x1xf32> to vector<16x32xf32>
    %22 = arith.mulf %17, %21 : vector<16x32xf32>
    %23 = arith.mulf %22, %2 : vector<16x32xf32>
    %24 = arith.addf %23, %4 : vector<16x32xf32>
    %c0_11 = arith.constant 0 : index
    %c0_12 = arith.constant 0 : index
    %c0_13 = arith.constant 0 : index
    %25 = vector.load %arg1[%c0_11, %c0_12, %c0_13] : memref<4x64x16xbf16, #tpu.memory_space<vmem>>, vector<1x64x16xbf16>
    %26 = vector.shape_cast %25 : vector<1x64x16xbf16> to vector<64x16xbf16>
    %27 = arith.truncf %24 : vector<16x32xf32> to vector<16x32xbf16>
    %cst_14 = arith.constant dense<0.000000e+00> : vector<64x32xf32>
    %28 = tpu.matmul %26, %27, %cst_14 {dimension_numbers = #tpu.dot_dimension_numbers<[1], [0], [0], [1], [0, 0, 1, 1], [], []>} : vector<64x16xbf16>, vector<16x32xbf16>, vector<64x32xf32> -> vector<64x32xf32>
    %c0_15 = arith.constant 0 : index
    %c0_16 = arith.constant 0 : index
    %c0_17 = arith.constant 0 : index
    %29 = vector.load %arg2[%c0_15, %c0_16, %c0_17] : memref<4x64x32xf32, #tpu.memory_space<vmem>>, vector<1x64x32xf32>
    %30 = vector.shape_cast %29 : vector<1x64x32xf32> to vector<64x32xf32>
    %31 = arith.addf %28, %30 : vector<64x32xf32>
    %cst_18 = arith.constant 5.000000e-01 : f32
    %32 = vector.broadcast %cst_18 : f32 to vector<64x32xf32>
    %33 = arith.mulf %32, %31 : vector<64x32xf32>
    %cst_19 = arith.constant 0.707106769 : f32
    %34 = vector.broadcast %cst_19 : f32 to vector<64x32xf32>
    %35 = arith.mulf %31, %34 : vector<64x32xf32>
    %36 = math.erf %35 : vector<64x32xf32>
    %cst_20 = arith.constant 1.000000e+00 : f32
    %37 = vector.broadcast %cst_20 : f32 to vector<64x32xf32>
    %38 = arith.addf %37, %36 : vector<64x32xf32>
    %39 = arith.mulf %33, %38 : vector<64x32xf32>
    %c0_21 = arith.constant 0 : index
    %c0_22 = arith.constant 0 : index
    %c0_23 = arith.constant 0 : index
    %40 = vector.load %arg3[%c0_21, %c0_22, %c0_23] : memref<4x16x64xbf16, #tpu.memory_space<vmem>>, vector<1x16x64xbf16>
    %41 = vector.shape_cast %40 : vector<1x16x64xbf16> to vector<16x64xbf16>
    %42 = arith.truncf %39 : vector<64x32xf32> to vector<64x32xbf16>
    %cst_24 = arith.constant dense<0.000000e+00> : vector<16x32xf32>
    %43 = tpu.matmul %41, %42, %cst_24 {dimension_numbers = #tpu.dot_dimension_numbers<[1], [0], [0], [1], [0, 0, 1, 1], [], []>} : vector<16x64xbf16>, vector<64x32xbf16>, vector<16x32xf32> -> vector<16x32xf32>
    %c0_25 = arith.constant 0 : index
    %c0_26 = arith.constant 0 : index
    %c0_27 = arith.constant 0 : index
    %44 = vector.load %arg4[%c0_25, %c0_26, %c0_27] : memref<4x16x32xf32, #tpu.memory_space<vmem>>, vector<1x16x32xf32>
    %45 = vector.shape_cast %44 : vector<1x16x32xf32> to vector<16x32xf32>
    %46 = arith.addf %43, %45 : vector<16x32xf32>
    %47 = arith.addf %0, %46 : vector<16x32xf32>
    %c0_28 = arith.constant 0 : index
    %c0_29 = arith.constant 0 : index
    %c0_30 = arith.constant 0 : index
    %48 = vector.load %arg11[%c0_28, %c0_29, %c0_30] : memref<4x16x32xf32, #tpu.memory_space<vmem>>, vector<1x16x32xf32>
    %49 = vector.shape_cast %48 : vector<1x16x32xf32> to vector<16x32xf32>
    %c0_31 = arith.constant 0 : index
    %c0_32 = arith.constant 0 : index
    %c0_33 = arith.constant 0 : index
    %50 = vector.load %arg12[%c0_31, %c0_32, %c0_33] : memref<4x16x32xf32, #tpu.memory_space<vmem>>, vector<1x16x32xf32>
    %51 = vector.shape_cast %50 : vector<1x16x32xf32> to vector<16x32xf32>
    %cst_34 = arith.constant dense<0.000000e+00> : vector<16xf32>
    %52 = vector.multi_reduction <add>, %47, %cst_34 [1] : vector<16x32xf32> to vector<16xf32>
    %53 = vector.shape_cast %52 : vector<16xf32> to vector<16x1xf32>
    %cst_35 = arith.constant 3.200000e+01 : f32
    %54 = vector.broadcast %cst_35 : f32 to vector<16x1xf32>
    %55 = arith.divf %53, %54 : vector<16x1xf32>
    %56 = vector.broadcast %55 : vector<16x1xf32> to vector<16x32xf32>
    %57 = arith.subf %47, %56 : vector<16x32xf32>
    %58 = arith.mulf %57, %57 : vector<16x32xf32>
    %cst_36 = arith.constant dense<0.000000e+00> : vector<16xf32>
    %59 = vector.multi_reduction <add>, %58, %cst_36 [1] : vector<16x32xf32> to vector<16xf32>
    %60 = vector.shape_cast %59 : vector<16xf32> to vector<16x1xf32>
    %cst_37 = arith.constant 3.200000e+01 : f32
    %61 = vector.broadcast %cst_37 : f32 to vector<16x1xf32>
    %62 = arith.divf %60, %61 : vector<16x1xf32>
    %63 = vector.broadcast %55 : vector<16x1xf32> to vector<16x32xf32>
    %64 = arith.subf %47, %63 : vector<16x32xf32>
    %cst_38 = arith.constant 9.99999974E-6 : f32
    %65 = vector.broadcast %cst_38 : f32 to vector<16x1xf32>
    %66 = arith.addf %62, %65 : vector<16x1xf32>
    %67 = math.rsqrt %66 : vector<16x1xf32>
    %68 = vector.broadcast %67 : vector<16x1xf32> to vector<16x32xf32>
    %69 = arith.mulf %64, %68 : vector<16x32xf32>
    %70 = arith.mulf %69, %49 : vector<16x32xf32>
    %71 = arith.addf %70, %51 : vector<16x32xf32>
    %72 = arith.truncf %71 : vector<16x32xf32> to vector<16x32xbf16>
    %c0_39 = arith.constant 0 : index
    %c0_40 = arith.constant 0 : index
    %c0_41 = arith.constant 0 : index
    %73 = vector.load %arg7[%c0_39, %c0_40, %c0_41] : memref<4x32x32xbf16, #tpu.memory_space<vmem>>, vector<1x32x32xbf16>
    %74 = vector.shape_cast %73 : vector<1x32x32xbf16> to vector<32x32xbf16>
    %cst_42 = arith.constant dense<0.000000e+00> : vector<16x32xf32>
    %75 = tpu.matmul %72, %74, %cst_42 {dimension_numbers = #tpu.dot_dimension_numbers<[1], [0], [0], [1], [0, 0, 1, 1], [], []>} : vector<16x32xbf16>, vector<32x32xbf16>, vector<16x32xf32> -> vector<16x32xf32>
    %c0_43 = arith.constant 0 : index
    %c0_44 = arith.constant 0 : index
    %c0_45 = arith.constant 0 : index
    %76 = vector.load %arg8[%c0_43, %c0_44, %c0_45] : memref<4x16x32xf32, #tpu.memory_space<vmem>>, vector<1x16x32xf32>
    %77 = vector.shape_cast %76 : vector<1x16x32xf32> to vector<16x32xf32>
    %78 = arith.addf %75, %77 : vector<16x32xf32>
    %cst_46 = arith.constant 5.000000e-01 : f32
    %79 = vector.broadcast %cst_46 : f32 to vector<16x32xf32>
    %80 = arith.mulf %79, %78 : vector<16x32xf32>
    %cst_47 = arith.constant 0.707106769 : f32
    %81 = vector.broadcast %cst_47 : f32 to vector<16x32xf32>
    %82 = arith.mulf %78, %81 : vector<16x32xf32>
    %83 = math.erf %82 : vector<16x32xf32>
    %cst_48 = arith.constant 1.000000e+00 : f32
    %84 = vector.broadcast %cst_48 : f32 to vector<16x32xf32>
    %85 = arith.addf %84, %83 : vector<16x32xf32>
    %86 = arith.mulf %80, %85 : vector<16x32xf32>
    %87 = arith.truncf %86 : vector<16x32xf32> to vector<16x32xbf16>
    %c0_49 = arith.constant 0 : index
    %c0_50 = arith.constant 0 : index
    %c0_51 = arith.constant 0 : index
    %88 = vector.load %arg9[%c0_49, %c0_50, %c0_51] : memref<4x32x32xbf16, #tpu.memory_space<vmem>>, vector<1x32x32xbf16>
    %89 = vector.shape_cast %88 : vector<1x32x32xbf16> to vector<32x32xbf16>
    %cst_52 = arith.constant dense<0.000000e+00> : vector<16x32xf32>
    %90 = tpu.matmul %87, %89, %cst_52 {dimension_numbers = #tpu.dot_dimension_numbers<[1], [0], [0], [1], [0, 0, 1, 1], [], []>} : vector<16x32xbf16>, vector<32x32xbf16>, vector<16x32xf32> -> vector<16x32xf32>
    %c0_53 = arith.constant 0 : index
    %c0_54 = arith.constant 0 : index
    %c0_55 = arith.constant 0 : index
    %91 = vector.load %arg10[%c0_53, %c0_54, %c0_55] : memref<4x16x32xf32, #tpu.memory_space<vmem>>, vector<1x16x32xf32>
    %92 = vector.shape_cast %91 : vector<1x16x32xf32> to vector<16x32xf32>
    %93 = arith.addf %90, %92 : vector<16x32xf32>
    %94 = arith.addf %47, %93 : vector<16x32xf32>
    %c1 = arith.constant 1 : index
    %c0_56 = arith.constant 0 : index
    %c0_57 = arith.constant 0 : index
    %95 = vector.load %arg5[%c1, %c0_56, %c0_57] : memref<4x16x32xf32, #tpu.memory_space<vmem>>, vector<1x16x32xf32>
    %96 = vector.shape_cast %95 : vector<1x16x32xf32> to vector<16x32xf32>
    %c1_58 = arith.constant 1 : index
    %c0_59 = arith.constant 0 : index
    %c0_60 = arith.constant 0 : index
    %97 = vector.load %arg6[%c1_58, %c0_59, %c0_60] : memref<4x16x32xf32, #tpu.memory_space<vmem>>, vector<1x16x32xf32>
    %98 = vector.shape_cast %97 : vector<1x16x32xf32> to vector<16x32xf32>
    %cst_61 = arith.constant dense<0.000000e+00> : vector<16xf32>
    %99 = vector.multi_reduction <add>, %94, %cst_61 [1] : vector<16x32xf32> to vector<16xf32>
    %100 = vector.shape_cast %99 : vector<16xf32> to vector<16x1xf32>
    %cst_62 = arith.constant 3.200000e+01 : f32
    %101 = vector.broadcast %cst_62 : f32 to vector<16x1xf32>
    %102 = arith.divf %100, %101 : vector<16x1xf32>
    %103 = vector.broadcast %102 : vector<16x1xf32> to vector<16x32xf32>
    %104 = arith.subf %94, %103 : vector<16x32xf32>
    %105 = arith.mulf %104, %104 : vector<16x32xf32>
    %cst_63 = arith.constant dense<0.000000e+00> : vector<16xf32>
    %106 = vector.multi_reduction <add>, %105, %cst_63 [1] : vector<16x32xf32> to vector<16xf32>
    %107 = vector.shape_cast %106 : vector<16xf32> to vector<16x1xf32>
    %cst_64 = arith.constant 3.200000e+01 : f32
    %108 = vector.broadcast %cst_64 : f32 to vector<16x1xf32>
    %109 = arith.divf %107, %108 : vector<16x1xf32>
    %110 = vector.broadcast %102 : vector<16x1xf32> to vector<16x32xf32>
    %111 = arith.subf %94, %110 : vector<16x32xf32>
    %cst_65 = arith.constant 9.99999974E-6 : f32
    %112 = vector.broadcast %cst_65 : f32 to vector<16x1xf32>
    %113 = arith.addf %109, %112 : vector<16x1xf32>
    %114 = math.rsqrt %113 : vector<16x1xf32>
    %115 = vector.broadcast %114 : vector<16x1xf32> to vector<16x32xf32>
    %116 = arith.mulf %111, %115 : vector<16x32xf32>
    %117 = arith.mulf %116, %96 : vector<16x32xf32>
    %118 = arith.addf %117, %98 : vector<16x32xf32>
    %c1_66 = arith.constant 1 : index
    %c0_67 = arith.constant 0 : index
    %c0_68 = arith.constant 0 : index
    %119 = vector.load %arg1[%c1_66, %c0_67, %c0_68] : memref<4x64x16xbf16, #tpu.memory_space<vmem>>, vector<1x64x16xbf16>
    %120 = vector.shape_cast %119 : vector<1x64x16xbf16> to vector<64x16xbf16>
    %121 = arith.truncf %118 : vector<16x32xf32> to vector<16x32xbf16>
    %cst_69 = arith.constant dense<0.000000e+00> : vector<64x32xf32>
    %122 = tpu.matmul %120, %121, %cst_69 {dimension_numbers = #tpu.dot_dimension_numbers<[1], [0], [0], [1], [0, 0, 1, 1], [], []>} : vector<64x16xbf16>, vector<16x32xbf16>, vector<64x32xf32> -> vector<64x32xf32>
    %c1_70 = arith.constant 1 : index
    %c0_71 = arith.constant 0 : index
    %c0_72 = arith.constant 0 : index
    %123 = vector.load %arg2[%c1_70, %c0_71, %c0_72] : memref<4x64x32xf32, #tpu.memory_space<vmem>>, vector<1x64x32xf32>
    %124 = vector.shape_cast %123 : vector<1x64x32xf32> to vector<64x32xf32>
    %125 = arith.addf %122, %124 : vector<64x32xf32>
    %cst_73 = arith.constant 5.000000e-01 : f32
    %126 = vector.broadcast %cst_73 : f32 to vector<64x32xf32>
    %127 = arith.mulf %126, %125 : vector<64x32xf32>
    %cst_74 = arith.constant 0.707106769 : f32
    %128 = vector.broadcast %cst_74 : f32 to vector<64x32xf32>
    %129 = arith.mulf %125, %128 : vector<64x32xf32>
    %130 = math.erf %129 : vector<64x32xf32>
    %cst_75 = arith.constant 1.000000e+00 : f32
    %131 = vector.broadcast %cst_75 : f32 to vector<64x32xf32>
    %132 = arith.addf %131, %130 : vector<64x32xf32>
    %133 = arith.mulf %127, %132 : vector<64x32xf32>
    %c1_76 = arith.constant 1 : index
    %c0_77 = arith.constant 0 : index
    %c0_78 = arith.constant 0 : index
    %134 = vector.load %arg3[%c1_76, %c0_77, %c0_78] : memref<4x16x64xbf16, #tpu.memory_space<vmem>>, vector<1x16x64xbf16>
    %135 = vector.shape_cast %134 : vector<1x16x64xbf16> to vector<16x64xbf16>
    %136 = arith.truncf %133 : vector<64x32xf32> to vector<64x32xbf16>
    %cst_79 = arith.constant dense<0.000000e+00> : vector<16x32xf32>
    %137 = tpu.matmul %135, %136, %cst_79 {dimension_numbers = #tpu.dot_dimension_numbers<[1], [0], [0], [1], [0, 0, 1, 1], [], []>} : vector<16x64xbf16>, vector<64x32xbf16>, vector<16x32xf32> -> vector<16x32xf32>
    %c1_80 = arith.constant 1 : index
    %c0_81 = arith.constant 0 : index
    %c0_82 = arith.constant 0 : index
    %138 = vector.load %arg4[%c1_80, %c0_81, %c0_82] : memref<4x16x32xf32, #tpu.memory_space<vmem>>, vector<1x16x32xf32>
    %139 = vector.shape_cast %138 : vector<1x16x32xf32> to vector<16x32xf32>
    %140 = arith.addf %137, %139 : vector<16x32xf32>
    %141 = arith.addf %94, %140 : vector<16x32xf32>
    %c1_83 = arith.constant 1 : index
    %c0_84 = arith.constant 0 : index
    %c0_85 = arith.constant 0 : index
    %142 = vector.load %arg11[%c1_83, %c0_84, %c0_85] : memref<4x16x32xf32, #tpu.memory_space<vmem>>, vector<1x16x32xf32>
    %143 = vector.shape_cast %142 : vector<1x16x32xf32> to vector<16x32xf32>
    %c1_86 = arith.constant 1 : index
    %c0_87 = arith.constant 0 : index
    %c0_88 = arith.constant 0 : index
    %144 = vector.load %arg12[%c1_86, %c0_87, %c0_88] : memref<4x16x32xf32, #tpu.memory_space<vmem>>, vector<1x16x32xf32>
    %145 = vector.shape_cast %144 : vector<1x16x32xf32> to vector<16x32xf32>
    %cst_89 = arith.constant dense<0.000000e+00> : vector<16xf32>
    %146 = vector.multi_reduction <add>, %141, %cst_89 [1] : vector<16x32xf32> to vector<16xf32>
    %147 = vector.shape_cast %146 : vector<16xf32> to vector<16x1xf32>
    %cst_90 = arith.constant 3.200000e+01 : f32
    %148 = vector.broadcast %cst_90 : f32 to vector<16x1xf32>
    %149 = arith.divf %147, %148 : vector<16x1xf32>
    %150 = vector.broadcast %149 : vector<16x1xf32> to vector<16x32xf32>
    %151 = arith.subf %141, %150 : vector<16x32xf32>
    %152 = arith.mulf %151, %151 : vector<16x32xf32>
    %cst_91 = arith.constant dense<0.000000e+00> : vector<16xf32>
    %153 = vector.multi_reduction <add>, %152, %cst_91 [1] : vector<16x32xf32> to vector<16xf32>
    %154 = vector.shape_cast %153 : vector<16xf32> to vector<16x1xf32>
    %cst_92 = arith.constant 3.200000e+01 : f32
    %155 = vector.broadcast %cst_92 : f32 to vector<16x1xf32>
    %156 = arith.divf %154, %155 : vector<16x1xf32>
    %157 = vector.broadcast %149 : vector<16x1xf32> to vector<16x32xf32>
    %158 = arith.subf %141, %157 : vector<16x32xf32>
    %cst_93 = arith.constant 9.99999974E-6 : f32
    %159 = vector.broadcast %cst_93 : f32 to vector<16x1xf32>
    %160 = arith.addf %156, %159 : vector<16x1xf32>
    %161 = math.rsqrt %160 : vector<16x1xf32>
    %162 = vector.broadcast %161 : vector<16x1xf32> to vector<16x32xf32>
    %163 = arith.mulf %158, %162 : vector<16x32xf32>
    %164 = arith.mulf %163, %143 : vector<16x32xf32>
    %165 = arith.addf %164, %145 : vector<16x32xf32>
    %166 = arith.truncf %165 : vector<16x32xf32> to vector<16x32xbf16>
    %c1_94 = arith.constant 1 : index
    %c0_95 = arith.constant 0 : index
    %c0_96 = arith.constant 0 : index
    %167 = vector.load %arg7[%c1_94, %c0_95, %c0_96] : memref<4x32x32xbf16, #tpu.memory_space<vmem>>, vector<1x32x32xbf16>
    %168 = vector.shape_cast %167 : vector<1x32x32xbf16> to vector<32x32xbf16>
    %cst_97 = arith.constant dense<0.000000e+00> : vector<16x32xf32>
    %169 = tpu.matmul %166, %168, %cst_97 {dimension_numbers = #tpu.dot_dimension_numbers<[1], [0], [0], [1], [0, 0, 1, 1], [], []>} : vector<16x32xbf16>, vector<32x32xbf16>, vector<16x32xf32> -> vector<16x32xf32>
    %c1_98 = arith.constant 1 : index
    %c0_99 = arith.constant 0 : index
    %c0_100 = arith.constant 0 : index
    %170 = vector.load %arg8[%c1_98, %c0_99, %c0_100] : memref<4x16x32xf32, #tpu.memory_space<vmem>>, vector<1x16x32xf32>
    %171 = vector.shape_cast %170 : vector<1x16x32xf32> to vector<16x32xf32>
    %172 = arith.addf %169, %171 : vector<16x32xf32>
    %cst_101 = arith.constant 5.000000e-01 : f32
    %173 = vector.broadcast %cst_101 : f32 to vector<16x32xf32>
    %174 = arith.mulf %173, %172 : vector<16x32xf32>
    %cst_102 = arith.constant 0.707106769 : f32
    %175 = vector.broadcast %cst_102 : f32 to vector<16x32xf32>
    %176 = arith.mulf %172, %175 : vector<16x32xf32>
    %177 = math.erf %176 : vector<16x32xf32>
    %cst_103 = arith.constant 1.000000e+00 : f32
    %178 = vector.broadcast %cst_103 : f32 to vector<16x32xf32>
    %179 = arith.addf %178, %177 : vector<16x32xf32>
    %180 = arith.mulf %174, %179 : vector<16x32xf32>
    %181 = arith.truncf %180 : vector<16x32xf32> to vector<16x32xbf16>
    %c1_104 = arith.constant 1 : index
    %c0_105 = arith.constant 0 : index
    %c0_106 = arith.constant 0 : index
    %182 = vector.load %arg9[%c1_104, %c0_105, %c0_106] : memref<4x32x32xbf16, #tpu.memory_space<vmem>>, vector<1x32x32xbf16>
    %183 = vector.shape_cast %182 : vector<1x32x32xbf16> to vector<32x32xbf16>
    %cst_107 = arith.constant dense<0.000000e+00> : vector<16x32xf32>
    %184 = tpu.matmul %181, %183, %cst_107 {dimension_numbers = #tpu.dot_dimension_numbers<[1], [0], [0], [1], [0, 0, 1, 1], [], []>} : vector<16x32xbf16>, vector<32x32xbf16>, vector<16x32xf32> -> vector<16x32xf32>
    %c1_108 = arith.constant 1 : index
    %c0_109 = arith.constant 0 : index
    %c0_110 = arith.constant 0 : index
    %185 = vector.load %arg10[%c1_108, %c0_109, %c0_110] : memref<4x16x32xf32, #tpu.memory_space<vmem>>, vector<1x16x32xf32>
    %186 = vector.shape_cast %185 : vector<1x16x32xf32> to vector<16x32xf32>
    %187 = arith.addf %184, %186 : vector<16x32xf32>
    %188 = arith.addf %141, %187 : vector<16x32xf32>
    %c2 = arith.constant 2 : index
    %c0_111 = arith.constant 0 : index
    %c0_112 = arith.constant 0 : index
    %189 = vector.load %arg5[%c2, %c0_111, %c0_112] : memref<4x16x32xf32, #tpu.memory_space<vmem>>, vector<1x16x32xf32>
    %190 = vector.shape_cast %189 : vector<1x16x32xf32> to vector<16x32xf32>
    %c2_113 = arith.constant 2 : index
    %c0_114 = arith.constant 0 : index
    %c0_115 = arith.constant 0 : index
    %191 = vector.load %arg6[%c2_113, %c0_114, %c0_115] : memref<4x16x32xf32, #tpu.memory_space<vmem>>, vector<1x16x32xf32>
    %192 = vector.shape_cast %191 : vector<1x16x32xf32> to vector<16x32xf32>
    %cst_116 = arith.constant dense<0.000000e+00> : vector<16xf32>
    %193 = vector.multi_reduction <add>, %188, %cst_116 [1] : vector<16x32xf32> to vector<16xf32>
    %194 = vector.shape_cast %193 : vector<16xf32> to vector<16x1xf32>
    %cst_117 = arith.constant 3.200000e+01 : f32
    %195 = vector.broadcast %cst_117 : f32 to vector<16x1xf32>
    %196 = arith.divf %194, %195 : vector<16x1xf32>
    %197 = vector.broadcast %196 : vector<16x1xf32> to vector<16x32xf32>
    %198 = arith.subf %188, %197 : vector<16x32xf32>
    %199 = arith.mulf %198, %198 : vector<16x32xf32>
    %cst_118 = arith.constant dense<0.000000e+00> : vector<16xf32>
    %200 = vector.multi_reduction <add>, %199, %cst_118 [1] : vector<16x32xf32> to vector<16xf32>
    %201 = vector.shape_cast %200 : vector<16xf32> to vector<16x1xf32>
    %cst_119 = arith.constant 3.200000e+01 : f32
    %202 = vector.broadcast %cst_119 : f32 to vector<16x1xf32>
    %203 = arith.divf %201, %202 : vector<16x1xf32>
    %204 = vector.broadcast %196 : vector<16x1xf32> to vector<16x32xf32>
    %205 = arith.subf %188, %204 : vector<16x32xf32>
    %cst_120 = arith.constant 9.99999974E-6 : f32
    %206 = vector.broadcast %cst_120 : f32 to vector<16x1xf32>
    %207 = arith.addf %203, %206 : vector<16x1xf32>
    %208 = math.rsqrt %207 : vector<16x1xf32>
    %209 = vector.broadcast %208 : vector<16x1xf32> to vector<16x32xf32>
    %210 = arith.mulf %205, %209 : vector<16x32xf32>
    %211 = arith.mulf %210, %190 : vector<16x32xf32>
    %212 = arith.addf %211, %192 : vector<16x32xf32>
    %c2_121 = arith.constant 2 : index
    %c0_122 = arith.constant 0 : index
    %c0_123 = arith.constant 0 : index
    %213 = vector.load %arg1[%c2_121, %c0_122, %c0_123] : memref<4x64x16xbf16, #tpu.memory_space<vmem>>, vector<1x64x16xbf16>
    %214 = vector.shape_cast %213 : vector<1x64x16xbf16> to vector<64x16xbf16>
    %215 = arith.truncf %212 : vector<16x32xf32> to vector<16x32xbf16>
    %cst_124 = arith.constant dense<0.000000e+00> : vector<64x32xf32>
    %216 = tpu.matmul %214, %215, %cst_124 {dimension_numbers = #tpu.dot_dimension_numbers<[1], [0], [0], [1], [0, 0, 1, 1], [], []>} : vector<64x16xbf16>, vector<16x32xbf16>, vector<64x32xf32> -> vector<64x32xf32>
    %c2_125 = arith.constant 2 : index
    %c0_126 = arith.constant 0 : index
    %c0_127 = arith.constant 0 : index
    %217 = vector.load %arg2[%c2_125, %c0_126, %c0_127] : memref<4x64x32xf32, #tpu.memory_space<vmem>>, vector<1x64x32xf32>
    %218 = vector.shape_cast %217 : vector<1x64x32xf32> to vector<64x32xf32>
    %219 = arith.addf %216, %218 : vector<64x32xf32>
    %cst_128 = arith.constant 5.000000e-01 : f32
    %220 = vector.broadcast %cst_128 : f32 to vector<64x32xf32>
    %221 = arith.mulf %220, %219 : vector<64x32xf32>
    %cst_129 = arith.constant 0.707106769 : f32
    %222 = vector.broadcast %cst_129 : f32 to vector<64x32xf32>
    %223 = arith.mulf %219, %222 : vector<64x32xf32>
    %224 = math.erf %223 : vector<64x32xf32>
    %cst_130 = arith.constant 1.000000e+00 : f32
    %225 = vector.broadcast %cst_130 : f32 to vector<64x32xf32>
    %226 = arith.addf %225, %224 : vector<64x32xf32>
    %227 = arith.mulf %221, %226 : vector<64x32xf32>
    %c2_131 = arith.constant 2 : index
    %c0_132 = arith.constant 0 : index
    %c0_133 = arith.constant 0 : index
    %228 = vector.load %arg3[%c2_131, %c0_132, %c0_133] : memref<4x16x64xbf16, #tpu.memory_space<vmem>>, vector<1x16x64xbf16>
    %229 = vector.shape_cast %228 : vector<1x16x64xbf16> to vector<16x64xbf16>
    %230 = arith.truncf %227 : vector<64x32xf32> to vector<64x32xbf16>
    %cst_134 = arith.constant dense<0.000000e+00> : vector<16x32xf32>
    %231 = tpu.matmul %229, %230, %cst_134 {dimension_numbers = #tpu.dot_dimension_numbers<[1], [0], [0], [1], [0, 0, 1, 1], [], []>} : vector<16x64xbf16>, vector<64x32xbf16>, vector<16x32xf32> -> vector<16x32xf32>
    %c2_135 = arith.constant 2 : index
    %c0_136 = arith.constant 0 : index
    %c0_137 = arith.constant 0 : index
    %232 = vector.load %arg4[%c2_135, %c0_136, %c0_137] : memref<4x16x32xf32, #tpu.memory_space<vmem>>, vector<1x16x32xf32>
    %233 = vector.shape_cast %232 : vector<1x16x32xf32> to vector<16x32xf32>
    %234 = arith.addf %231, %233 : vector<16x32xf32>
    %235 = arith.addf %188, %234 : vector<16x32xf32>
    %c2_138 = arith.constant 2 : index
    %c0_139 = arith.constant 0 : index
    %c0_140 = arith.constant 0 : index
    %236 = vector.load %arg11[%c2_138, %c0_139, %c0_140] : memref<4x16x32xf32, #tpu.memory_space<vmem>>, vector<1x16x32xf32>
    %237 = vector.shape_cast %236 : vector<1x16x32xf32> to vector<16x32xf32>
    %c2_141 = arith.constant 2 : index
    %c0_142 = arith.constant 0 : index
    %c0_143 = arith.constant 0 : index
    %238 = vector.load %arg12[%c2_141, %c0_142, %c0_143] : memref<4x16x32xf32, #tpu.memory_space<vmem>>, vector<1x16x32xf32>
    %239 = vector.shape_cast %238 : vector<1x16x32xf32> to vector<16x32xf32>
    %cst_144 = arith.constant dense<0.000000e+00> : vector<16xf32>
    %240 = vector.multi_reduction <add>, %235, %cst_144 [1] : vector<16x32xf32> to vector<16xf32>
    %241 = vector.shape_cast %240 : vector<16xf32> to vector<16x1xf32>
    %cst_145 = arith.constant 3.200000e+01 : f32
    %242 = vector.broadcast %cst_145 : f32 to vector<16x1xf32>
    %243 = arith.divf %241, %242 : vector<16x1xf32>
    %244 = vector.broadcast %243 : vector<16x1xf32> to vector<16x32xf32>
    %245 = arith.subf %235, %244 : vector<16x32xf32>
    %246 = arith.mulf %245, %245 : vector<16x32xf32>
    %cst_146 = arith.constant dense<0.000000e+00> : vector<16xf32>
    %247 = vector.multi_reduction <add>, %246, %cst_146 [1] : vector<16x32xf32> to vector<16xf32>
    %248 = vector.shape_cast %247 : vector<16xf32> to vector<16x1xf32>
    %cst_147 = arith.constant 3.200000e+01 : f32
    %249 = vector.broadcast %cst_147 : f32 to vector<16x1xf32>
    %250 = arith.divf %248, %249 : vector<16x1xf32>
    %251 = vector.broadcast %243 : vector<16x1xf32> to vector<16x32xf32>
    %252 = arith.subf %235, %251 : vector<16x32xf32>
    %cst_148 = arith.constant 9.99999974E-6 : f32
    %253 = vector.broadcast %cst_148 : f32 to vector<16x1xf32>
    %254 = arith.addf %250, %253 : vector<16x1xf32>
    %255 = math.rsqrt %254 : vector<16x1xf32>
    %256 = vector.broadcast %255 : vector<16x1xf32> to vector<16x32xf32>
    %257 = arith.mulf %252, %256 : vector<16x32xf32>
    %258 = arith.mulf %257, %237 : vector<16x32xf32>
    %259 = arith.addf %258, %239 : vector<16x32xf32>
    %260 = arith.truncf %259 : vector<16x32xf32> to vector<16x32xbf16>
    %c2_149 = arith.constant 2 : index
    %c0_150 = arith.constant 0 : index
    %c0_151 = arith.constant 0 : index
    %261 = vector.load %arg7[%c2_149, %c0_150, %c0_151] : memref<4x32x32xbf16, #tpu.memory_space<vmem>>, vector<1x32x32xbf16>
    %262 = vector.shape_cast %261 : vector<1x32x32xbf16> to vector<32x32xbf16>
    %cst_152 = arith.constant dense<0.000000e+00> : vector<16x32xf32>
    %263 = tpu.matmul %260, %262, %cst_152 {dimension_numbers = #tpu.dot_dimension_numbers<[1], [0], [0], [1], [0, 0, 1, 1], [], []>} : vector<16x32xbf16>, vector<32x32xbf16>, vector<16x32xf32> -> vector<16x32xf32>
    %c2_153 = arith.constant 2 : index
    %c0_154 = arith.constant 0 : index
    %c0_155 = arith.constant 0 : index
    %264 = vector.load %arg8[%c2_153, %c0_154, %c0_155] : memref<4x16x32xf32, #tpu.memory_space<vmem>>, vector<1x16x32xf32>
    %265 = vector.shape_cast %264 : vector<1x16x32xf32> to vector<16x32xf32>
    %266 = arith.addf %263, %265 : vector<16x32xf32>
    %cst_156 = arith.constant 5.000000e-01 : f32
    %267 = vector.broadcast %cst_156 : f32 to vector<16x32xf32>
    %268 = arith.mulf %267, %266 : vector<16x32xf32>
    %cst_157 = arith.constant 0.707106769 : f32
    %269 = vector.broadcast %cst_157 : f32 to vector<16x32xf32>
    %270 = arith.mulf %266, %269 : vector<16x32xf32>
    %271 = math.erf %270 : vector<16x32xf32>
    %cst_158 = arith.constant 1.000000e+00 : f32
    %272 = vector.broadcast %cst_158 : f32 to vector<16x32xf32>
    %273 = arith.addf %272, %271 : vector<16x32xf32>
    %274 = arith.mulf %268, %273 : vector<16x32xf32>
    %275 = arith.truncf %274 : vector<16x32xf32> to vector<16x32xbf16>
    %c2_159 = arith.constant 2 : index
    %c0_160 = arith.constant 0 : index
    %c0_161 = arith.constant 0 : index
    %276 = vector.load %arg9[%c2_159, %c0_160, %c0_161] : memref<4x32x32xbf16, #tpu.memory_space<vmem>>, vector<1x32x32xbf16>
    %277 = vector.shape_cast %276 : vector<1x32x32xbf16> to vector<32x32xbf16>
    %cst_162 = arith.constant dense<0.000000e+00> : vector<16x32xf32>
    %278 = tpu.matmul %275, %277, %cst_162 {dimension_numbers = #tpu.dot_dimension_numbers<[1], [0], [0], [1], [0, 0, 1, 1], [], []>} : vector<16x32xbf16>, vector<32x32xbf16>, vector<16x32xf32> -> vector<16x32xf32>
    %c2_163 = arith.constant 2 : index
    %c0_164 = arith.constant 0 : index
    %c0_165 = arith.constant 0 : index
    %279 = vector.load %arg10[%c2_163, %c0_164, %c0_165] : memref<4x16x32xf32, #tpu.memory_space<vmem>>, vector<1x16x32xf32>
    %280 = vector.shape_cast %279 : vector<1x16x32xf32> to vector<16x32xf32>
    %281 = arith.addf %278, %280 : vector<16x32xf32>
    %282 = arith.addf %235, %281 : vector<16x32xf32>
    %c3 = arith.constant 3 : index
    %c0_166 = arith.constant 0 : index
    %c0_167 = arith.constant 0 : index
    %283 = vector.load %arg5[%c3, %c0_166, %c0_167] : memref<4x16x32xf32, #tpu.memory_space<vmem>>, vector<1x16x32xf32>
    %284 = vector.shape_cast %283 : vector<1x16x32xf32> to vector<16x32xf32>
    %c3_168 = arith.constant 3 : index
    %c0_169 = arith.constant 0 : index
    %c0_170 = arith.constant 0 : index
    %285 = vector.load %arg6[%c3_168, %c0_169, %c0_170] : memref<4x16x32xf32, #tpu.memory_space<vmem>>, vector<1x16x32xf32>
    %286 = vector.shape_cast %285 : vector<1x16x32xf32> to vector<16x32xf32>
    %cst_171 = arith.constant dense<0.000000e+00> : vector<16xf32>
    %287 = vector.multi_reduction <add>, %282, %cst_171 [1] : vector<16x32xf32> to vector<16xf32>
    %288 = vector.shape_cast %287 : vector<16xf32> to vector<16x1xf32>
    %cst_172 = arith.constant 3.200000e+01 : f32
    %289 = vector.broadcast %cst_172 : f32 to vector<16x1xf32>
    %290 = arith.divf %288, %289 : vector<16x1xf32>
    %291 = vector.broadcast %290 : vector<16x1xf32> to vector<16x32xf32>
    %292 = arith.subf %282, %291 : vector<16x32xf32>
    %293 = arith.mulf %292, %292 : vector<16x32xf32>
    %cst_173 = arith.constant dense<0.000000e+00> : vector<16xf32>
    %294 = vector.multi_reduction <add>, %293, %cst_173 [1] : vector<16x32xf32> to vector<16xf32>
    %295 = vector.shape_cast %294 : vector<16xf32> to vector<16x1xf32>
    %cst_174 = arith.constant 3.200000e+01 : f32
    %296 = vector.broadcast %cst_174 : f32 to vector<16x1xf32>
    %297 = arith.divf %295, %296 : vector<16x1xf32>
    %298 = vector.broadcast %290 : vector<16x1xf32> to vector<16x32xf32>
    %299 = arith.subf %282, %298 : vector<16x32xf32>
    %cst_175 = arith.constant 9.99999974E-6 : f32
    %300 = vector.broadcast %cst_175 : f32 to vector<16x1xf32>
    %301 = arith.addf %297, %300 : vector<16x1xf32>
    %302 = math.rsqrt %301 : vector<16x1xf32>
    %303 = vector.broadcast %302 : vector<16x1xf32> to vector<16x32xf32>
    %304 = arith.mulf %299, %303 : vector<16x32xf32>
    %305 = arith.mulf %304, %284 : vector<16x32xf32>
    %306 = arith.addf %305, %286 : vector<16x32xf32>
    %c3_176 = arith.constant 3 : index
    %c0_177 = arith.constant 0 : index
    %c0_178 = arith.constant 0 : index
    %307 = vector.load %arg1[%c3_176, %c0_177, %c0_178] : memref<4x64x16xbf16, #tpu.memory_space<vmem>>, vector<1x64x16xbf16>
    %308 = vector.shape_cast %307 : vector<1x64x16xbf16> to vector<64x16xbf16>
    %309 = arith.truncf %306 : vector<16x32xf32> to vector<16x32xbf16>
    %cst_179 = arith.constant dense<0.000000e+00> : vector<64x32xf32>
    %310 = tpu.matmul %308, %309, %cst_179 {dimension_numbers = #tpu.dot_dimension_numbers<[1], [0], [0], [1], [0, 0, 1, 1], [], []>} : vector<64x16xbf16>, vector<16x32xbf16>, vector<64x32xf32> -> vector<64x32xf32>
    %c3_180 = arith.constant 3 : index
    %c0_181 = arith.constant 0 : index
    %c0_182 = arith.constant 0 : index
    %311 = vector.load %arg2[%c3_180, %c0_181, %c0_182] : memref<4x64x32xf32, #tpu.memory_space<vmem>>, vector<1x64x32xf32>
    %312 = vector.shape_cast %311 : vector<1x64x32xf32> to vector<64x32xf32>
    %313 = arith.addf %310, %312 : vector<64x32xf32>
    %cst_183 = arith.constant 5.000000e-01 : f32
    %314 = vector.broadcast %cst_183 : f32 to vector<64x32xf32>
    %315 = arith.mulf %314, %313 : vector<64x32xf32>
    %cst_184 = arith.constant 0.707106769 : f32
    %316 = vector.broadcast %cst_184 : f32 to vector<64x32xf32>
    %317 = arith.mulf %313, %316 : vector<64x32xf32>
    %318 = math.erf %317 : vector<64x32xf32>
    %cst_185 = arith.constant 1.000000e+00 : f32
    %319 = vector.broadcast %cst_185 : f32 to vector<64x32xf32>
    %320 = arith.addf %319, %318 : vector<64x32xf32>
    %321 = arith.mulf %315, %320 : vector<64x32xf32>
    %c3_186 = arith.constant 3 : index
    %c0_187 = arith.constant 0 : index
    %c0_188 = arith.constant 0 : index
    %322 = vector.load %arg3[%c3_186, %c0_187, %c0_188] : memref<4x16x64xbf16, #tpu.memory_space<vmem>>, vector<1x16x64xbf16>
    %323 = vector.shape_cast %322 : vector<1x16x64xbf16> to vector<16x64xbf16>
    %324 = arith.truncf %321 : vector<64x32xf32> to vector<64x32xbf16>
    %cst_189 = arith.constant dense<0.000000e+00> : vector<16x32xf32>
    %325 = tpu.matmul %323, %324, %cst_189 {dimension_numbers = #tpu.dot_dimension_numbers<[1], [0], [0], [1], [0, 0, 1, 1], [], []>} : vector<16x64xbf16>, vector<64x32xbf16>, vector<16x32xf32> -> vector<16x32xf32>
    %c3_190 = arith.constant 3 : index
    %c0_191 = arith.constant 0 : index
    %c0_192 = arith.constant 0 : index
    %326 = vector.load %arg4[%c3_190, %c0_191, %c0_192] : memref<4x16x32xf32, #tpu.memory_space<vmem>>, vector<1x16x32xf32>
    %327 = vector.shape_cast %326 : vector<1x16x32xf32> to vector<16x32xf32>
    %328 = arith.addf %325, %327 : vector<16x32xf32>
    %329 = arith.addf %282, %328 : vector<16x32xf32>
    %c3_193 = arith.constant 3 : index
    %c0_194 = arith.constant 0 : index
    %c0_195 = arith.constant 0 : index
    %330 = vector.load %arg11[%c3_193, %c0_194, %c0_195] : memref<4x16x32xf32, #tpu.memory_space<vmem>>, vector<1x16x32xf32>
    %331 = vector.shape_cast %330 : vector<1x16x32xf32> to vector<16x32xf32>
    %c3_196 = arith.constant 3 : index
    %c0_197 = arith.constant 0 : index
    %c0_198 = arith.constant 0 : index
    %332 = vector.load %arg12[%c3_196, %c0_197, %c0_198] : memref<4x16x32xf32, #tpu.memory_space<vmem>>, vector<1x16x32xf32>
    %333 = vector.shape_cast %332 : vector<1x16x32xf32> to vector<16x32xf32>
    %cst_199 = arith.constant dense<0.000000e+00> : vector<16xf32>
    %334 = vector.multi_reduction <add>, %329, %cst_199 [1] : vector<16x32xf32> to vector<16xf32>
    %335 = vector.shape_cast %334 : vector<16xf32> to vector<16x1xf32>
    %cst_200 = arith.constant 3.200000e+01 : f32
    %336 = vector.broadcast %cst_200 : f32 to vector<16x1xf32>
    %337 = arith.divf %335, %336 : vector<16x1xf32>
    %338 = vector.broadcast %337 : vector<16x1xf32> to vector<16x32xf32>
    %339 = arith.subf %329, %338 : vector<16x32xf32>
    %340 = arith.mulf %339, %339 : vector<16x32xf32>
    %cst_201 = arith.constant dense<0.000000e+00> : vector<16xf32>
    %341 = vector.multi_reduction <add>, %340, %cst_201 [1] : vector<16x32xf32> to vector<16xf32>
    %342 = vector.shape_cast %341 : vector<16xf32> to vector<16x1xf32>
    %cst_202 = arith.constant 3.200000e+01 : f32
    %343 = vector.broadcast %cst_202 : f32 to vector<16x1xf32>
    %344 = arith.divf %342, %343 : vector<16x1xf32>
    %345 = vector.broadcast %337 : vector<16x1xf32> to vector<16x32xf32>
    %346 = arith.subf %329, %345 : vector<16x32xf32>
    %cst_203 = arith.constant 9.99999974E-6 : f32
    %347 = vector.broadcast %cst_203 : f32 to vector<16x1xf32>
    %348 = arith.addf %344, %347 : vector<16x1xf32>
    %349 = math.rsqrt %348 : vector<16x1xf32>
    %350 = vector.broadcast %349 : vector<16x1xf32> to vector<16x32xf32>
    %351 = arith.mulf %346, %350 : vector<16x32xf32>
    %352 = arith.mulf %351, %331 : vector<16x32xf32>
    %353 = arith.addf %352, %333 : vector<16x32xf32>
    %354 = arith.truncf %353 : vector<16x32xf32> to vector<16x32xbf16>
    %c3_204 = arith.constant 3 : index
    %c0_205 = arith.constant 0 : index
    %c0_206 = arith.constant 0 : index
    %355 = vector.load %arg7[%c3_204, %c0_205, %c0_206] : memref<4x32x32xbf16, #tpu.memory_space<vmem>>, vector<1x32x32xbf16>
    %356 = vector.shape_cast %355 : vector<1x32x32xbf16> to vector<32x32xbf16>
    %cst_207 = arith.constant dense<0.000000e+00> : vector<16x32xf32>
    %357 = tpu.matmul %354, %356, %cst_207 {dimension_numbers = #tpu.dot_dimension_numbers<[1], [0], [0], [1], [0, 0, 1, 1], [], []>} : vector<16x32xbf16>, vector<32x32xbf16>, vector<16x32xf32> -> vector<16x32xf32>
    %c3_208 = arith.constant 3 : index
    %c0_209 = arith.constant 0 : index
    %c0_210 = arith.constant 0 : index
    %358 = vector.load %arg8[%c3_208, %c0_209, %c0_210] : memref<4x16x32xf32, #tpu.memory_space<vmem>>, vector<1x16x32xf32>
    %359 = vector.shape_cast %358 : vector<1x16x32xf32> to vector<16x32xf32>
    %360 = arith.addf %357, %359 : vector<16x32xf32>
    %cst_211 = arith.constant 5.000000e-01 : f32
    %361 = vector.broadcast %cst_211 : f32 to vector<16x32xf32>
    %362 = arith.mulf %361, %360 : vector<16x32xf32>
    %cst_212 = arith.constant 0.707106769 : f32
    %363 = vector.broadcast %cst_212 : f32 to vector<16x32xf32>
    %364 = arith.mulf %360, %363 : vector<16x32xf32>
    %365 = math.erf %364 : vector<16x32xf32>
    %cst_213 = arith.constant 1.000000e+00 : f32
    %366 = vector.broadcast %cst_213 : f32 to vector<16x32xf32>
    %367 = arith.addf %366, %365 : vector<16x32xf32>
    %368 = arith.mulf %362, %367 : vector<16x32xf32>
    %369 = arith.truncf %368 : vector<16x32xf32> to vector<16x32xbf16>
    %c3_214 = arith.constant 3 : index
    %c0_215 = arith.constant 0 : index
    %c0_216 = arith.constant 0 : index
    %370 = vector.load %arg9[%c3_214, %c0_215, %c0_216] : memref<4x32x32xbf16, #tpu.memory_space<vmem>>, vector<1x32x32xbf16>
    %371 = vector.shape_cast %370 : vector<1x32x32xbf16> to vector<32x32xbf16>
    %cst_217 = arith.constant dense<0.000000e+00> : vector<16x32xf32>
    %372 = tpu.matmul %369, %371, %cst_217 {dimension_numbers = #tpu.dot_dimension_numbers<[1], [0], [0], [1], [0, 0, 1, 1], [], []>} : vector<16x32xbf16>, vector<32x32xbf16>, vector<16x32xf32> -> vector<16x32xf32>
    %c3_218 = arith.constant 3 : index
    %c0_219 = arith.constant 0 : index
    %c0_220 = arith.constant 0 : index
    %373 = vector.load %arg10[%c3_218, %c0_219, %c0_220] : memref<4x16x32xf32, #tpu.memory_space<vmem>>, vector<1x16x32xf32>
    %374 = vector.shape_cast %373 : vector<1x16x32xf32> to vector<16x32xf32>
    %375 = arith.addf %372, %374 : vector<16x32xf32>
    %376 = arith.addf %329, %375 : vector<16x32xf32>
    %c0_221 = arith.constant 0 : index
    %c0_222 = arith.constant 0 : index
    %377 = vector.load %arg13[%c0_221, %c0_222] : memref<16x32xf32, #tpu.memory_space<vmem>>, vector<16x32xf32>
    %c0_223 = arith.constant 0 : index
    %c0_224 = arith.constant 0 : index
    %378 = vector.load %arg14[%c0_223, %c0_224] : memref<16x32xf32, #tpu.memory_space<vmem>>, vector<16x32xf32>
    %cst_225 = arith.constant dense<0.000000e+00> : vector<16xf32>
    %379 = vector.multi_reduction <add>, %376, %cst_225 [1] : vector<16x32xf32> to vector<16xf32>
    %380 = vector.shape_cast %379 : vector<16xf32> to vector<16x1xf32>
    %cst_226 = arith.constant 3.200000e+01 : f32
    %381 = vector.broadcast %cst_226 : f32 to vector<16x1xf32>
    %382 = arith.divf %380, %381 : vector<16x1xf32>
    %383 = vector.broadcast %382 : vector<16x1xf32> to vector<16x32xf32>
    %384 = arith.subf %376, %383 : vector<16x32xf32>
    %385 = arith.mulf %384, %384 : vector<16x32xf32>
    %cst_227 = arith.constant dense<0.000000e+00> : vector<16xf32>
    %386 = vector.multi_reduction <add>, %385, %cst_227 [1] : vector<16x32xf32> to vector<16xf32>
    %387 = vector.shape_cast %386 : vector<16xf32> to vector<16x1xf32>
    %cst_228 = arith.constant 3.200000e+01 : f32
    %388 = vector.broadcast %cst_228 : f32 to vector<16x1xf32>
    %389 = arith.divf %387, %388 : vector<16x1xf32>
    %390 = vector.broadcast %382 : vector<16x1xf32> to vector<16x32xf32>
    %391 = arith.subf %376, %390 : vector<16x32xf32>
    %cst_229 = arith.constant 9.99999974E-6 : f32
    %392 = vector.broadcast %cst_229 : f32 to vector<16x1xf32>
    %393 = arith.addf %389, %392 : vector<16x1xf32>
    %394 = math.rsqrt %393 : vector<16x1xf32>
    %395 = vector.broadcast %394 : vector<16x1xf32> to vector<16x32xf32>
    %396 = arith.mulf %391, %395 : vector<16x32xf32>
    %397 = arith.mulf %396, %377 : vector<16x32xf32>
    %398 = arith.addf %397, %378 : vector<16x32xf32>
    %399 = vector.shape_cast %398 : vector<16x32xf32> to vector<2x8x32xf32>
    %cst_230 = arith.constant dense<0.000000e+00> : vector<2x32xf32>
    %400 = vector.multi_reduction <add>, %399, %cst_230 [1] : vector<2x8x32xf32> to vector<2x32xf32>
    %cst_231 = arith.constant 8.000000e+00 : f32
    %401 = vector.broadcast %cst_231 : f32 to vector<2x32xf32>
    %402 = arith.divf %400, %401 : vector<2x32xf32>
    %c0_232 = arith.constant 0 : index
    %c0_233 = arith.constant 0 : index
    %403 = vector.load %arg15[%c0_232, %c0_233] : memref<2x32xf32, #tpu.memory_space<vmem>>, vector<2x32xf32>
    tpu.vector_store %arg15[%c0_232, %c0_233], %402 {strides = array<i32>} : memref<2x32xf32, #tpu.memory_space<vmem>>, vector<2x32xf32>,
    return
  }
}

</mosaic_0001>

<bundles_post_ra>
// kernel: tpu_custom_call.1
= control target key start
LH: loop header
LB: loop body
LE: loop exit
PB: predicated region body
PF: predicated region fallthrough
CT: control target
= control target key end

     0   :  { %20 = vsyncpa [#allocation3], 0  ;;  %s5971_s0 = inlined_call_operand.hbm [shape: f32[16,32], index: 0, kind: input, shape index: {}]   ;;  %s5972_s1 = inlined_call_operand.vmem [shape: bf16[4,64,16], index: 1, kind: input, shape index: {}]   ;;  %s5973_s2 = inlined_call_operand.vmem [shape: f32[4,64,32], index: 2, kind: input, shape index: {}]   ;;  %s5974_s3 = inlined_call_operand.vmem [shape: bf16[4,16,64], index: 3, kind: input, shape index: {}]   ;;  %s5975_s4 = inlined_call_operand.vmem [shape: f32[4,16,32], index: 4, kind: input, shape index: {}]   ;;  %s5976_s5 = inlined_call_operand.vmem [shape: f32[4,16,32], index: 5, kind: input, shape index: {}]   ;;  %s5977_s6 = inlined_call_operand.vmem [shape: f32[4,16,32], index: 6, kind: input, shape index: {}]   ;;  %s5978_s7 = inlined_call_operand.vmem [shape: bf16[4,32,32], index: 7, kind: input, shape index: {}]   ;;  %s5979_s8 = inlined_call_operand.vmem [shape: f32[4,16,32], index: 8, kind: input, shape index: {}]   ;;  %s5980_s9 = inlined_call_operand.vmem [shape: bf16[4,32,32], index: 9, kind: input, shape index: {}]   ;;  %s5981_s10 = inlined_call_operand.hbm [shape: f32[4,16,32], index: 10, kind: input, shape index: {}]   ;;  %s5982_s11 = inlined_call_operand.hbm [shape: f32[4,16,32], index: 11, kind: input, shape index: {}]   ;;  %s5983_s12 = inlined_call_operand.hbm [shape: f32[4,16,32], index: 12, kind: input, shape index: {}]   ;;  %s5984_s13 = inlined_call_operand.hbm [shape: f32[16,32], index: 13, kind: input, shape index: {}]   ;;  %s5985_s14 = inlined_call_operand.hbm [shape: f32[16,32], index: 14, kind: input, shape index: {}]   ;;  %s5986_s15 = inlined_call_operand.hbm [shape: f32[2,32], index: 15, kind: output, shape index: {}]  }
   0x1   :  { %21 = vsyncpa [#allocation6], 0 }
   0x2   :  { %22 = vsyncpa [#allocation9], 0 }
   0x3   :  { %23 = vsyncpa [#allocation12], 0 }
   0x4   :  { %24 = vsyncpa [#allocation4], 0  ;;  %s60_s20 = sshll.u32 %s5981_s10, 4  ;;  %s3868_s21 = smov [#allocation5]   ;;  %s61_s20 = int_to_ptr.hbm [resolvable:$true] %s60_s20 }
   0x5   :  { %s62_s22 = sshll.u32 %s3868_s21, 4  ;;  %s86_s25 = sshll.u32 %s5983_s12, 4  ;;  %s63_s22 = int_to_ptr.vmem [resolvable:$true] %s62_s22  ;;  %s87_s25 = int_to_ptr.hbm [resolvable:$true] %s86_s25 }
   0x6   :  { %s3869_s26 = smov 128   ;;  %s3870_s27 = smov 8  }
   0x7   :  { %68 = dma.hbm_to_vmem [thread:$0]  %s61_s20, 1024, %s63_s22, [#allocation6], %s3869_s26, %s3869_s26, %s3870_s27  }
   0x8   :  { %s3871_s28 = smov [#allocation8]   ;;  %s29_s10 = sshll.u32 %s5971_s0, 4  ;;  %s30_s10 = int_to_ptr.hbm [resolvable:$true] %s29_s10 }
   0x9   :  { %s88_s29 = sshll.u32 %s3871_s28, 4  ;;  %s73_s18 = sshll.u32 %s5982_s11, 4  ;;  %s89_s29 = int_to_ptr.vmem [resolvable:$true] %s88_s29  ;;  %s74_s18 = int_to_ptr.hbm [resolvable:$true] %s73_s18 }
   0xa   :  { %94 = dma.hbm_to_vmem [thread:$0]  %s87_s25, 1024, %s89_s29, [#allocation9], %s3869_s26, %s3869_s26, %s3870_s27  }
   0xb   :  { %s3872_s19 = smov [#allocation2]   ;;  %s3873_s20 = smov [#allocation7]  }
   0xc   :  { %s31_s21 = sshll.u32 %s3872_s19, 4  ;;  %s75_s0 = sshll.u32 %s3873_s20, 4  ;;  %s32_s21 = int_to_ptr.vmem [resolvable:$true] %s31_s21  ;;  %s76_s0 = int_to_ptr.vmem [resolvable:$true] %s75_s0 }
   0xd   :  { %37 = dma.hbm_to_vmem [thread:$0]  %s30_s10, 256, %s32_s21, [#allocation3], %s3869_s26, %s3869_s26, %s3870_s27  }
   0xe   :  { %s99_s24 = sshll.u32 %s5984_s13, 4  ;;  %s112_s28 = sshll.u32 %s5985_s14, 4  ;;  %s100_s24 = int_to_ptr.hbm [resolvable:$true] %s99_s24  ;;  %s113_s28 = int_to_ptr.hbm [resolvable:$true] %s112_s28 }
   0xf   :  { %81 = dma.hbm_to_vmem [thread:$0]  %s74_s18, 1024, %s76_s0, [#allocation6], %s3869_s26, %s3869_s26, %s3870_s27  }
  0x10   :  { %s3874_s29 = smov [#allocation10]   ;;  %s3875_s16 = smov [#allocation11]  }
  0x11   :  { %s101_s30 = sshll.u32 %s3874_s29, 4  ;;  %s114_s13 = sshll.u32 %s3875_s16, 4  ;;  %s102_s30 = int_to_ptr.vmem [resolvable:$true] %s101_s30  ;;  %s115_s13 = int_to_ptr.vmem [resolvable:$true] %s114_s13 }
  0x12   :  { %107 = dma.hbm_to_vmem [thread:$0]  %s100_s24, 256, %s102_s30, [#allocation9], %s3869_s26, %s3869_s26, %s3870_s27  }
  0x13   :  { %120 = dma.hbm_to_vmem [thread:$0]  %s113_s28, 256, %s115_s13, [#allocation12], %s3869_s26, %s3869_s26, %s3870_s27  }
  0x14   :  { %3858 = dma.done.wait [#allocation3], 256  }
  0x15   :  { %3859 = vsyncadd [#allocation3], 4294967040 }
  0x16   :  { %3860 = dma.done.wait [#allocation6], 2048  }
  0x17   :  { %3861 = vsyncadd [#allocation6], 4294965248 }
  0x18   :  { %3862 = dma.done.wait [#allocation9], 1280  }
  0x19   :  { %3863 = vsyncadd [#allocation9], 4294966016 }
  0x1a   :  { %3864 = dma.done.wait [#allocation12], 256  }
  0x1b   :  { %3865 = vsyncadd [#allocation12], 4294967040  ;;  %vm152_vm0 = vcmask 261120   ;;  %v3995_v0 = vld [vmem:[#allocation2] sm:$0xff]  ;;  %v3999_v2 = vld [vmem:[#allocation2 + $0x8] sm:$0xff]  ;;  %v3876_v4 = vmov 32.0  }
  0x1c   :  { %v153_v1 = vsel %vm152_vm0, %v3995_v0, 0.0  ;;  %v156_v3 = vsel %vm152_vm0, %v3999_v2, 0.0  ;;  %3570 = vrcp.f32 %v3876_v4  ;;  %v148_v41 = vld [vmem:[%s5976_s5] sm:$0xff]  ;;  %v149_v42 = vld [vmem:[%s5976_s5 + $0x8] sm:$0xff]  ;;  %v3525_v53 = vld [vmem:[%s5972_s1 + $0x18] sm:$0xff]  ;;  %vm245_vm8 = vcmask 130048  }
  0x1d   :  { %154 = vadd.xlane.f32.xlu0 %v153_v1  ;;  %v150_v46 = vld [vmem:[%s5977_s6] sm:$0xff]  ;;  %v151_v47 = vld [vmem:[%s5977_s6 + $0x8] sm:$0xff]  ;;  %v3524_v55 = vld [vmem:[%s5972_s1 + $0x10] sm:$0xff]  ;;  %s3195_s10 = sshll.u32 %s5986_s15, 4  ;;  %s3196_s10 = int_to_ptr.hbm [resolvable:$true] %s3195_s10 }
  0x1e   :  { %v3522_v52 = vld [vmem:[%s5972_s1] sm:$0xff]  ;;  %v3523_v54 = vld [vmem:[%s5972_s1 + $0x8] sm:$0xff]  ;;  %v223_v58 = vld [vmem:[%s5973_s2 + $0x30] sm:$0xff] }
  0x1f   :  { %v217_v57 = vld [vmem:[%s5973_s2] sm:$0xff]  ;;  %v224_v4 = vld [vmem:[%s5973_s2 + $0x38] sm:$0xff] }
  0x22   :  { %v3571_v5 = vpop.eup %3570 }
  0x23   :  { %v160_v6 = vmul.f32 32.0, %v3571_v5  ;;  %vm164_vm1 = vweird.f32 %v3571_v5 }
  0x25   :  { %157 = vadd.xlane.f32.xlu0 %v156_v3  ;;  %v161_v7 = vsub.f32 1.0, %v160_v6 }
  0x27   :  { %v162_v8 = vmul.f32 %v3571_v5, %v161_v7 }
  0x29   :  { %v163_v9 = vadd.f32 %v3571_v5, %v162_v8 }
  0x2b   :  { %v4003_v10 = vsel %vm164_vm1, %v3571_v5, %v163_v9 }
  0x2c   :  { %6000 = vst [vmem:[#allocation19_spill] sm:$0xff] %v4003_v10 }
  0x90   :  { %v155_v11 = vpop.xlane.xlu0 %154 }
  0x91   :  { %v166_v12 = vmul.f32 %v4003_v10, %v155_v11  ;;  %v219_v11 = vld [vmem:[%s5973_s2 + $0x10] sm:$0xff] }
  0x93   :  { %v168_v13 = vsub.f32 %v3995_v0, %v166_v12 }
  0x95   :  { %v170_v14 = vmul.f32 %v168_v13, %v168_v13 }
  0x97   :  { %v172_v15 = vsel %vm152_vm0, %v170_v14, 0.0 }
  0x98   :  { %173 = vadd.xlane.f32.xlu1 %v172_v15  ;;  %v158_v16 = vpop.xlane.xlu0 %157 }
  0x99   :  { %v167_v17 = vmul.f32 %v4003_v10, %v158_v16  ;;  %v218_v16 = vld [vmem:[%s5973_s2 + $0x8] sm:$0xff] }
  0x9b   :  { %v169_v18 = vsub.f32 %v3999_v2, %v167_v17 }
  0x9d   :  { %v171_v19 = vmul.f32 %v169_v18, %v169_v18 }
  0x9f   :  { %v175_v20 = vsel %vm152_vm0, %v171_v19, 0.0 }
  0xa0   :  { %176 = vadd.xlane.f32.xlu1 %v175_v20 }
 0x10b   :  { %v174_v21 = vpop.xlane.xlu1 %173 }
 0x10c   :  { %v178_v22 = vmul.f32 %v174_v21, %v4003_v10 }
 0x10e   :  { %v180_v23 = vadd.f32 1e-05, %v178_v22 }
 0x110   :  { %3572 = vrsqrt.f32 %v180_v23  ;;  %vm188_vm3 = vweird.f32 %v180_v23 }
 0x113   :  { %v177_v24 = vpop.xlane.xlu1 %176 }
 0x114   :  { %v179_v25 = vmul.f32 %v177_v24, %v4003_v10 }
 0x116   :  { %v3573_v26 = vpop.eup %3572  ;;  %v181_v27 = vadd.f32 1e-05, %v179_v25 }
 0x117   :  { %v183_v28 = vmul.f32 %v3573_v26, %v180_v23  ;;  %vm189_vm2 = vweird.f32 %v3573_v26 }
 0x118   :  { %3574 = vrsqrt.f32 %v181_v27  ;;  %vm190_vm4 = vmor %vm188_vm3, %vm189_vm2  ;;  %vm198_vm6 = vweird.f32 %v181_v27 }
 0x119   :  { %v184_v29 = vmul.f32 %v3573_v26, %v183_v28 }
 0x11b   :  { %v185_v30 = vmul.f32 0.5, %v184_v29 }
 0x11d   :  { %v186_v31 = vsub.f32 1.5, %v185_v30 }
 0x11e   :  { %v3575_v32 = vpop.eup %3574 }
 0x11f   :  { %v187_v33 = vmul.f32 %v3573_v26, %v186_v31  ;;  %v193_v34 = vmul.f32 %v3575_v32, %v181_v27  ;;  %vm199_vm5 = vweird.f32 %v3575_v32 }
 0x120   :  { %vm200_vm7 = vmor %vm198_vm6, %vm199_vm5 }
 0x121   :  { %v194_v35 = vmul.f32 %v3575_v32, %v193_v34  ;;  %v191_v37 = vsel %vm190_vm4, %v3573_v26, %v187_v33  ;;  %v220_v33 = vld [vmem:[%s5973_s2 + $0x18] sm:$0xff] }
 0x122   :  { %v202_v39 = vmul.f32 %v191_v37, %v168_v13 }
 0x123   :  { %v195_v36 = vmul.f32 0.5, %v194_v35 }
 0x124   :  { %v204_v45 = vmul.f32 %v202_v39, %v148_v41 }
 0x125   :  { %v196_v38 = vsub.f32 1.5, %v195_v36 }
 0x126   :  { %v206_v49 = vadd.f32 %v204_v45, %v150_v46 }
 0x127   :  { %v197_v40 = vmul.f32 %v3575_v32, %v196_v38 }
 0x129   :  { %v201_v43 = vsel %vm200_vm7, %v3575_v32, %v197_v40 }
 0x12a   :  { %v203_v44 = vmul.f32 %v201_v43, %v169_v18 }
 0x12c   :  { %v205_v48 = vmul.f32 %v203_v44, %v149_v42 }
 0x12e   :  { %v207_v50 = vadd.f32 %v205_v48, %v151_v47 }
 0x130   :  { %v216_v51 = vpack.c.bf16 %v207_v50, %v206_v49  ;;  %v221_v50 = vld [vmem:[%s5973_s2 + $0x20] sm:$0xff] }
 0x132   :  { %265 = vmatpush.bf16.msra.mxu0 %v216_v51  ;;  %3558 = vmatpush.bf16.msra.mxu3 %v216_v51 }
 0x135   :  { %3224 = vmatmul.msk.bf16.vlgmr.msra.gmra.mxu0 %vm245_vm8, %v3522_v52  ;;  %3227 = vmatmul.msk.bf16.vlgmr.msra.gmra.mxu3 %vm245_vm8, %v3525_v53 }
 0x145   :  { %3225 = vmatmul.msk.bf16.gmra.mxu0 %vm245_vm8, %v3523_v54 }
 0x155   :  { %3226 = vmatmul.msk.bf16.gmra.mxu0 %vm245_vm8, %v3524_v55 }
 0x1b2   :  { %v267_v56 = vpop.f32.mrf.mxu0 }
 0x1b3   :  { %v4047_v59 = vadd.f32 %v267_v56, %v217_v57 }
 0x1b5   :  { %v4052_v63 = vmul.f32 0.70710677, %v4047_v59 }
 0x1b7   :  { %v303_v5 = vmul.f32 %v4052_v63, %v4052_v63 }
 0x1b8   :  { %v282_v60 = vpop.f32.mrf.mxu3 }
 0x1b9   :  { %v4049_v61 = vadd.f32 %v282_v60, %v223_v58  ;;  %v4073_v14 = vmin.f32 %v303_v5, 16.0 }
 0x1ba   :  { %v269_v62 = vpop.f32.mrf.mxu0 }
 0x1bb   :  { %v4055_v1 = vmul.f32 0.70710677, %v4049_v61  ;;  %v4083_v20 = vadd.f32 %v269_v62, %v218_v16  ;;  %v316_v25 = vmul.f32 3.8918573e-05, %v4073_v14  ;;  %v305_v29 = vmul.f32 2.1237322e-06, %v4073_v14 }
 0x1bd   :  { %v543_v3 = vmul.f32 %v4055_v1, %v4055_v1  ;;  %v4099_v30 = vmul.f32 0.70710677, %v4083_v20  ;;  %v317_v38 = vadd.f32 0.001143296, %v316_v25  ;;  %v306_v46 = vadd.f32 0.00028619796, %v305_v29 }
 0x1be   :  { %v222_v25 = vld [vmem:[%s5973_s2 + $0x28] sm:$0xff] }
 0x1bf   :  { %v4064_v6 = vmin.f32 %v543_v3, 16.0  ;;  %v343_v42 = vmul.f32 %v4099_v30, %v4099_v30  ;;  %v318_v52 = vmul.f32 %v317_v38, %v4073_v14  ;;  %v307_v60 = vmul.f32 %v306_v46, %v4073_v14 }
 0x1c0   :  { %v284_v7 = vpop.f32.mrf.mxu3 }
 0x1c1   :  { %v545_v8 = vmul.f32 2.1237322e-06, %v4064_v6  ;;  %v4067_v9 = vadd.f32 %v284_v7, %v224_v4  ;;  %v556_v13 = vmul.f32 3.8918573e-05, %v4064_v6  ;;  %v4122_v54 = vmin.f32 %v343_v42, 16.0 }
 0x1c2   :  { %v272_v12 = vpop.f32.mrf.mxu0  ;;  %v319_v7 = vadd.f32 0.014752088, %v318_v52 }
 0x1c3   :  { %v546_v15 = vadd.f32 0.00028619796, %v545_v8  ;;  %v4079_v17 = vmul.f32 0.70710677, %v4067_v9  ;;  %v4081_v18 = vadd.f32 %v272_v12, %v219_v11  ;;  %v557_v19 = vadd.f32 0.001143296, %v556_v13 }
 0x1c4   :  { %v345_v13 = vmul.f32 2.1237322e-06, %v4122_v54 }
 0x1c5   :  { %v583_v21 = vmul.f32 %v4079_v17, %v4079_v17  ;;  %v4088_v22 = vmul.f32 0.70710677, %v4081_v18  ;;  %v558_v23 = vmul.f32 %v557_v19, %v4064_v6  ;;  %v547_v24 = vmul.f32 %v546_v15, %v4064_v6 }
 0x1c6   :  { %v308_v19 = vadd.f32 0.0036580483, %v307_v60 }
 0x1c7   :  { %v4093_v26 = vmin.f32 %v583_v21, 16.0  ;;  %v383_v27 = vmul.f32 %v4088_v22, %v4088_v22  ;;  %v559_v28 = vadd.f32 0.014752088, %v558_v23  ;;  %v548_v36 = vadd.f32 0.0036580483, %v547_v24 }
 0x1c8   :  { %v4159_v38 = vmul.f32 %v308_v19, %v4073_v14 }
 0x1c9   :  { %v585_v31 = vmul.f32 2.1237322e-06, %v4093_v26  ;;  %v4102_v32 = vmin.f32 %v383_v27, 16.0  ;;  %v560_v35 = vmul.f32 %v559_v28, %v4064_v6  ;;  %v596_v37 = vmul.f32 3.8918573e-05, %v4093_v26 }
 0x1ca   :  { %v274_v34 = vpop.f32.mrf.mxu0  ;;  %v549_v48 = vmul.f32 %v548_v36, %v4064_v6  ;;  %v4150_v27 = vmul.f32 0.5, %v4049_v61 }
 0x1cb   :  { %v586_v39 = vadd.f32 0.00028619796, %v585_v31  ;;  %v385_v40 = vmul.f32 2.1237322e-06, %v4102_v32  ;;  %v561_v41 = vadd.f32 0.112945676, %v560_v35  ;;  %v4113_v44 = vadd.f32 %v274_v34, %v220_v33 }
 0x1cc   :  { %v597_v47 = vadd.f32 0.001143296, %v596_v37  ;;  %v550_v3 = vadd.f32 0.05243302, %v549_v48  ;;  %v396_v12 = vmul.f32 3.8918573e-05, %v4102_v32  ;;  %v320_v37 = vmul.f32 %v319_v7, %v4073_v14 }
 0x1cd   :  { %v587_v43 = vmul.f32 %v586_v39, %v4093_v26  ;;  %v562_v45 = vmul.f32 %v561_v41, %v4064_v6  ;;  %v386_v49 = vadd.f32 0.00028619796, %v385_v40  ;;  %v4125_v56 = vmul.f32 0.70710677, %v4113_v44 }
 0x1ce   :  { %v598_v53 = vmul.f32 %v597_v47, %v4093_v26  ;;  %v551_v23 = vmul.f32 %v550_v3, %v4064_v6  ;;  %v397_v31 = vadd.f32 0.001143296, %v396_v12  ;;  %v346_v33 = vadd.f32 0.00028619796, %v345_v13 }
 0x1cf   :  { %v563_v51 = vadd.f32 0.4994258, %v562_v45  ;;  %v588_v55 = vadd.f32 0.0036580483, %v587_v43  ;;  %v387_v4 = vmul.f32 %v386_v49, %v4102_v32  ;;  %v423_v16 = vmul.f32 %v4125_v56, %v4125_v56 }
 0x1d0   :  { %v599_v11 = vadd.f32 0.014752088, %v598_v53  ;;  %v552_v42 = vadd.f32 0.18741608, %v551_v23  ;;  %v398_v46 = vmul.f32 %v397_v31, %v4102_v32  ;;  %v4170_v47 = vmul.f32 0.5, %v4067_v9 }
 0x1d1   :  { %v564_v58 = vmul.f32 %v563_v51, %v4064_v6  ;;  %v589_v15 = vmul.f32 %v588_v55, %v4093_v26  ;;  %v388_v24 = vadd.f32 0.0036580483, %v387_v4  ;;  %v4155_v35 = vmin.f32 %v423_v16, 16.0 }
 0x1d2   :  { %v277_v57 = vpop.f32.mrf.mxu0  ;;  %v600_v29 = vmul.f32 %v599_v11, %v4093_v26  ;;  %v347_v51 = vmul.f32 %v346_v33, %v4122_v54  ;;  %v321_v55 = vadd.f32 0.112945676, %v320_v37  ;;  %v553_v3 = vmul.f32 %v552_v42, %v4064_v6 }
 0x1d3   :  { %v4129_v62 = vadd.f32 %v277_v57, %v221_v50  ;;  %v4132_v5 = vadd.f32 1.0, %v564_v58  ;;  %v590_v34 = vadd.f32 0.05243302, %v589_v15  ;;  %v389_v43 = vmul.f32 %v388_v24, %v4102_v32 }
 0x1d4   :  { %v601_v61 = vadd.f32 0.112945676, %v600_v29  ;;  %v425_v53 = vmul.f32 2.1237322e-06, %v4155_v35  ;;  %v399_v11 = vadd.f32 0.014752088, %v398_v46 }
 0x1d5   :  { %v4135_v8 = vmul.f32 0.70710677, %v4129_v62  ;;  %3576 = vrcp.f32 %v4132_v5  ;;  %v591_v52 = vmul.f32 %v590_v34, %v4093_v26  ;;  %v390_v4 = vadd.f32 0.05243302, %v389_v43 }
 0x1d6   :  { %v602_v60 = vmul.f32 %v601_v61, %v4093_v26  ;;  %v426_v19 = vadd.f32 0.00028619796, %v425_v53  ;;  %vm571_vm9 = vweird.f32 %v4132_v5  ;;  %v400_v23 = vmul.f32 %v399_v11, %v4102_v32 }
 0x1d7   :  { %v463_v21 = vmul.f32 %v4135_v8, %v4135_v8  ;;  %v592_v24 = vadd.f32 0.18741608, %v591_v52  ;;  %v575_v6 = vand.u32 2147483647, %v4132_v5 }
 0x1d8   :  { %v603_v16 = vadd.f32 0.4994258, %v602_v60  ;;  %v427_v42 = vmul.f32 %v426_v19, %v4155_v35  ;;  %v401_v46 = vadd.f32 0.112945676, %v400_v23  ;;  %v322_v19 = vmul.f32 %v321_v55, %v4073_v14 }
 0x1d9   :  { %v4152_v28 = vmin.f32 %v463_v21, 16.0  ;;  %vm576_vm12 = vcmp.eq.f32.partialorder %v575_v6, 8.507059e+37 }
 0x1da   :  { %v279_v36 = vpop.f32.mrf.mxu0  ;;  %v604_v29 = vmul.f32 %v603_v16, %v4093_v26  ;;  %v428_v11 = vadd.f32 0.0036580483, %v427_v42 }
 0x1db   :  { %v465_v39 = vmul.f32 2.1237322e-06, %v4152_v28  ;;  %v4162_v40 = vadd.f32 %v279_v36, %v222_v25  ;;  %v4164_v41 = vpop.eup %3576  ;;  %v476_v45 = vmul.f32 3.8918573e-05, %v4152_v28 }
 0x1dc   :  { %v567_v50 = vmul.f32 %v4164_v41, %v4132_v5  ;;  %vm572_vm10 = vweird.f32 %v4164_v41  ;;  %v4199_v61 = vadd.f32 1.0, %v604_v29 }
 0x1dd   :  { %v466_v48 = vadd.f32 0.00028619796, %v465_v39  ;;  %v4173_v49 = vmul.f32 0.70710677, %v4162_v40  ;;  %v477_v7 = vadd.f32 0.001143296, %v476_v45  ;;  %vm4208_vm11 = vmor %vm571_vm9, %vm572_vm10 }
 0x1de   :  { %v568_v58 = vsub.f32 1.0, %v567_v50  ;;  %v577_v39 = vand.u32 2147483648, %v4132_v5  ;;  %v4203_v50 = vadd.f32 0.0036580483, %v347_v51  ;;  %3578 = vrcp.f32 %v4199_v61 }
 0x1df   :  { %v467_v57 = vmul.f32 %v466_v48, %v4152_v28  ;;  %v503_v9 = vmul.f32 %v4173_v49, %v4173_v49  ;;  %v478_v21 = vmul.f32 %v477_v7, %v4152_v28  ;;  %v554_v48 = vadd.f32 1.1283791, %v553_v3 }
 0x1e0   :  { %v569_v15 = vmul.f32 %v4164_v41, %v568_v58  ;;  %v436_v51 = vmul.f32 3.8918573e-05, %v4155_v35  ;;  %v578_v7 = vor.u32 1.1754944e-38, %v577_v39  ;;  %v615_v39 = vand.u32 2147483647, %v4199_v61 }
 0x1e1   :  { %v468_v12 = vadd.f32 0.0036580483, %v467_v57  ;;  %v4185_v13 = vmin.f32 %v503_v9, 16.0  ;;  %v479_v33 = vadd.f32 0.014752088, %v478_v21  ;;  %v593_v57 = vmul.f32 %v592_v24, %v4093_v26 }
 0x1e2   :  { %v570_v31 = vadd.f32 %v4164_v41, %v569_v15  ;;  %v391_v9 = vmul.f32 %v390_v4, %v4102_v32  ;;  %v402_v15 = vmul.f32 %v401_v46, %v4102_v32  ;;  %v555_v26 = vmul.f32 %v554_v48, %v4055_v1 }
 0x1e3   :  { %v505_v25 = vmul.f32 2.1237322e-06, %v4185_v13  ;;  %v516_v34 = vmul.f32 3.8918573e-05, %v4185_v13  ;;  %v469_v36 = vmul.f32 %v468_v12, %v4152_v28  ;;  %v480_v43 = vmul.f32 %v479_v33, %v4152_v28 }
 0x1e4   :  { %v574_v58 = vsel %vm4208_vm11, %v4164_v41, %v570_v31  ;;  %v403_v23 = vadd.f32 0.4994258, %v402_v15  ;;  %v437_v24 = vadd.f32 0.001143296, %v436_v51  ;;  %v594_v29 = vadd.f32 1.1283791, %v593_v57 }
 0x1e5   :  { %v506_v37 = vadd.f32 0.00028619796, %v505_v25  ;;  %v517_v45 = vadd.f32 0.001143296, %v516_v34  ;;  %v470_v60 = vadd.f32 0.05243302, %v469_v36  ;;  %v579_v16 = vsel %vm576_vm12, %v578_v7, %v574_v58  ;;  %v3579_v25 = vpop.eup %3578 }
 0x1e6   :  { %v481_v12 = vadd.f32 0.112945676, %v480_v43  ;;  %v392_v31 = vadd.f32 0.18741608, %v391_v9  ;;  %v429_v34 = vmul.f32 %v428_v11, %v4155_v35  ;;  %v607_v1 = vmul.f32 %v3579_v25, %v4199_v61 }
 0x1e7   :  { %v507_v52 = vmul.f32 %v506_v37, %v4185_v13  ;;  %v518_v5 = vmul.f32 %v517_v45, %v4185_v13  ;;  %v471_v6 = vmul.f32 %v470_v60, %v4152_v28  ;;  %v404_v55 = vmul.f32 %v403_v23, %v4102_v32 }
 0x1e8   :  { %v482_v21 = vmul.f32 %v481_v12, %v4152_v28  ;;  %v580_v37 = vmul.f32 %v579_v16, %v555_v26  ;;  %v438_v43 = vmul.f32 %v437_v24, %v4155_v35  ;;  %v608_v46 = vsub.f32 1.0, %v607_v1 }
 0x1e9   :  { %v508_v3 = vadd.f32 0.0036580483, %v507_v52  ;;  %v519_v4 = vadd.f32 0.014752088, %v518_v5  ;;  %v4233_v52 = vadd.f32 1.0, %v404_v55  ;;  %vm612_vm13 = vweird.f32 %v3579_v25 }
 0x1ea   :  { %v483_v36 = vadd.f32 0.4994258, %v482_v21  ;;  %v472_v53 = vadd.f32 0.18741608, %v471_v6  ;;  %v617_v57 = vand.u32 2147483648, %v4199_v61  ;;  %v609_v58 = vmul.f32 %v3579_v25, %v608_v46 }
 0x1eb   :  { %v509_v41 = vmul.f32 %v508_v3, %v4185_v13  ;;  %v520_v33 = vmul.f32 %v519_v4, %v4185_v13  ;;  %3580 = vrcp.f32 %v4233_v52  ;;  %v439_v60 = vadd.f32 0.014752088, %v438_v43 }
 0x1ec   :  { %v484_v48 = vmul.f32 %v483_v36, %v4152_v28  ;;  %v595_v3 = vmul.f32 %v594_v29, %v4079_v17  ;;  %v3234_v7 = vclamps-f32 %v580_v37, 1.0  ;;  %v323_v11 = vadd.f32 0.4994258, %v322_v19 }
 0x1ed   :  { %v521_v42 = vadd.f32 0.112945676, %v520_v33  ;;  %v510_v45 = vadd.f32 0.05243302, %v509_v41  ;;  %v610_v15 = vadd.f32 %v3579_v25, %v609_v58  ;;  %vm611_vm14 = vweird.f32 %v4199_v61 }
 0x1ee   :  { %v4237_v51 = vadd.f32 1.0, %v484_v48  ;;  %v430_v26 = vadd.f32 0.05243302, %v429_v34  ;;  %v473_v16 = vmul.f32 %v472_v53, %v4152_v28  ;;  %vm613_vm15 = vmor %vm611_vm14, %vm612_vm13  ;;  %v618_v4 = vor.u32 1.1754944e-38, %v617_v57 }
 0x1ef   :  { %v522_v9 = vmul.f32 %v521_v42, %v4185_v13  ;;  %v511_v12 = vmul.f32 %v510_v45, %v4185_v13  ;;  %v614_v21 = vsel %vm613_vm15, %v3579_v25, %v610_v15  ;;  %vm616_vm1 = vcmp.eq.f32.partialorder %v615_v39, 8.507059e+37 }
 0x1f0   :  { %3582 = vrcp.f32 %v4237_v51  ;;  %v440_v17 = vmul.f32 %v439_v60, %v4155_v35  ;;  %v356_v19 = vmul.f32 3.8918573e-05, %v4122_v54  ;;  %v619_v23 = vsel %vm616_vm1, %v618_v4, %v614_v21 }
 0x1f1   :  { %v523_v5 = vadd.f32 0.4994258, %v522_v9  ;;  %v629_v24 = vadd.f32 1.0, %v3234_v7  ;;  %v324_v61 = vmul.f32 %v323_v11, %v4073_v14  ;;  %v4252_v6 = vpop.eup %3580  ;;  %v4255_v28 = vadd.f32 0.05243302, %v4159_v38 }
 0x1f2   :  { %v512_v33 = vadd.f32 0.18741608, %v511_v12  ;;  %v620_v34 = vmul.f32 %v619_v23, %v595_v3  ;;  %v441_v1 = vadd.f32 0.112945676, %v440_v17  ;;  %v4259_v25 = vmul.f32 %v4203_v50, %v4122_v54 }
 0x1f3   :  { %v524_v41 = vmul.f32 %v523_v5, %v4185_v13  ;;  %v393_v36 = vmul.f32 %v392_v31, %v4102_v32  ;;  %v474_v55 = vadd.f32 1.1283791, %v473_v16  ;;  %v407_v42 = vmul.f32 %v4252_v6, %v4233_v52 }
 0x1f4   :  { %v3235_v39 = vclamps-f32 %v620_v34, 1.0  ;;  %v442_v38 = vmul.f32 %v441_v1, %v4155_v35  ;;  %v357_v43 = vadd.f32 0.001143296, %v356_v19  ;;  %v431_v45 = vmul.f32 %v430_v26, %v4155_v35 }
 0x1f5   :  { %v4249_v29 = vadd.f32 1.0, %v524_v41  ;;  %v637_v46 = vmul.f32 %v629_v24, %v4150_v27  ;;  %v4269_v48 = vadd.f32 1.0, %v324_v61  ;;  %v513_v32 = vmul.f32 %v512_v33, %v4185_v13 }
 0x1f6   :  { %v3583_v37 = vpop.eup %3582  ;;  %v630_v31 = vadd.f32 1.0, %v3235_v39  ;;  %v408_v53 = vsub.f32 1.0, %v407_v42  ;;  %v443_v57 = vadd.f32 0.4994258, %v442_v38  ;;  %v475_v9 = vmul.f32 %v474_v55, %v4135_v8 }
 0x1f7   :  { %3584 = vrcp.f32 %v4249_v29  ;;  %v487_v50 = vmul.f32 %v3583_v37, %v4237_v51  ;;  %v495_v60 = vand.u32 2147483647, %v4237_v51  ;;  %v497_v3 = vand.u32 2147483648, %v4237_v51 }
 0x1f8   :  { %v638_v7 = vmul.f32 %v630_v31, %v4170_v47  ;;  %v417_v27 = vand.u32 2147483648, %v4233_v52  ;;  %v444_v5 = vmul.f32 %v443_v57, %v4155_v35  ;;  %v358_v11 = vmul.f32 %v357_v43, %v4122_v54 }
 0x1f9   :  { %v488_v58 = vsub.f32 1.0, %v487_v50  ;;  %vm492_vm2 = vweird.f32 %v3583_v37  ;;  %v409_v15 = vmul.f32 %v4252_v6, %v408_v53  ;;  %3586 = vrcp.f32 %v4269_v48 }
 0x1fa   :  { %v514_v8 = vadd.f32 1.1283791, %v513_v32  ;;  %v644_v26 = vpack.c.bf16 %v638_v7, %v637_v46  ;;  %vm491_vm3 = vweird.f32 %v4237_v51  ;;  %vm496_vm4 = vcmp.eq.f32.partialorder %v495_v60, 8.507059e+37 }
 0x1fb   :  { %v489_v13 = vmul.f32 %v3583_v37, %v488_v58  ;;  %v498_v4 = vor.u32 1.1754944e-38, %v497_v3  ;;  %v4283_v41 = vadd.f32 1.0, %v444_v5  ;;  %vm493_vm5 = vmor %vm491_vm3, %vm492_vm2  ;;  %v535_v17 = vand.u32 2147483647, %v4249_v29 }
 0x1fc   :  { %660 = vmatpush.bf16.msra.mxu1 %v644_v26  ;;  %v537_v19 = vand.u32 2147483648, %v4249_v29  ;;  %v359_v23 = vadd.f32 0.014752088, %v358_v11  ;;  %v410_v61 = vadd.f32 %v4252_v6, %v409_v15  ;;  %vm412_vm6 = vweird.f32 %v4252_v6 }
 0x1fd   :  { %v3585_v12 = vpop.eup %3584  ;;  %v490_v47 = vadd.f32 %v3583_v37, %v489_v13  ;;  %3588 = vrcp.f32 %v4283_v41  ;;  %v394_v51 = vadd.f32 1.1283791, %v393_v36  ;;  %v432_v55 = vadd.f32 0.18741608, %v431_v45 }
 0x1fe   :  { %v527_v16 = vmul.f32 %v3585_v12, %v4249_v29  ;;  %vm532_vm7 = vweird.f32 %v3585_v12  ;;  %vm411_vm9 = vweird.f32 %v4233_v52  ;;  %v415_v42 = vand.u32 2147483647, %v4233_v52 }
 0x1ff   :  { %v494_v24 = vsel %vm493_vm5, %v3583_v37, %v490_v47  ;;  %v4290_v1 = vpop.eup %3586  ;;  %vm531_vm10 = vweird.f32 %v4249_v29  ;;  %vm4295_vm11 = vmor %vm411_vm9, %vm412_vm6  ;;  %v418_v43 = vor.u32 1.1754944e-38, %v417_v27  ;;  %v360_v36 = vmul.f32 %v359_v23, %v4122_v54 }
 0x200   :  { %v528_v21 = vsub.f32 1.0, %v527_v16  ;;  %v499_v33 = vsel %vm496_vm4, %v498_v4, %v494_v24  ;;  %v515_v46 = vmul.f32 %v514_v8, %v4173_v49  ;;  %vm533_vm12 = vmor %vm531_vm10, %vm532_vm7  ;;  %vm536_vm13 = vcmp.eq.f32.partialorder %v535_v17, 8.507059e+37 }
 0x201   :  { %v500_v39 = vmul.f32 %v499_v33, %v475_v9  ;;  %v538_v45 = vor.u32 1.1754944e-38, %v537_v19  ;;  %v414_v50 = vsel %vm4295_vm11, %v4252_v6, %v410_v61  ;;  %v327_v29 = vmul.f32 %v4290_v1, %v4269_v48 }
 0x202   :  { %v529_v34 = vmul.f32 %v3585_v12, %v528_v21  ;;  %v361_v31 = vadd.f32 0.112945676, %v360_v36  ;;  %v311_v57 = vmul.f32 %v4255_v28, %v4073_v14  ;;  %v433_v9 = vmul.f32 %v432_v55, %v4155_v35 }
 0x203   :  { %v3232_v52 = vclamps-f32 %v500_v39, 1.0  ;;  %v3589_v53 = vpop.eup %3588  ;;  %vm416_vm14 = vcmp.eq.f32.partialorder %v415_v42, 8.507059e+37  ;;  %v350_v58 = vadd.f32 0.05243302, %v4259_v25  ;;  %v395_v7 = vmul.f32 %v394_v51, %v4088_v22 }
 0x204   :  { %v530_v38 = vadd.f32 %v3585_v12, %v529_v34  ;;  %v419_v3 = vsel %vm416_vm14, %v418_v43, %v414_v50  ;;  %v447_v6 = vmul.f32 %v3589_v53, %v4283_v41  ;;  %v291_v27 = vmul.f32 0.5, %v4129_v62 }
 0x205   :  { %v292_v5 = vmul.f32 0.5, %v4162_v40  ;;  %v362_v11 = vmul.f32 %v361_v31, %v4122_v54  ;;  %v627_v28 = vadd.f32 1.0, %v3232_v52  ;;  %v328_v35 = vsub.f32 1.0, %v327_v29 }
 0x206   :  { %v534_v32 = vsel %vm533_vm12, %v3585_v12, %v530_v38  ;;  %v448_v13 = vsub.f32 1.0, %v447_v6  ;;  %v434_v15 = vadd.f32 1.1283791, %v433_v9  ;;  %v420_v8 = vmul.f32 %v419_v3, %v395_v7 }
 0x207   :  { %v539_v49 = vsel %vm536_vm13, %v538_v45, %v534_v32  ;;  %v457_v25 = vand.u32 2147483648, %v4283_v41  ;;  %v363_v26 = vadd.f32 0.4994258, %v362_v11  ;;  %vm452_vm15 = vweird.f32 %v3589_v53 }
 0x208   :  { %v540_v60 = vmul.f32 %v539_v49, %v515_v46  ;;  %v449_v47 = vmul.f32 %v3589_v53, %v448_v13  ;;  %v455_v22 = vand.u32 2147483647, %v4283_v41  ;;  %v312_v4 = vadd.f32 0.18741608, %v311_v57 }
 0x209   :  { %vm451_vm1 = vweird.f32 %v4283_v41  ;;  %v364_v62 = vmul.f32 %v363_v26, %v4122_v54  ;;  %v635_v40 = vmul.f32 %v627_v28, %v291_v27  ;;  %v329_v19 = vmul.f32 %v4290_v1, %v328_v35 }
 0x20a   :  { %v3233_v12 = vclamps-f32 %v540_v60, 1.0  ;;  %v450_v17 = vadd.f32 %v3589_v53, %v449_v47  ;;  %v351_v23 = vmul.f32 %v350_v58, %v4122_v54  ;;  %v435_v24 = vmul.f32 %v434_v15, %v4125_v56  ;;  %vm453_vm2 = vmor %vm451_vm1, %vm452_vm15 }
 0x20b   :  { %v458_v61 = vor.u32 1.1754944e-38, %v457_v25  ;;  %v365_v51 = vadd.f32 1.0, %v364_v62  ;;  %v3230_v34 = vclamps-f32 %v420_v8, 1.0  ;;  %vm456_vm3 = vcmp.eq.f32.partialorder %v455_v22, 8.507059e+37  ;;  %v3526_v22 = vld [vmem:[%s5974_s3] sm:$0xff] }
 0x20c   :  { %v628_v16 = vadd.f32 1.0, %v3233_v12  ;;  %v454_v55 = vsel %vm453_vm2, %v3589_v53, %v450_v17  ;;  %v313_v41 = vmul.f32 %v312_v4, %v4073_v14  ;;  %v330_v38 = vadd.f32 %v4290_v1, %v329_v19 }
 0x20d   :  { %v459_v39 = vsel %vm456_vm3, %v458_v61, %v454_v55  ;;  %3590 = vrcp.f32 %v365_v51  ;;  %vm332_vm4 = vweird.f32 %v4290_v1  ;;  %v352_v37 = vadd.f32 0.18741608, %v351_v23 }
 0x20e   :  { %v636_v21 = vmul.f32 %v628_v16, %v292_v5  ;;  %v460_v42 = vmul.f32 %v459_v39, %v435_v24  ;;  %v337_v56 = vand.u32 2147483648, %v4269_v48  ;;  %v625_v36 = vadd.f32 1.0, %v3230_v34 }
 0x20f   :  { %vm331_vm5 = vweird.f32 %v4269_v48  ;;  %v335_v46 = vand.u32 2147483647, %v4269_v48  ;;  %v289_v45 = vmul.f32 0.5, %v4081_v18  ;;  %v314_v50 = vadd.f32 1.1283791, %v313_v41 }
 0x210   :  { %v643_v33 = vpack.c.bf16 %v636_v21, %v635_v40  ;;  %v3231_v43 = vclamps-f32 %v460_v42, 1.0  ;;  %vm333_vm6 = vmor %vm331_vm5, %vm332_vm4  ;;  %v290_v14 = vmul.f32 0.5, %v4113_v44  ;;  %v353_v31 = vmul.f32 %v352_v37, %v4122_v54  ;;  %v646_v40 = vld [vmem:[%s5975_s4 + $0x8] sm:$0xff] }
 0x211   :  { %v334_v32 = vsel %vm333_vm6, %v4290_v1, %v330_v38  ;;  %v338_v53 = vor.u32 1.1754944e-38, %v337_v56  ;;  %v633_v57 = vmul.f32 %v625_v36, %v289_v45  ;;  %vm336_vm7 = vcmp.eq.f32.partialorder %v335_v46, 8.507059e+37  ;;  %v3528_v42 = vld [vmem:[%s5978_s7 + $0x8] sm:$0xff]  ;;  %v3527_v56 = vld [vmem:[%s5978_s7] sm:$0xff] }
 0x212   :  { %661 = vmatpush.bf16.msra.mxu1 %v643_v33  ;;  %v626_v52 = vadd.f32 1.0, %v3231_v43  ;;  %v315_v48 = vmul.f32 %v314_v50, %v4052_v63  ;;  %v354_v3 = vadd.f32 1.1283791, %v353_v31  ;;  %v377_v6 = vand.u32 2147483648, %v365_v51  ;;  %752 = vmatpush.bf16.msra.mxu2 %v3528_v42 }
 0x213   :  { %v3591_v29 = vpop.eup %3590  ;;  %v339_v58 = vsel %vm336_vm7, %v338_v53, %v334_v32  ;;  %v375_v1 = vand.u32 2147483647, %v365_v51  ;;  %vm371_vm10 = vweird.f32 %v365_v51  ;;  %v287_v15 = vmul.f32 0.5, %v4047_v59 }
 0x214   :  { %v634_v9 = vmul.f32 %v626_v52, %v290_v14  ;;  %v367_v49 = vmul.f32 %v3591_v29, %v365_v51  ;;  %v340_v44 = vmul.f32 %v339_v58, %v315_v48  ;;  %vm372_vm9 = vweird.f32 %v3591_v29 }
 0x215   :  { %vm373_vm11 = vmor %vm371_vm10, %vm372_vm9  ;;  %v378_v54 = vor.u32 1.1754944e-38, %v377_v6  ;;  %v355_v5 = vmul.f32 %v354_v3, %v4099_v30  ;;  %vm376_vm12 = vcmp.eq.f32.partialorder %v375_v1, 8.507059e+37  ;;  %v288_v8 = vmul.f32 0.5, %v4083_v20  ;;  %v645_v30 = vld [vmem:[%s5975_s4] sm:$0xff]  ;;  %v672_v3 = vld [vmem:[#allocation7] sm:$0xff] }
 0x216   :  { %v642_v60 = vpack.c.bf16 %v634_v9, %v633_v57  ;;  %v368_v18 = vsub.f32 1.0, %v367_v49  ;;  %v3228_v11 = vclamps-f32 %v340_v44, 1.0  ;;  %vm652_vm13 = vcmask 523264   ;;  %753 = vmatpush.bf16.msra.mxu2 %v3527_v56  ;;  %v673_v44 = vld [vmem:[#allocation7 + $0x8] sm:$0xff] }
 0x218   :  { %662 = vmatpush.bf16.msra.mxu1 %v642_v60  ;;  %v369_v7 = vmul.f32 %v3591_v29, %v368_v18  ;;  %v623_v35 = vadd.f32 1.0, %v3228_v11 }
 0x21a   :  { %v370_v27 = vadd.f32 %v3591_v29, %v369_v7  ;;  %v631_v26 = vmul.f32 %v623_v35, %v287_v15 }
 0x21c   :  { %v374_v12 = vsel %vm373_vm11, %v3591_v29, %v370_v27  ;;  %v674_v27 = vld [vmem:[#allocation8] sm:$0xff] }
 0x21d   :  { %v379_v28 = vsel %vm376_vm12, %v378_v54, %v374_v12  ;;  %v675_v54 = vld [vmem:[#allocation8 + $0x8] sm:$0xff] }
 0x21e   :  { %v380_v63 = vmul.f32 %v379_v28, %v355_v5 }
 0x220   :  { %v3229_v13 = vclamps-f32 %v380_v63, 1.0  ;;  %v729_v63 = vld [vmem:[%s5979_s8] sm:$0xff] }
 0x222   :  { %v624_v25 = vadd.f32 1.0, %v3229_v13 }
 0x224   :  { %v632_v16 = vmul.f32 %v624_v25, %v288_v8 }
 0x226   :  { %v641_v47 = vpack.c.bf16 %v632_v16, %v631_v26 }
 0x228   :  { %663 = vmatpush.bf16.msra.mxu1 %v641_v47 }
 0x22b   :  { %3240 = vmatmul.msk.bf16.vlgmr.msra.gmra.mxu1 %vm652_vm13, %v3526_v22 }
 0x2a8   :  { %v665_v4 = vpop.f32.mrf.mxu1 }
 0x2a9   :  { %v666_v59 = vadd.f32 %v665_v4, %v645_v30 }
 0x2ab   :  { %v4344_v20 = vadd.f32 %v666_v59, %v3995_v0  ;;  %v730_v59 = vld [vmem:[%s5979_s8 + $0x8] sm:$0xff] }
 0x2ad   :  { %v676_v62 = vsel %vm152_vm0, %v4344_v20, 0.0 }
 0x2ae   :  { %677 = vadd.xlane.f32.xlu2 %v676_v62 }
 0x2b0   :  { %v667_v21 = vpop.f32.mrf.mxu1 }
 0x2b1   :  { %v668_v17 = vadd.f32 %v667_v21, %v646_v40 }
 0x2b3   :  { %v4352_v19 = vadd.f32 %v668_v17, %v3999_v2 }
 0x2b5   :  { %v679_v23 = vsel %vm152_vm0, %v4352_v19, 0.0 }
 0x2b6   :  { %680 = vadd.xlane.f32.xlu2 %v679_v23 }
 0x321   :  { %v678_v24 = vpop.xlane.xlu2 %677 }
 0x322   :  { %v682_v0 = vmul.f32 %v678_v24, %v4003_v10 }
 0x324   :  { %v684_v61 = vsub.f32 %v4344_v20, %v682_v0 }
 0x326   :  { %v686_v51 = vmul.f32 %v684_v61, %v684_v61 }
 0x328   :  { %v688_v33 = vsel %vm152_vm0, %v686_v51, 0.0 }
 0x329   :  { %689 = vadd.xlane.f32.xlu0 %v688_v33  ;;  %v681_v34 = vpop.xlane.xlu2 %680 }
 0x32a   :  { %v683_v55 = vmul.f32 %v681_v34, %v4003_v10 }
 0x32c   :  { %v685_v39 = vsub.f32 %v4352_v19, %v683_v55 }
 0x32e   :  { %v687_v2 = vmul.f32 %v685_v39, %v685_v39 }
 0x330   :  { %v691_v41 = vsel %vm152_vm0, %v687_v2, 0.0 }
 0x331   :  { %692 = vadd.xlane.f32.xlu1 %v691_v41 }
 0x39c   :  { %v690_v38 = vpop.xlane.xlu0 %689 }
 0x39d   :  { %v694_v37 = vmul.f32 %v690_v38, %v4003_v10 }
 0x39f   :  { %v696_v43 = vadd.f32 1e-05, %v694_v37 }
 0x3a1   :  { %3592 = vrsqrt.f32 %v696_v43  ;;  %vm704_vm15 = vweird.f32 %v696_v43 }
 0x3a4   :  { %v693_v36 = vpop.xlane.xlu1 %692 }
 0x3a5   :  { %v695_v46 = vmul.f32 %v693_v36, %v4003_v10 }
 0x3a7   :  { %v3593_v45 = vpop.eup %3592  ;;  %v697_v50 = vadd.f32 1e-05, %v695_v46 }
 0x3a8   :  { %v699_v14 = vmul.f32 %v3593_v45, %v696_v43  ;;  %vm705_vm14 = vweird.f32 %v3593_v45 }
 0x3a9   :  { %3594 = vrsqrt.f32 %v697_v50  ;;  %vm706_vm1 = vmor %vm704_vm15, %vm705_vm14  ;;  %vm714_vm3 = vweird.f32 %v697_v50 }
 0x3aa   :  { %v700_v52 = vmul.f32 %v3593_v45, %v699_v14 }
 0x3ac   :  { %v701_v32 = vmul.f32 0.5, %v700_v52 }
 0x3ae   :  { %v702_v29 = vsub.f32 1.5, %v701_v32 }
 0x3af   :  { %v3595_v31 = vpop.eup %3594 }
 0x3b0   :  { %v703_v53 = vmul.f32 %v3593_v45, %v702_v29  ;;  %v709_v57 = vmul.f32 %v3595_v31, %v697_v50  ;;  %vm715_vm2 = vweird.f32 %v3595_v31 }
 0x3b1   :  { %vm716_vm4 = vmor %vm714_vm3, %vm715_vm2 }
 0x3b2   :  { %v710_v9 = vmul.f32 %v3595_v31, %v709_v57  ;;  %v707_v49 = vsel %vm706_vm1, %v3593_v45, %v703_v53 }
 0x3b3   :  { %v718_v60 = vmul.f32 %v707_v49, %v684_v61 }
 0x3b4   :  { %v711_v58 = vmul.f32 0.5, %v710_v9  ;;  %v3530_v9 = vld [vmem:[%s5980_s9 + $0x8] sm:$0xff] }
 0x3b5   :  { %v720_v1 = vmul.f32 %v718_v60, %v672_v3  ;;  %876 = vmatpush.bf16.msrb.mxu3 %v3530_v9 }
 0x3b6   :  { %v712_v48 = vsub.f32 1.5, %v711_v58 }
 0x3b7   :  { %v722_v11 = vadd.f32 %v720_v1, %v674_v27 }
 0x3b8   :  { %v713_v18 = vmul.f32 %v3595_v31, %v712_v48  ;;  %v3529_v48 = vld [vmem:[%s5980_s9] sm:$0xff] }
 0x3b9   :  { %877 = vmatpush.bf16.msrb.mxu3 %v3529_v48 }
 0x3ba   :  { %v717_v6 = vsel %vm716_vm4, %v3595_v31, %v713_v18 }
 0x3bb   :  { %v719_v7 = vmul.f32 %v717_v6, %v685_v39 }
 0x3bd   :  { %v721_v5 = vmul.f32 %v719_v7, %v673_v44 }
 0x3bf   :  { %v723_v12 = vadd.f32 %v721_v5, %v675_v54 }
 0x3c1   :  { %v724_v28 = vpack.c.bf16 %v723_v12, %v722_v11 }
 0x3c3   :  { %3249 = vmatmul.msk.bf16.vlgmr.msra.gmra.mxu2 %vm152_vm0, %v724_v28 }
 0x446   :  { %v755_v13 = vpop.f32.mrf.mxu2 }
 0x447   :  { %v4374_v35 = vadd.f32 %v755_v13, %v729_v63 }
 0x449   :  { %v4377_v15 = vmul.f32 0.70710677, %v4374_v35 }
 0x44b   :  { %v764_v8 = vmul.f32 %v4377_v15, %v4377_v15 }
 0x44d   :  { %v765_v25 = vmin.f32 %v764_v8, 16.0 }
 0x44e   :  { %v757_v62 = vpop.f32.mrf.mxu2 }
 0x44f   :  { %v777_v26 = vmul.f32 3.8918573e-05, %v765_v25  ;;  %v766_v22 = vmul.f32 2.1237322e-06, %v765_v25  ;;  %v4384_v40 = vadd.f32 %v757_v62, %v730_v59 }
 0x451   :  { %v778_v16 = vadd.f32 0.001143296, %v777_v26  ;;  %v767_v21 = vadd.f32 0.00028619796, %v766_v22  ;;  %v4387_v23 = vmul.f32 0.70710677, %v4384_v40 }
 0x453   :  { %v779_v47 = vmul.f32 %v778_v16, %v765_v25  ;;  %v804_v0 = vmul.f32 %v4387_v23, %v4387_v23  ;;  %v768_v61 = vmul.f32 %v767_v21, %v765_v25 }
 0x455   :  { %v780_v30 = vadd.f32 0.014752088, %v779_v47  ;;  %v805_v33 = vmin.f32 %v804_v0, 16.0  ;;  %v769_v2 = vadd.f32 0.0036580483, %v768_v61 }
 0x457   :  { %v781_v4 = vmul.f32 %v780_v30, %v765_v25  ;;  %v806_v55 = vmul.f32 2.1237322e-06, %v805_v33  ;;  %v817_v39 = vmul.f32 3.8918573e-05, %v805_v33  ;;  %v770_v43 = vmul.f32 %v769_v2, %v765_v25 }
 0x459   :  { %v782_v17 = vadd.f32 0.112945676, %v781_v4  ;;  %v807_v42 = vadd.f32 0.00028619796, %v806_v55  ;;  %v818_v38 = vadd.f32 0.001143296, %v817_v39 }
 0x45a   :  { %v771_v14 = vadd.f32 0.05243302, %v770_v43  ;;  %v761_v55 = vmul.f32 0.5, %v4384_v40 }
 0x45b   :  { %v783_v24 = vmul.f32 %v782_v17, %v765_v25  ;;  %v808_v37 = vmul.f32 %v807_v42, %v805_v33  ;;  %v819_v56 = vmul.f32 %v818_v38, %v805_v33  ;;  %v853_v38 = vld [vmem:[#allocation5] sm:$0xff] }
 0x45c   :  { %v772_v53 = vmul.f32 %v771_v14, %v765_v25 }
 0x45d   :  { %v784_v51 = vadd.f32 0.4994258, %v783_v24  ;;  %v809_v36 = vadd.f32 0.0036580483, %v808_v37  ;;  %v820_v46 = vadd.f32 0.014752088, %v819_v56 }
 0x45e   :  { %v773_v18 = vadd.f32 0.18741608, %v772_v53 }
 0x45f   :  { %v785_v34 = vmul.f32 %v784_v51, %v765_v25  ;;  %v821_v45 = vmul.f32 %v820_v46, %v805_v33  ;;  %v810_v32 = vmul.f32 %v809_v36, %v805_v33  ;;  %v854_v36 = vld [vmem:[#allocation5 + $0x8] sm:$0xff] }
 0x460   :  { %v774_v7 = vmul.f32 %v773_v18, %v765_v25 }
 0x461   :  { %v786_v41 = vadd.f32 1.0, %v785_v34  ;;  %v822_v29 = vadd.f32 0.112945676, %v821_v45  ;;  %v811_v49 = vadd.f32 0.05243302, %v810_v32  ;;  %v760_v34 = vmul.f32 0.5, %v4374_v35 }
 0x462   :  { %v775_v11 = vadd.f32 1.1283791, %v774_v7 }
 0x463   :  { %3596 = vrcp.f32 %v786_v41  ;;  %v823_v31 = vmul.f32 %v822_v29, %v805_v33  ;;  %v812_v6 = vmul.f32 %v811_v49, %v805_v33  ;;  %v798_v27 = vand.u32 2147483648, %v786_v41 }
 0x464   :  { %vm792_vm6 = vweird.f32 %v786_v41  ;;  %v796_v5 = vand.u32 2147483647, %v786_v41  ;;  %v776_v16 = vmul.f32 %v775_v11, %v4377_v15 }
 0x465   :  { %v824_v58 = vadd.f32 0.4994258, %v823_v31  ;;  %v813_v54 = vadd.f32 0.18741608, %v812_v6  ;;  %v799_v63 = vor.u32 1.1754944e-38, %v798_v27 }
 0x466   :  { %vm797_vm9 = vcmp.eq.f32.partialorder %v796_v5, 8.507059e+37 }
 0x467   :  { %v825_v60 = vmul.f32 %v824_v58, %v805_v33  ;;  %v814_v13 = vmul.f32 %v813_v54, %v805_v33 }
 0x469   :  { %v3597_v50 = vpop.eup %3596  ;;  %v826_v44 = vadd.f32 1.0, %v825_v60  ;;  %v815_v22 = vadd.f32 1.1283791, %v814_v13 }
 0x46a   :  { %v788_v52 = vmul.f32 %v3597_v50, %v786_v41  ;;  %vm793_vm5 = vweird.f32 %v3597_v50 }
 0x46b   :  { %3598 = vrcp.f32 %v826_v44  ;;  %vm794_vm7 = vmor %vm792_vm6, %vm793_vm5  ;;  %v838_v25 = vand.u32 2147483648, %v826_v44  ;;  %v836_v59 = vand.u32 2147483647, %v826_v44  ;;  %vm832_vm11 = vweird.f32 %v826_v44 }
 0x46c   :  { %v789_v57 = vsub.f32 1.0, %v788_v52  ;;  %v816_v24 = vmul.f32 %v815_v22, %v4387_v23 }
 0x46d   :  { %v839_v21 = vor.u32 1.1754944e-38, %v838_v25  ;;  %vm837_vm14 = vcmp.eq.f32.partialorder %v836_v59, 8.507059e+37 }
 0x46e   :  { %v790_v3 = vmul.f32 %v3597_v50, %v789_v57 }
 0x470   :  { %v791_v1 = vadd.f32 %v3597_v50, %v790_v3 }
 0x471   :  { %v3599_v28 = vpop.eup %3598 }
 0x472   :  { %v795_v12 = vsel %vm794_vm7, %v3597_v50, %v791_v1  ;;  %v828_v8 = vmul.f32 %v3599_v28, %v826_v44  ;;  %vm833_vm10 = vweird.f32 %v3599_v28 }
 0x473   :  { %v800_v26 = vsel %vm797_vm9, %v799_v63, %v795_v12  ;;  %vm834_vm12 = vmor %vm832_vm11, %vm833_vm10 }
 0x474   :  { %v829_v47 = vsub.f32 1.0, %v828_v8  ;;  %v801_v30 = vmul.f32 %v800_v26, %v776_v16  ;;  %v3261_v26 = vld [vmem:[%s5976_s5 + $0x10] sm:$0xff]  ;;  %v3262_v16 = vld [vmem:[%s5976_s5 + $0x18] sm:$0xff] }
 0x476   :  { %v830_v4 = vmul.f32 %v3599_v28, %v829_v47  ;;  %v3250_v17 = vclamps-f32 %v801_v30, 1.0  ;;  %v3263_v30 = vld [vmem:[%s5977_s6 + $0x10] sm:$0xff] }
 0x478   :  { %v831_v62 = vadd.f32 %v3599_v28, %v830_v4  ;;  %v844_v33 = vadd.f32 1.0, %v3250_v17  ;;  %v3264_v4 = vld [vmem:[%s5977_s6 + $0x18] sm:$0xff] }
 0x47a   :  { %v835_v0 = vsel %vm834_vm12, %v3599_v28, %v831_v62  ;;  %v846_v2 = vmul.f32 %v844_v33, %v760_v34  ;;  %v3273_v33 = vld [vmem:[%s5973_s2 + $0x40] sm:$0xff] }
 0x47b   :  { %v840_v61 = vsel %vm837_vm14, %v839_v21, %v835_v0  ;;  %v3532_v0 = vld [vmem:[%s5972_s1 + $0x28] sm:$0xff] }
 0x47c   :  { %v841_v51 = vmul.f32 %v840_v61, %v816_v24  ;;  %v3531_v24 = vld [vmem:[%s5972_s1 + $0x20] sm:$0xff]  ;;  %v3533_v61 = vld [vmem:[%s5972_s1 + $0x30] sm:$0xff] }
 0x47e   :  { %v3251_v15 = vclamps-f32 %v841_v51, 1.0  ;;  %v3534_v51 = vld [vmem:[%s5972_s1 + $0x38] sm:$0xff] }
 0x480   :  { %v845_v39 = vadd.f32 1.0, %v3251_v15 }
 0x482   :  { %v847_v41 = vmul.f32 %v845_v39, %v761_v55  ;;  %v3274_v39 = vld [vmem:[%s5973_s2 + $0x48] sm:$0xff] }
 0x484   :  { %v848_v42 = vpack.c.bf16 %v847_v41, %v846_v2 }
 0x486   :  { %3260 = vmatmul.msk.bf16.vlgmr.msrb.gmra.mxu3 %vm152_vm0, %v848_v42 }
 0x509   :  { %v879_v37 = vpop.f32.mrf.mxu3 }
 0x50a   :  { %v880_v56 = vadd.f32 %v879_v37, %v853_v38 }
 0x50c   :  { %v4403_v23 = vadd.f32 %v880_v56, %v4344_v20 }
 0x50e   :  { %6005 = vst [vmem:[#allocation20_spill] sm:$0xff] %v4403_v23  ;;  %v892_v43 = vsel %vm152_vm0, %v4403_v23, 0.0 }
 0x50f   :  { %893 = vadd.xlane.f32.xlu2 %v892_v43 }
 0x511   :  { %v881_v35 = vpop.f32.mrf.mxu3 }
 0x512   :  { %v882_v46 = vadd.f32 %v881_v35, %v854_v36  ;;  %v3275_v36 = vld [vmem:[%s5973_s2 + $0x50] sm:$0xff] }
 0x514   :  { %v4408_v40 = vadd.f32 %v882_v46, %v4352_v19 }
 0x516   :  { %6006 = vst [vmem:[#allocation21_spill] sm:$0xff] %v4408_v40  ;;  %v895_v45 = vsel %vm152_vm0, %v4408_v40, 0.0 }
 0x517   :  { %896 = vadd.xlane.f32.xlu0 %v895_v45 }
 0x582   :  { %v894_v50 = vpop.xlane.xlu2 %893 }
 0x583   :  { %v898_v14 = vmul.f32 %v894_v50, %v4003_v10 }
 0x585   :  { %v900_v20 = vsub.f32 %v4403_v23, %v898_v14  ;;  %v3276_v14 = vld [vmem:[%s5973_s2 + $0x58] sm:$0xff] }
 0x587   :  { %v902_v52 = vmul.f32 %v900_v20, %v900_v20 }
 0x589   :  { %v904_v32 = vsel %vm152_vm0, %v902_v52, 0.0 }
 0x58a   :  { %v897_v29 = vpop.xlane.xlu0 %896  ;;  %905 = vadd.xlane.f32.xlu1 %v904_v32 }
 0x58b   :  { %v899_v31 = vmul.f32 %v897_v29, %v4003_v10 }
 0x58d   :  { %v901_v53 = vsub.f32 %v4408_v40, %v899_v31 }
 0x58f   :  { %v903_v19 = vmul.f32 %v901_v53, %v901_v53 }
 0x591   :  { %v907_v57 = vsel %vm152_vm0, %v903_v19, 0.0 }
 0x592   :  { %908 = vadd.xlane.f32.xlu2 %v907_v57 }
 0x5fd   :  { %v906_v9 = vpop.xlane.xlu1 %905 }
 0x5fe   :  { %v910_v49 = vmul.f32 %v906_v9, %v4003_v10 }
 0x600   :  { %v912_v58 = vadd.f32 1e-05, %v910_v49 }
 0x602   :  { %3600 = vrsqrt.f32 %v912_v58  ;;  %vm920_vm1 = vweird.f32 %v912_v58 }
 0x605   :  { %v909_v48 = vpop.xlane.xlu2 %908 }
 0x606   :  { %v911_v60 = vmul.f32 %v909_v48, %v4003_v10 }
 0x608   :  { %v3601_v18 = vpop.eup %3600  ;;  %v913_v3 = vadd.f32 1e-05, %v911_v60 }
 0x609   :  { %v915_v6 = vmul.f32 %v3601_v18, %v912_v58  ;;  %vm921_vm15 = vweird.f32 %v3601_v18 }
 0x60a   :  { %3602 = vrsqrt.f32 %v913_v3  ;;  %vm922_vm2 = vmor %vm920_vm1, %vm921_vm15  ;;  %vm930_vm4 = vweird.f32 %v913_v3 }
 0x60b   :  { %v916_v44 = vmul.f32 %v3601_v18, %v915_v6 }
 0x60d   :  { %v917_v7 = vmul.f32 0.5, %v916_v44  ;;  %v3277_v44 = vld [vmem:[%s5973_s2 + $0x60] sm:$0xff] }
 0x60f   :  { %v918_v1 = vsub.f32 1.5, %v917_v7 }
 0x610   :  { %v3603_v27 = vpop.eup %3602 }
 0x611   :  { %v919_v54 = vmul.f32 %v3601_v18, %v918_v1  ;;  %v925_v5 = vmul.f32 %v3603_v27, %v913_v3  ;;  %vm931_vm3 = vweird.f32 %v3603_v27 }
 0x612   :  { %vm932_vm5 = vmor %vm930_vm4, %vm931_vm3 }
 0x613   :  { %v926_v11 = vmul.f32 %v3603_v27, %v925_v5  ;;  %v923_v28 = vsel %vm922_vm2, %v3601_v18, %v919_v54 }
 0x614   :  { %v934_v13 = vmul.f32 %v923_v28, %v900_v20 }
 0x615   :  { %v927_v12 = vmul.f32 0.5, %v926_v11 }
 0x616   :  { %v936_v25 = vmul.f32 %v3261_v26, %v934_v13 }
 0x617   :  { %v928_v63 = vsub.f32 1.5, %v927_v12 }
 0x618   :  { %v938_v62 = vadd.f32 %v3263_v30, %v936_v25 }
 0x619   :  { %v929_v8 = vmul.f32 %v3603_v27, %v928_v63 }
 0x61b   :  { %v933_v47 = vsel %vm932_vm5, %v3603_v27, %v929_v8 }
 0x61c   :  { %v935_v22 = vmul.f32 %v933_v47, %v901_v53 }
 0x61e   :  { %v937_v59 = vmul.f32 %v3262_v16, %v935_v22  ;;  %v3278_v22 = vld [vmem:[%s5973_s2 + $0x68] sm:$0xff] }
 0x620   :  { %v939_v21 = vadd.f32 %v3264_v4, %v937_v59 }
 0x622   :  { %v949_v17 = vpack.c.bf16 %v939_v21, %v938_v62 }
 0x624   :  { %998 = vmatpush.bf16.msrb.mxu2 %v949_v17 }
 0x627   :  { %3297 = vmatmul.msk.bf16.vlgmr.msrb.gmra.mxu2 %vm245_vm8, %v3531_v24 }
 0x637   :  { %3298 = vmatmul.msk.bf16.gmra.mxu2 %vm245_vm8, %v3532_v0 }
 0x647   :  { %3299 = vmatmul.msk.bf16.gmra.mxu2 %vm245_vm8, %v3533_v61 }
 0x657   :  { %3300 = vmatmul.msk.bf16.gmra.mxu2 %vm245_vm8, %v3534_v51 }
 0x6aa   :  { %v1000_v15 = vpop.f32.mrf.mxu2 }
 0x6ab   :  { %v4451_v34 = vadd.f32 %v3273_v33, %v1000_v15 }
 0x6ad   :  { %6007 = vst [vmem:[#allocation22_spill] sm:$0xff] %v4451_v34  ;;  %v4454_v55 = vmul.f32 0.70710677, %v4451_v34 }
 0x6af   :  { %v1036_v41 = vmul.f32 %v4454_v55, %v4454_v55 }
 0x6b1   :  { %v4463_v38 = vmin.f32 %v1036_v41, 16.0 }
 0x6b2   :  { %v1002_v2 = vpop.f32.mrf.mxu2 }
 0x6b3   :  { %v4461_v42 = vadd.f32 %v3274_v39, %v1002_v2  ;;  %v1049_v43 = vmul.f32 3.8918573e-05, %v4463_v38  ;;  %v1038_v58 = vmul.f32 2.1237322e-06, %v4463_v38 }
 0x6b5   :  { %v4466_v37 = vmul.f32 0.70710677, %v4461_v42  ;;  %v1050_v46 = vadd.f32 0.001143296, %v1049_v43  ;;  %v1039_v7 = vadd.f32 0.00028619796, %v1038_v58 }
 0x6b7   :  { %v1076_v35 = vmul.f32 %v4466_v37, %v4466_v37  ;;  %v1051_v52 = vmul.f32 %v1050_v46, %v4463_v38  ;;  %v1040_v12 = vmul.f32 %v1039_v7, %v4463_v38 }
 0x6b9   :  { %v4476_v50 = vmin.f32 %v1076_v35, 16.0  ;;  %v1052_v19 = vadd.f32 0.014752088, %v1051_v52  ;;  %v1041_v25 = vadd.f32 0.0036580483, %v1040_v12 }
 0x6ba   :  { %v1005_v56 = vpop.f32.mrf.mxu2 }
 0x6bb   :  { %v4474_v45 = vadd.f32 %v3275_v36, %v1005_v56  ;;  %v1089_v31 = vmul.f32 3.8918573e-05, %v4476_v50  ;;  %v1053_v60 = vmul.f32 %v1052_v19, %v4463_v38  ;;  %v1078_v28 = vmul.f32 2.1237322e-06, %v4476_v50 }
 0x6bc   :  { %v1042_v61 = vmul.f32 %v1041_v25, %v4463_v38 }
 0x6bd   :  { %v4483_v32 = vmul.f32 0.70710677, %v4474_v45  ;;  %v1090_v9 = vadd.f32 0.001143296, %v1089_v31  ;;  %v1054_v1 = vadd.f32 0.112945676, %v1053_v60 }
 0x6be   :  { %v1079_v30 = vadd.f32 0.00028619796, %v1078_v28  ;;  %v1043_v35 = vadd.f32 0.05243302, %v1042_v61 }
 0x6bf   :  { %v1116_v57 = vmul.f32 %v4483_v32, %v4483_v32  ;;  %v1091_v6 = vmul.f32 %v1090_v9, %v4476_v50  ;;  %v1055_v13 = vmul.f32 %v1054_v1, %v4463_v38 }
 0x6c0   :  { %v1080_v51 = vmul.f32 %v1079_v30, %v4476_v50  ;;  %v1044_v58 = vmul.f32 %v1043_v35, %v4463_v38 }
 0x6c1   :  { %v4497_v18 = vmin.f32 %v1116_v57, 16.0  ;;  %v1092_v11 = vadd.f32 0.014752088, %v1091_v6  ;;  %v1056_v59 = vadd.f32 0.4994258, %v1055_v13 }
 0x6c2   :  { %v1007_v20 = vpop.f32.mrf.mxu2  ;;  %v1081_v46 = vadd.f32 0.0036580483, %v1080_v51 }
 0x6c3   :  { %v4485_v29 = vadd.f32 %v3276_v14, %v1007_v20  ;;  %v1129_v27 = vmul.f32 3.8918573e-05, %v4497_v18  ;;  %v1093_v47 = vmul.f32 %v1092_v11, %v4476_v50  ;;  %v1057_v33 = vmul.f32 %v1056_v59, %v4463_v38 }
 0x6c4   :  { %v1118_v15 = vmul.f32 2.1237322e-06, %v4497_v18 }
 0x6c5   :  { %v4489_v53 = vmul.f32 0.70710677, %v4485_v29  ;;  %v1130_v8 = vadd.f32 0.001143296, %v1129_v27  ;;  %v1094_v24 = vadd.f32 0.112945676, %v1093_v47 }
 0x6c6   :  { %v4536_v20 = vadd.f32 1.0, %v1057_v33  ;;  %v1119_v52 = vadd.f32 0.00028619796, %v1118_v15 }
 0x6c7   :  { %v1156_v49 = vmul.f32 %v4489_v53, %v4489_v53  ;;  %v1131_v62 = vmul.f32 %v1130_v8, %v4497_v18  ;;  %v1095_v36 = vmul.f32 %v1094_v24, %v4476_v50  ;;  %v1045_v8 = vadd.f32 0.18741608, %v1044_v58 }
 0x6c8   :  { %3604 = vrcp.f32 %v4536_v20  ;;  %v1120_v7 = vmul.f32 %v1119_v52, %v4497_v18  ;;  %vm1064_vm6 = vweird.f32 %v4536_v20 }
 0x6c9   :  { %v4499_v3 = vmin.f32 %v1156_v49, 16.0  ;;  %v1132_v39 = vadd.f32 0.014752088, %v1131_v62  ;;  %v1096_v49 = vadd.f32 0.4994258, %v1095_v36 }
 0x6ca   :  { %v1010_v48 = vpop.f32.mrf.mxu2 }
 0x6cb   :  { %v1169_v54 = vmul.f32 3.8918573e-05, %v4499_v3  ;;  %v4507_v5 = vadd.f32 %v3277_v44, %v1010_v48  ;;  %v1133_v31 = vmul.f32 %v1132_v39, %v4497_v18  ;;  %v1082_v48 = vmul.f32 %v1081_v46, %v4476_v50  ;;  %v3279_v44 = vld [vmem:[%s5973_s2 + $0x70] sm:$0xff] }
 0x6cc   :  { %v1158_v27 = vmul.f32 2.1237322e-06, %v4499_v3  ;;  %v1097_v11 = vmul.f32 %v1096_v49, %v4476_v50 }
 0x6cd   :  { %v1170_v26 = vadd.f32 0.001143296, %v1169_v54  ;;  %v4513_v16 = vmul.f32 0.70710677, %v4507_v5  ;;  %v1134_v1 = vadd.f32 0.112945676, %v1133_v31 }
 0x6ce   :  { %v1159_v30 = vadd.f32 0.00028619796, %v1158_v27  ;;  %v4565_v24 = vpop.eup %3604  ;;  %v4567_v61 = vadd.f32 1.0, %v1097_v11 }
 0x6cf   :  { %v1196_v4 = vmul.f32 %v4513_v16, %v4513_v16  ;;  %v1171_v21 = vmul.f32 %v1170_v26, %v4499_v3  ;;  %v1083_v26 = vadd.f32 0.05243302, %v1082_v48  ;;  %v1135_v25 = vmul.f32 %v1134_v1, %v4497_v18 }
 0x6d0   :  { %v1160_v46 = vmul.f32 %v1159_v30, %v4499_v3  ;;  %3606 = vrcp.f32 %v4567_v61  ;;  %vm1065_vm7 = vweird.f32 %v4565_v24  ;;  %vm1104_vm9 = vweird.f32 %v4567_v61 }
 0x6d1   :  { %v4525_v0 = vmin.f32 %v1196_v4, 16.0  ;;  %v1172_v56 = vadd.f32 0.014752088, %v1171_v21  ;;  %v1084_v39 = vmul.f32 %v1083_v26, %v4476_v50  ;;  %v1136_v35 = vadd.f32 0.4994258, %v1135_v25  ;;  %vm4657_vm10 = vmor %vm1064_vm6, %vm1065_vm7 }
 0x6d2   :  { %v1012_v63 = vpop.f32.mrf.mxu2 }
 0x6d3   :  { %v4523_v17 = vadd.f32 %v3278_v22, %v1012_v63  ;;  %v1209_v2 = vmul.f32 3.8918573e-05, %v4525_v0  ;;  %v1173_v19 = vmul.f32 %v1172_v56, %v4499_v3  ;;  %v3280_v63 = vld [vmem:[%s5973_s2 + $0x78] sm:$0xff]  ;;  %v1121_v22 = vadd.f32 0.0036580483, %v1120_v7 }
 0x6d4   :  { %v1198_v51 = vmul.f32 2.1237322e-06, %v4525_v0  ;;  %v1046_v56 = vmul.f32 %v1045_v8, %v4463_v38  ;;  %v1085_v38 = vadd.f32 0.18741608, %v1084_v39  ;;  %v1161_v7 = vadd.f32 0.0036580483, %v1160_v46 }
 0x6d5   :  { %v4533_v43 = vmul.f32 0.70710677, %v4523_v17  ;;  %v1210_v14 = vadd.f32 0.001143296, %v1209_v2  ;;  %v1174_v54 = vadd.f32 0.112945676, %v1173_v19  ;;  %v1122_v36 = vmul.f32 %v1121_v22, %v4497_v18 }
 0x6d6   :  { %v4604_v30 = vpop.eup %3606 }
 0x6d7   :  { %v1211_v57 = vmul.f32 %v1210_v14, %v4525_v0  ;;  %v1236_v9 = vmul.f32 %v4533_v43, %v4533_v43  ;;  %v1175_v59 = vmul.f32 %v1174_v54, %v4499_v3  ;;  %v1060_v14 = vmul.f32 %v4565_v24, %v4536_v20 }
 0x6d8   :  { %vm1105_vm11 = vweird.f32 %v4604_v30 }
 0x6d9   :  { %v1212_v60 = vadd.f32 0.014752088, %v1211_v57  ;;  %v4545_v6 = vmin.f32 %v1236_v9, 16.0  ;;  %v1176_v52 = vadd.f32 0.4994258, %v1175_v59  ;;  %v1061_v27 = vsub.f32 1.0, %v1060_v14  ;;  %vm4702_vm12 = vmor %vm1104_vm9, %vm1105_vm11 }
 0x6da   :  { %v1015_v41 = vpop.f32.mrf.mxu2  ;;  %v1199_v57 = vadd.f32 0.00028619796, %v1198_v51  ;;  %v1100_v14 = vmul.f32 %v4604_v30, %v4567_v61 }
 0x6db   :  { %v1213_v12 = vmul.f32 %v1212_v60, %v4525_v0  ;;  %v4555_v28 = vadd.f32 %v3279_v44, %v1015_v41  ;;  %v1249_v47 = vmul.f32 3.8918573e-05, %v4545_v6  ;;  %v1238_v9 = vmul.f32 2.1237322e-06, %v4545_v6 }
 0x6dc   :  { %v1123_v60 = vadd.f32 0.05243302, %v1122_v36  ;;  %v1137_v44 = vmul.f32 %v1136_v35, %v4497_v18  ;;  %v1177_v54 = vmul.f32 %v1176_v52, %v4499_v3 }
 0x6dd   :  { %v1214_v4 = vadd.f32 0.112945676, %v1213_v12  ;;  %v1250_v62 = vadd.f32 0.001143296, %v1249_v47  ;;  %v4572_v15 = vmul.f32 0.70710677, %v4555_v28 }
 0x6de   :  { %v1239_v8 = vadd.f32 0.00028619796, %v1238_v9  ;;  %v1070_v47 = vand.u32 2147483648, %v4536_v20  ;;  %v4607_v59 = vadd.f32 1.0, %v1137_v44  ;;  %v1124_v39 = vmul.f32 %v1123_v60, %v4497_v18 }
 0x6df   :  { %v1215_v33 = vmul.f32 %v1214_v4, %v4525_v0  ;;  %v1251_v2 = vmul.f32 %v1250_v62, %v4545_v6  ;;  %v1276_v49 = vmul.f32 %v4572_v15, %v4572_v15  ;;  %v1086_v4 = vmul.f32 %v1085_v38, %v4476_v50 }
 0x6e0   :  { %v1162_v62 = vmul.f32 %v1161_v7, %v4499_v3  ;;  %v1240_v35 = vmul.f32 %v1239_v8, %v4545_v6  ;;  %3608 = vrcp.f32 %v4607_v59  ;;  %v1125_v60 = vadd.f32 0.18741608, %v1124_v39 }
 0x6e1   :  { %v1216_v31 = vadd.f32 0.4994258, %v1215_v33  ;;  %v1252_v19 = vadd.f32 0.014752088, %v1251_v2  ;;  %v4592_v1 = vmin.f32 %v1276_v49, 16.0  ;;  %v1062_v33 = vmul.f32 %v4565_v24, %v1061_v27 }
 0x6e2   :  { %v1017_v13 = vpop.f32.mrf.mxu2  ;;  %v4613_v2 = vadd.f32 1.0, %v1177_v54  ;;  %v1241_v7 = vadd.f32 0.0036580483, %v1240_v35  ;;  %vm1144_vm14 = vweird.f32 %v4607_v59 }
 0x6e3   :  { %v4563_v21 = vadd.f32 %v3280_v63, %v1017_v13  ;;  %v1253_v58 = vmul.f32 %v1252_v19, %v4545_v6  ;;  %v1217_v11 = vmul.f32 %v1216_v31, %v4525_v0  ;;  %v4596_v63 = vadd.f32 1.1283791, %v1046_v56 }
 0x6e4   :  { %v1200_v13 = vmul.f32 %v1199_v57, %v4525_v0  ;;  %v1278_v22 = vmul.f32 2.1237322e-06, %v4592_v1  ;;  %v1289_v46 = vmul.f32 3.8918573e-05, %v4592_v1  ;;  %v1163_v57 = vadd.f32 0.05243302, %v1162_v62 }
 0x6e5   :  { %v4577_v41 = vmul.f32 0.70710677, %v4563_v21  ;;  %v1254_v12 = vadd.f32 0.112945676, %v1253_v58  ;;  %v4615_v56 = vadd.f32 1.0, %v1217_v11  ;;  %v4640_v62 = vor.u32 1.1754944e-38, %v1070_v47 }
 0x6e6   :  { %v1201_v36 = vadd.f32 0.0036580483, %v1200_v13  ;;  %v1279_v52 = vadd.f32 0.00028619796, %v1278_v22  ;;  %v1290_v49 = vadd.f32 0.001143296, %v1289_v46  ;;  %v1164_v8 = vmul.f32 %v1163_v57, %v4499_v3 }
 0x6e7   :  { %v1316_v48 = vmul.f32 %v4577_v41, %v4577_v41  ;;  %v1255_v51 = vmul.f32 %v1254_v12, %v4545_v6  ;;  %3610 = vrcp.f32 %v4615_v56  ;;  %v4636_v12 = vadd.f32 %v4565_v24, %v1062_v33 }
 0x6e8   :  { %v1202_v44 = vmul.f32 %v1201_v36, %v4525_v0  ;;  %3612 = vrcp.f32 %v4613_v2  ;;  %v1280_v54 = vmul.f32 %v1279_v52, %v4592_v1  ;;  %v1291_v11 = vmul.f32 %v1290_v49, %v4592_v1  ;;  %v4646_v36 = vpop.eup %3608 }
 0x6e9   :  { %v4602_v25 = vmin.f32 %v1316_v48, 16.0  ;;  %v1256_v50 = vadd.f32 0.4994258, %v1255_v51  ;;  %v1110_v48 = vand.u32 2147483648, %v4567_v61  ;;  %v1101_v13 = vsub.f32 1.0, %v1100_v14 }
 0x6ea   :  { %v4642_v51 = vadd.f32 1.1283791, %v1086_v4  ;;  %v1203_v35 = vadd.f32 0.05243302, %v1202_v44  ;;  %v1292_v46 = vadd.f32 0.014752088, %v1291_v11  ;;  %v1126_v52 = vmul.f32 %v1125_v60, %v4497_v18 }
 0x6eb   :  { %v1318_v31 = vmul.f32 2.1237322e-06, %v4602_v25  ;;  %v1329_v19 = vmul.f32 3.8918573e-05, %v4602_v25  ;;  %v1257_v9 = vmul.f32 %v1256_v50, %v4545_v6  ;;  %v1242_v50 = vmul.f32 %v1241_v7, %v4545_v6 }
 0x6ec   :  { %v4661_v4 = vor.u32 1.1754944e-38, %v1110_v48  ;;  %v1165_v49 = vadd.f32 0.18741608, %v1164_v8  ;;  %v1140_v48 = vmul.f32 %v4646_v36, %v4607_v59  ;;  %v1204_v44 = vmul.f32 %v1203_v35, %v4525_v0 }
 0x6ed   :  { %v1319_v38 = vadd.f32 0.00028619796, %v1318_v31  ;;  %v1330_v58 = vadd.f32 0.001143296, %v1329_v19  ;;  %v4631_v27 = vadd.f32 1.0, %v1257_v9  ;;  %v4651_v14 = vpop.eup %3610  ;;  %v1102_v9 = vmul.f32 %v4604_v30, %v1101_v13 }
 0x6ee   :  { %v1281_v31 = vadd.f32 0.0036580483, %v1280_v54  ;;  %v1220_v7 = vmul.f32 %v4651_v14, %v4615_v56  ;;  %v1243_v54 = vadd.f32 0.05243302, %v1242_v50  ;;  %v4681_v8 = vadd.f32 1.1283791, %v1126_v52 }
 0x6ef   :  { %v1331_v22 = vmul.f32 %v1330_v58, %v4602_v25  ;;  %3614 = vrcp.f32 %v4631_v27  ;;  %v1320_v39 = vmul.f32 %v1319_v38, %v4602_v25  ;;  %v1293_v38 = vmul.f32 %v1292_v46, %v4592_v1  ;;  %v4670_v58 = vpop.eup %3612 }
 0x6f0   :  { %v1282_v46 = vmul.f32 %v1281_v31, %v4592_v1  ;;  %v1180_v35 = vmul.f32 %v4670_v58, %v4613_v2  ;;  %v1205_v33 = vadd.f32 0.18741608, %v1204_v44  ;;  %vm1145_vm15 = vweird.f32 %v4646_v36 }
 0x6f1   :  { %v1332_v19 = vadd.f32 0.014752088, %v1331_v22  ;;  %v1321_v18 = vadd.f32 0.0036580483, %v1320_v39  ;;  %v1294_v11 = vadd.f32 0.112945676, %v1293_v38  ;;  %v4686_v39 = vadd.f32 %v4604_v30, %v1102_v9  ;;  %vm4746_vm4 = vmor %vm1144_vm14, %vm1145_vm15 }
 0x6f2   :  { %v1150_v38 = vand.u32 2147483648, %v4607_v59  ;;  %v1221_v9 = vsub.f32 1.0, %v1220_v7  ;;  %v1244_v22 = vmul.f32 %v1243_v54, %v4545_v6  ;;  %v1181_v44 = vsub.f32 1.0, %v1180_v35 }
 0x6f3   :  { %v1333_v60 = vmul.f32 %v1332_v19, %v4602_v25  ;;  %v1166_v19 = vmul.f32 %v1165_v49, %v4499_v3  ;;  %v1295_v52 = vmul.f32 %v1294_v11, %v4592_v1  ;;  %v1322_v26 = vmul.f32 %v1321_v18, %v4602_v25 }
 0x6f4   :  { %v1283_v49 = vadd.f32 0.05243302, %v1282_v46  ;;  %v4711_v54 = vor.u32 1.1754944e-38, %v1150_v38  ;;  %v1206_v46 = vmul.f32 %v1205_v33, %v4525_v0  ;;  %vm1184_vm1 = vweird.f32 %v4613_v2 }
 0x6f5   :  { %v4679_v13 = vpop.eup %3614  ;;  %v1334_v57 = vadd.f32 0.112945676, %v1333_v60  ;;  %v1141_v60 = vsub.f32 1.0, %v1140_v48  ;;  %v1296_v11 = vadd.f32 0.4994258, %v1295_v52  ;;  %v1190_v33 = vand.u32 2147483648, %v4613_v2 }
 0x6f6   :  { %v1260_v50 = vmul.f32 %v4679_v13, %v4631_v27  ;;  %v1167_v48 = vadd.f32 1.1283791, %v1166_v19  ;;  %v1323_v40 = vadd.f32 0.05243302, %v1322_v26  ;;  %v1245_v52 = vadd.f32 0.18741608, %v1244_v22 }
 0x6f7   :  { %v1335_v31 = vmul.f32 %v1334_v57, %v4602_v25  ;;  %v1107_v57 = vsel %vm4702_vm12, %v4604_v30, %v4686_v39  ;;  %v1297_v10 = vmul.f32 %v1296_v11, %v4592_v1  ;;  %v1142_v34 = vmul.f32 %v4646_v36, %v1141_v60 }
 0x6f8   :  { %v1261_v7 = vsub.f32 1.0, %v1260_v50  ;;  %v1284_v19 = vmul.f32 %v1283_v49, %v4592_v1  ;;  %v4725_v38 = vmul.f32 %v1167_v48, %v4489_v53  ;;  %v1182_v26 = vmul.f32 %v4670_v58, %v1181_v44 }
 0x6f9   :  { %v1336_v18 = vadd.f32 0.4994258, %v1335_v31  ;;  %v1222_v31 = vmul.f32 %v4651_v14, %v1221_v9  ;;  %v4720_v35 = vadd.f32 1.0, %v1297_v10  ;;  %v1188_v0 = vand.u32 2147483647, %v4613_v2 }
 0x6fa   :  { %v1262_v60 = vmul.f32 %v4679_v13, %v1261_v7  ;;  %v1324_v10 = vmul.f32 %v1323_v40, %v4602_v25  ;;  %vm1185_vm2 = vweird.f32 %v4670_v58  ;;  %v1246_v53 = vmul.f32 %v1245_v52, %v4545_v6 }
 0x6fb   :  { %v1337_v23 = vmul.f32 %v1336_v18, %v4602_v25  ;;  %3616 = vrcp.f32 %v4720_v35  ;;  %v1207_v22 = vadd.f32 1.1283791, %v1206_v46  ;;  %v1223_v9 = vadd.f32 %v4651_v14, %v1222_v31  ;;  %vm4756_vm6 = vmor %vm1184_vm1, %vm1185_vm2 }
 0x6fc   :  { %vm1225_vm3 = vweird.f32 %v4651_v14  ;;  %v1285_v49 = vadd.f32 0.18741608, %v1284_v19  ;;  %v1230_v6 = vand.u32 2147483648, %v4615_v56  ;;  %v1263_v11 = vadd.f32 %v4679_v13, %v1262_v60 }
 0x6fd   :  { %v4722_v50 = vadd.f32 1.0, %v1337_v23  ;;  %v4735_v23 = vadd.f32 %v4646_v36, %v1142_v34  ;;  %v1183_v34 = vadd.f32 %v4670_v58, %v1182_v26  ;;  %vm1265_vm5 = vweird.f32 %v4679_v13 }
 0x6fe   :  { %vm4760_vm7 = vcmp.eq.f32.partialorder %v1188_v0, 8.507059e+37  ;;  %vm1224_vm9 = vweird.f32 %v4615_v56  ;;  %v1228_v44 = vand.u32 2147483647, %v4615_v56  ;;  %v1270_v7 = vand.u32 2147483648, %v4631_v27 }
 0x6ff   :  { %3618 = vrcp.f32 %v4722_v50  ;;  %v1325_v46 = vadd.f32 0.18741608, %v1324_v10  ;;  %v1191_v52 = vor.u32 1.1754944e-38, %v1190_v33  ;;  %vm4767_vm11 = vmor %vm1224_vm9, %vm1225_vm3  ;;  %v1247_v2 = vadd.f32 1.1283791, %v1246_v53 }
 0x700   :  { %vm1264_vm14 = vweird.f32 %v4631_v27  ;;  %v1268_v19 = vand.u32 2147483647, %v4631_v27  ;;  %v1147_v60 = vsel %vm4746_vm4, %v4646_v36, %v4735_v23  ;;  %v1208_v56 = vmul.f32 %v1207_v22, %v4513_v16 }
 0x701   :  { %v3617_v26 = vpop.eup %3616  ;;  %v1227_v0 = vsel %vm4767_vm11, %v4651_v14, %v1223_v9  ;;  %vm4783_vm15 = vmor %vm1264_vm14, %vm1265_vm5  ;;  %v1286_v27 = vmul.f32 %v1285_v49, %v4592_v1  ;;  %v1187_v53 = vsel %vm4756_vm6, %v4670_v58, %v1183_v34  ;;  %v1231_v36 = vor.u32 1.1754944e-38, %v1230_v6 }
 0x702   :  { %v1267_v16 = vsel %vm4783_vm15, %v4679_v13, %v1263_v11  ;;  %v1300_v14 = vmul.f32 %v3617_v26, %v4720_v35  ;;  %v6022_v23 = vand.u32 2147483647, %v4607_v59  ;;  %vm1229_vm2 = vcmp.eq.f32.partialorder %v1228_v44, 8.507059e+37 }
 0x703   :  { %v1271_v1 = vor.u32 1.1754944e-38, %v1270_v7  ;;  %v1326_v9 = vmul.f32 %v1325_v46, %v4602_v25  ;;  %v6025_v58 = vand.u32 2147483647, %v4567_v61  ;;  %v1232_v13 = vsel %vm1229_vm2, %v1231_v36, %v1227_v0 }
 0x704   :  { %vm4797_vm1 = vcmp.eq.f32.partialorder %v6022_v23, 8.507059e+37  ;;  %v1248_v34 = vmul.f32 %v1247_v2, %v4533_v43  ;;  %vm1269_vm4 = vcmp.eq.f32.partialorder %v1268_v19, 8.507059e+37  ;;  %v1301_v59 = vsub.f32 1.0, %v1300_v14 }
 0x705   :  { %v3619_v10 = vpop.eup %3618  ;;  %vm4805_vm3 = vcmp.eq.f32.partialorder %v6025_v58, 8.507059e+37  ;;  %v1272_v6 = vsel %vm1269_vm4, %v1271_v1, %v1267_v16  ;;  %v1287_v11 = vadd.f32 1.1283791, %v1286_v27  ;;  %v1310_v18 = vand.u32 2147483648, %v4720_v35 }
 0x706   :  { %v1340_v49 = vmul.f32 %v3619_v10, %v4722_v50  ;;  %v1302_v7 = vmul.f32 %v3617_v26, %v1301_v59  ;;  %vm1305_vm5 = vweird.f32 %v3617_v26  ;;  %v1308_v25 = vand.u32 2147483647, %v4720_v35 }
 0x707   :  { %v1350_v61 = vand.u32 2147483648, %v4722_v50  ;;  %v1327_v46 = vadd.f32 1.1283791, %v1326_v9  ;;  %vm1345_vm6 = vweird.f32 %v3619_v10  ;;  %v1348_v0 = vand.u32 2147483647, %v4722_v50 }
 0x708   :  { %v1341_v44 = vsub.f32 1.0, %v1340_v49  ;;  %v1192_v43 = vsel %vm4760_vm7, %v1191_v52, %v1187_v53  ;;  %v1233_v2 = vmul.f32 %v1232_v13, %v1208_v56  ;;  %v1303_v19 = vadd.f32 %v3617_v26, %v1302_v7 }
 0x709   :  { %vm1304_vm9 = vweird.f32 %v4720_v35  ;;  %v1273_v33 = vmul.f32 %v1272_v6, %v1248_v34  ;;  %v1311_v27 = vor.u32 1.1754944e-38, %v1310_v18  ;;  %vm1344_vm14 = vweird.f32 %v4722_v50 }
 0x70a   :  { %v1342_v31 = vmul.f32 %v3619_v10, %v1341_v44  ;;  %vm1306_vm11 = vmor %vm1304_vm9, %vm1305_vm5  ;;  %v1288_v16 = vmul.f32 %v1287_v11, %v4572_v15  ;;  %vm1309_vm15 = vcmp.eq.f32.partialorder %v1308_v25, 8.507059e+37  ;;  %v1351_v23 = vor.u32 1.1754944e-38, %v1350_v61 }
 0x70b   :  { %v1307_v14 = vsel %vm1306_vm11, %v3617_v26, %v1303_v19  ;;  %vm1346_vm2 = vmor %vm1344_vm14, %vm1345_vm6  ;;  %v1328_v48 = vmul.f32 %v1327_v46, %v4577_v41  ;;  %vm1349_vm7 = vcmp.eq.f32.partialorder %v1348_v0, 8.507059e+37  ;;  %v1128_v35 = vmul.f32 %v4681_v8, %v4483_v32 }
 0x70c   :  { %v1343_v36 = vadd.f32 %v3619_v10, %v1342_v31  ;;  %v1312_v1 = vsel %vm1309_vm15, %v1311_v27, %v1307_v14  ;;  %v1152_v56 = vsel %vm4797_vm1, %v4711_v54, %v1147_v60  ;;  %v1112_v15 = vsel %vm4805_vm3, %v4661_v4, %v1107_v57  ;;  %v6031_v27 = vld [vmem:[#allocation20_spill] sm:$0xff] }
 0x70d   :  { %v1313_v53 = vmul.f32 %v1312_v1, %v1288_v16  ;;  %v1193_v41 = vmul.f32 %v1192_v43, %v4725_v38  ;;  %v3306_v26 = vclamps-f32 %v1273_v33, 1.0  ;;  %v6028_v32 = vand.u32 2147483647, %v4536_v20  ;;  %v3312_v14 = vld [vmem:[%s5975_s4 + $0x18] sm:$0xff] }
 0x70e   :  { %v1347_v52 = vsel %vm1346_vm2, %v3619_v10, %v1343_v36  ;;  %v1088_v8 = vmul.f32 %v4642_v51, %v4466_v37  ;;  %v6029_v30 = vsel %vm4657_vm10, %v4565_v24, %v4636_v12  ;;  %v1153_v3 = vmul.f32 %v1152_v56, %v1128_v35 }
 0x70f   :  { %v1352_v50 = vsel %vm1349_vm7, %v1351_v23, %v1347_v52  ;;  %vm1069_vm4 = vcmp.eq.f32.partialorder %v6028_v32, 8.507059e+37  ;;  %v3307_v54 = vclamps-f32 %v1313_v53, 1.0  ;;  %v3305_v4 = vclamps-f32 %v1233_v2, 1.0  ;;  %v6033_v53 = vld [vmem:[#allocation19_spill] sm:$0xff] }
 0x710   :  { %v1353_v10 = vmul.f32 %v1352_v50, %v1328_v48  ;;  %v1072_v39 = vsel %vm1069_vm4, %v4640_v62, %v6029_v30  ;;  %v1048_v38 = vmul.f32 %v4596_v63, %v4454_v55  ;;  %v1113_v60 = vmul.f32 %v1112_v15, %v1088_v8  ;;  %v6032_v48 = vld [vmem:[#allocation21_spill] sm:$0xff] }
 0x711   :  { %v1026_v20 = vmul.f32 0.5, %v4555_v28  ;;  %v1362_v22 = vadd.f32 1.0, %v3307_v54  ;;  %v3304_v9 = vclamps-f32 %v1193_v41, 1.0  ;;  %v1361_v37 = vadd.f32 1.0, %v3306_v26 }
 0x712   :  { %v3308_v57 = vclamps-f32 %v1353_v10, 1.0  ;;  %v1027_v51 = vmul.f32 0.5, %v4563_v21  ;;  %v1073_v49 = vmul.f32 %v1072_v39, %v1048_v38  ;;  %v1025_v24 = vmul.f32 0.5, %v4523_v17  ;;  %v3537_v39 = vld [vmem:[%s5978_s7 + $0x18] sm:$0xff] }
 0x713   :  { %v3303_v12 = vclamps-f32 %v1153_v3, 1.0  ;;  %v1360_v62 = vadd.f32 1.0, %v3305_v4  ;;  %v1370_v58 = vmul.f32 %v1362_v22, %v1026_v20  ;;  %v1024_v13 = vmul.f32 0.5, %v4507_v5  ;;  %v6030_v5 = vld [vmem:[#allocation22_spill] sm:$0xff]  ;;  %1490 = vmatpush.bf16.msrb.mxu1 %v3537_v39 }
 0x714   :  { %v1363_v47 = vadd.f32 1.0, %v3308_v57  ;;  %v3302_v34 = vclamps-f32 %v1113_v60, 1.0  ;;  %v1359_v55 = vadd.f32 1.0, %v3304_v9  ;;  %v1369_v63 = vmul.f32 %v1361_v37, %v1025_v24  ;;  %v3536_v57 = vld [vmem:[%s5978_s7 + $0x10] sm:$0xff] }
 0x715   :  { %v3301_v28 = vclamps-f32 %v1073_v49, 1.0  ;;  %v1358_v6 = vadd.f32 1.0, %v3303_v12  ;;  %v1023_v11 = vmul.f32 0.5, %v4485_v29  ;;  %v1368_v18 = vmul.f32 %v1360_v62, %v1024_v13  ;;  %v3535_v29 = vld [vmem:[%s5974_s3 + $0x8] sm:$0xff] }
 0x716   :  { %v1371_v40 = vmul.f32 %v1363_v47, %v1027_v51  ;;  %v1357_v21 = vadd.f32 1.0, %v3302_v34  ;;  %v1022_v44 = vmul.f32 0.5, %v4474_v45  ;;  %v1021_v61 = vmul.f32 0.5, %v4461_v42  ;;  %v3311_v42 = vld [vmem:[%s5975_s4 + $0x10] sm:$0xff] }
 0x717   :  { %v1367_v17 = vmul.f32 %v1359_v55, %v1023_v11  ;;  %v1377_v7 = vpack.c.bf16 %v1369_v63, %v1368_v18  ;;  %v1356_v25 = vadd.f32 1.0, %v3301_v28  ;;  %v1020_v31 = vmul.f32 0.5, %v6030_v5  ;;  %1491 = vmatpush.bf16.msrb.mxu1 %v3536_v57 }
 0x718   :  { %v1378_v59 = vpack.c.bf16 %v1371_v40, %v1370_v58  ;;  %v1366_v46 = vmul.f32 %v1358_v6, %v1022_v44  ;;  %v1365_v0 = vmul.f32 %v1357_v21, %v1021_v61  ;;  %v1408_v6 = vld [vmem:[#allocation7 + $0x18] sm:$0xff]  ;;  %v1410_v21 = vld [vmem:[#allocation8 + $0x10] sm:$0xff] }
 0x719   :  { %v1364_v2 = vmul.f32 %v1356_v25, %v1020_v31  ;;  %v1411_v44 = vld [vmem:[#allocation8 + $0x18] sm:$0xff] }
 0x71a   :  { %1394 = vmatpush.bf16.msra.mxu3 %v1378_v59  ;;  %v1376_v43 = vpack.c.bf16 %v1367_v17, %v1366_v46  ;;  %v1407_v59 = vld [vmem:[#allocation7 + $0x10] sm:$0xff]  ;;  %v3322_v46 = vld [vmem:[%s5979_s8 + $0x10] sm:$0xff] }
 0x71b   :  { %v1375_v19 = vpack.c.bf16 %v1365_v0, %v1364_v2  ;;  %v3323_v2 = vld [vmem:[%s5979_s8 + $0x18] sm:$0xff] }
 0x71e   :  { %1395 = vmatpush.bf16.msra.mxu3 %v1377_v7 }
 0x722   :  { %1396 = vmatpush.bf16.msra.mxu3 %v1376_v43 }
 0x726   :  { %1397 = vmatpush.bf16.msra.mxu3 %v1375_v19 }
 0x729   :  { %3317 = vmatmul.msk.bf16.vlgmr.msra.gmra.mxu3 %vm652_vm13, %v3535_v29 }
 0x7ac   :  { %v1399_v45 = vpop.f32.mrf.mxu3 }
 0x7ad   :  { %v1400_v33 = vadd.f32 %v3311_v42, %v1399_v45 }
 0x7af   :  { %v4862_v36 = vadd.f32 %v1400_v33, %v6031_v27 }
 0x7b1   :  { %v1412_v16 = vsel %vm152_vm0, %v4862_v36, 0.0 }
 0x7b2   :  { %1413 = vadd.xlane.f32.xlu0 %v1412_v16 }
 0x7b4   :  { %v1401_v23 = vpop.f32.mrf.mxu3 }
 0x7b5   :  { %v1402_v1 = vadd.f32 %v3312_v14, %v1401_v23 }
 0x7b7   :  { %v4870_v52 = vadd.f32 %v1402_v1, %v6032_v48 }
 0x7b9   :  { %v1415_v35 = vsel %vm152_vm0, %v4870_v52, 0.0 }
 0x7ba   :  { %1416 = vadd.xlane.f32.xlu1 %v1415_v35 }
 0x825   :  { %v1414_v56 = vpop.xlane.xlu0 %1413 }
 0x826   :  { %v1418_v50 = vmul.f32 %v1414_v56, %v6033_v53 }
 0x828   :  { %v1420_v15 = vsub.f32 %v4862_v36, %v1418_v50 }
 0x82a   :  { %v1422_v41 = vmul.f32 %v1420_v15, %v1420_v15 }
 0x82c   :  { %v1424_v26 = vsel %vm152_vm0, %v1422_v41, 0.0 }
 0x82d   :  { %v1417_v10 = vpop.xlane.xlu1 %1416  ;;  %1425 = vadd.xlane.f32.xlu2 %v1424_v26 }
 0x82e   :  { %v1419_v32 = vmul.f32 %v1417_v10, %v6033_v53 }
 0x830   :  { %v1421_v8 = vsub.f32 %v4870_v52, %v1419_v32 }
 0x832   :  { %v1423_v54 = vmul.f32 %v1421_v8, %v1421_v8 }
 0x834   :  { %v1427_v30 = vsel %vm152_vm0, %v1423_v54, 0.0 }
 0x835   :  { %1428 = vadd.xlane.f32.xlu0 %v1427_v30 }
 0x8a0   :  { %v1426_v3 = vpop.xlane.xlu2 %1425 }
 0x8a1   :  { %v1430_v4 = vmul.f32 %v1426_v3, %v6033_v53 }
 0x8a3   :  { %v1432_v38 = vadd.f32 1e-05, %v1430_v4 }
 0x8a5   :  { %3620 = vrsqrt.f32 %v1432_v38  ;;  %vm1440_vm12 = vweird.f32 %v1432_v38 }
 0x8a8   :  { %v1429_v60 = vpop.xlane.xlu0 %1428 }
 0x8a9   :  { %v1431_v20 = vmul.f32 %v1429_v60, %v6033_v53 }
 0x8ab   :  { %v3621_v22 = vpop.eup %3620  ;;  %v1433_v9 = vadd.f32 1e-05, %v1431_v20 }
 0x8ac   :  { %v1435_v37 = vmul.f32 %v3621_v22, %v1432_v38  ;;  %vm1441_vm10 = vweird.f32 %v3621_v22 }
 0x8ad   :  { %3622 = vrsqrt.f32 %v1433_v9  ;;  %vm1442_vm1 = vmor %vm1440_vm12, %vm1441_vm10  ;;  %vm1450_vm5 = vweird.f32 %v1433_v9 }
 0x8ae   :  { %v1436_v51 = vmul.f32 %v3621_v22, %v1435_v37 }
 0x8b0   :  { %v1437_v47 = vmul.f32 0.5, %v1436_v51 }
 0x8b2   :  { %v1438_v49 = vsub.f32 1.5, %v1437_v47 }
 0x8b3   :  { %v3623_v24 = vpop.eup %3622 }
 0x8b4   :  { %v1439_v12 = vmul.f32 %v3621_v22, %v1438_v49  ;;  %v1445_v62 = vmul.f32 %v3623_v24, %v1433_v9  ;;  %vm1451_vm3 = vweird.f32 %v3623_v24 }
 0x8b5   :  { %vm1452_vm6 = vmor %vm1450_vm5, %vm1451_vm3 }
 0x8b6   :  { %v1446_v58 = vmul.f32 %v3623_v24, %v1445_v62  ;;  %v1443_v40 = vsel %vm1442_vm1, %v3621_v22, %v1439_v12 }
 0x8b7   :  { %v1454_v55 = vmul.f32 %v1443_v40, %v1420_v15 }
 0x8b8   :  { %v1447_v13 = vmul.f32 0.5, %v1446_v58  ;;  %v3538_v58 = vld [vmem:[%s5980_s9 + $0x10] sm:$0xff] }
 0x8b9   :  { %v1456_v18 = vmul.f32 %v1454_v55, %v1407_v59 }
 0x8ba   :  { %v1448_v34 = vsub.f32 1.5, %v1447_v13 }
 0x8bb   :  { %v1458_v7 = vadd.f32 %v1456_v18, %v1410_v21 }
 0x8bc   :  { %v1449_v63 = vmul.f32 %v3623_v24, %v1448_v34 }
 0x8be   :  { %v1453_v28 = vsel %vm1452_vm6, %v3623_v24, %v1449_v63  ;;  %v3539_v24 = vld [vmem:[%s5980_s9 + $0x18] sm:$0xff] }
 0x8bf   :  { %v1455_v11 = vmul.f32 %v1453_v28, %v1421_v8  ;;  %1616 = vmatpush.bf16.msrb.mxu3 %v3539_v24 }
 0x8c1   :  { %v1457_v17 = vmul.f32 %v1455_v11, %v1408_v6 }
 0x8c3   :  { %v1459_v25 = vadd.f32 %v1457_v17, %v1411_v44  ;;  %1617 = vmatpush.bf16.msrb.mxu3 %v3538_v58 }
 0x8c5   :  { %v1460_v61 = vpack.c.bf16 %v1459_v25, %v1458_v7 }
 0x8c7   :  { %3332 = vmatmul.msk.bf16.vlgmr.msrb.gmra.mxu1 %vm152_vm0, %v1460_v61 }
 0x944   :  { %v1493_v5 = vpop.f32.mrf.mxu1 }
 0x945   :  { %v4892_v31 = vadd.f32 %v3322_v46, %v1493_v5 }
 0x947   :  { %v4895_v0 = vmul.f32 0.70710677, %v4892_v31 }
 0x949   :  { %v1502_v43 = vmul.f32 %v4895_v0, %v4895_v0 }
 0x94b   :  { %v1503_v19 = vmin.f32 %v1502_v43, 16.0 }
 0x94c   :  { %v1495_v29 = vpop.f32.mrf.mxu1 }
 0x94d   :  { %v1504_v42 = vmul.f32 2.1237322e-06, %v1503_v19  ;;  %v1515_v45 = vmul.f32 3.8918573e-05, %v1503_v19  ;;  %v4902_v33 = vadd.f32 %v3323_v2, %v1495_v29 }
 0x94f   :  { %v1505_v27 = vadd.f32 0.00028619796, %v1504_v42  ;;  %v1516_v16 = vadd.f32 0.001143296, %v1515_v45  ;;  %v4905_v14 = vmul.f32 0.70710677, %v4902_v33 }
 0x951   :  { %v1517_v23 = vmul.f32 %v1516_v16, %v1503_v19  ;;  %v1542_v1 = vmul.f32 %v4905_v14, %v4905_v14  ;;  %v1506_v48 = vmul.f32 %v1505_v27, %v1503_v19 }
 0x953   :  { %v1518_v35 = vadd.f32 0.014752088, %v1517_v23  ;;  %v1543_v56 = vmin.f32 %v1542_v1, 16.0  ;;  %v1507_v26 = vadd.f32 0.0036580483, %v1506_v48 }
 0x955   :  { %v1519_v50 = vmul.f32 %v1518_v35, %v1503_v19  ;;  %v1544_v15 = vmul.f32 2.1237322e-06, %v1543_v56  ;;  %v1555_v41 = vmul.f32 3.8918573e-05, %v1543_v56  ;;  %v1508_v3 = vmul.f32 %v1507_v26, %v1503_v19 }
 0x957   :  { %v1520_v10 = vadd.f32 0.112945676, %v1519_v50  ;;  %v1545_v32 = vadd.f32 0.00028619796, %v1544_v15  ;;  %v1556_v8 = vadd.f32 0.001143296, %v1555_v41 }
 0x958   :  { %v1509_v22 = vadd.f32 0.05243302, %v1508_v3  ;;  %v1593_v3 = vld [vmem:[#allocation5 + $0x10] sm:$0xff] }
 0x959   :  { %v1521_v54 = vmul.f32 %v1520_v10, %v1503_v19  ;;  %v1546_v30 = vmul.f32 %v1545_v32, %v1543_v56  ;;  %v1557_v39 = vmul.f32 %v1556_v8, %v1543_v56  ;;  %v1498_v10 = vmul.f32 0.5, %v4892_v31 }
 0x95a   :  { %v1510_v49 = vmul.f32 %v1509_v22, %v1503_v19  ;;  %v1499_v32 = vmul.f32 0.5, %v4902_v33 }
 0x95b   :  { %v1522_v4 = vadd.f32 0.4994258, %v1521_v54  ;;  %v1547_v57 = vadd.f32 0.0036580483, %v1546_v30  ;;  %v1558_v38 = vadd.f32 0.014752088, %v1557_v39 }
 0x95c   :  { %v1511_v34 = vadd.f32 0.18741608, %v1510_v49 }
 0x95d   :  { %v1523_v60 = vmul.f32 %v1522_v4, %v1503_v19  ;;  %v1559_v20 = vmul.f32 %v1558_v38, %v1543_v56  ;;  %v1548_v37 = vmul.f32 %v1547_v57, %v1543_v56 }
 0x95e   :  { %v1512_v6 = vmul.f32 %v1511_v34, %v1503_v19 }
 0x95f   :  { %v1524_v9 = vadd.f32 1.0, %v1523_v60  ;;  %v1560_v51 = vadd.f32 0.112945676, %v1559_v20  ;;  %v1549_v12 = vadd.f32 0.05243302, %v1548_v37  ;;  %v1594_v60 = vld [vmem:[#allocation5 + $0x18] sm:$0xff] }
 0x960   :  { %v1513_v7 = vadd.f32 1.1283791, %v1512_v6 }
 0x961   :  { %3624 = vrcp.f32 %v1524_v9  ;;  %v1561_v47 = vmul.f32 %v1560_v51, %v1543_v56  ;;  %v1550_v63 = vmul.f32 %v1549_v12, %v1543_v56  ;;  %v1536_v18 = vand.u32 2147483648, %v1524_v9 }
 0x962   :  { %v1534_v44 = vand.u32 2147483647, %v1524_v9  ;;  %vm1530_vm11 = vweird.f32 %v1524_v9  ;;  %v1514_v29 = vmul.f32 %v1513_v7, %v4895_v0 }
 0x963   :  { %v1562_v62 = vadd.f32 0.4994258, %v1561_v47  ;;  %v1551_v21 = vadd.f32 0.18741608, %v1550_v63  ;;  %v1537_v46 = vor.u32 1.1754944e-38, %v1536_v18 }
 0x964   :  { %vm1535_vm15 = vcmp.eq.f32.partialorder %v1534_v44, 8.507059e+37 }
 0x965   :  { %v1563_v40 = vmul.f32 %v1562_v62, %v1543_v56  ;;  %v1552_v5 = vmul.f32 %v1551_v21, %v1543_v56 }
 0x967   :  { %v3625_v13 = vpop.eup %3624  ;;  %v1564_v59 = vadd.f32 1.0, %v1563_v40  ;;  %v1553_v19 = vadd.f32 1.1283791, %v1552_v5 }
 0x968   :  { %v1526_v55 = vmul.f32 %v3625_v13, %v1524_v9  ;;  %vm1531_vm9 = vweird.f32 %v3625_v13 }
 0x969   :  { %3626 = vrcp.f32 %v1564_v59  ;;  %vm1532_vm14 = vmor %vm1530_vm11, %vm1531_vm9  ;;  %v1576_v45 = vand.u32 2147483648, %v1564_v59  ;;  %v1574_v23 = vand.u32 2147483647, %v1564_v59  ;;  %vm1570_vm7 = vweird.f32 %v1564_v59 }
 0x96a   :  { %v1527_v28 = vsub.f32 1.0, %v1526_v55  ;;  %v1554_v50 = vmul.f32 %v1553_v19, %v4905_v14 }
 0x96b   :  { %v1577_v48 = vor.u32 1.1754944e-38, %v1576_v45  ;;  %vm1575_vm10 = vcmp.eq.f32.partialorder %v1574_v23, 8.507059e+37 }
 0x96c   :  { %v1528_v11 = vmul.f32 %v3625_v13, %v1527_v28 }
 0x96e   :  { %v1529_v17 = vadd.f32 %v3625_v13, %v1528_v11 }
 0x96f   :  { %v3627_v25 = vpop.eup %3626 }
 0x970   :  { %v1533_v61 = vsel %vm1532_vm14, %v3625_v13, %v1529_v17  ;;  %v1566_v43 = vmul.f32 %v3627_v25, %v1564_v59  ;;  %vm1571_vm2 = vweird.f32 %v3627_v25 }
 0x971   :  { %v1538_v2 = vsel %vm1535_vm15, %v1537_v46, %v1533_v61  ;;  %vm1572_vm4 = vmor %vm1570_vm7, %vm1571_vm2 }
 0x972   :  { %v1567_v42 = vsub.f32 1.0, %v1566_v43  ;;  %v1539_v27 = vmul.f32 %v1538_v2, %v1514_v29  ;;  %v3348_v2 = vld [vmem:[%s5976_s5 + $0x20] sm:$0xff] }
 0x974   :  { %v1568_v16 = vmul.f32 %v3627_v25, %v1567_v42  ;;  %v3333_v35 = vclamps-f32 %v1539_v27, 1.0  ;;  %v3349_v42 = vld [vmem:[%s5976_s5 + $0x28] sm:$0xff]  ;;  %v3350_v27 = vld [vmem:[%s5977_s6 + $0x20] sm:$0xff] }
 0x976   :  { %v1569_v1 = vadd.f32 %v3627_v25, %v1568_v16  ;;  %v1582_v26 = vadd.f32 1.0, %v3333_v35  ;;  %v3351_v16 = vld [vmem:[%s5977_s6 + $0x28] sm:$0xff] }
 0x978   :  { %v1573_v56 = vsel %vm1572_vm4, %v3627_v25, %v1569_v1  ;;  %v1584_v54 = vmul.f32 %v1582_v26, %v1498_v10  ;;  %v3360_v26 = vld [vmem:[%s5973_s2 + $0x80] sm:$0xff] }
 0x979   :  { %v1578_v15 = vsel %vm1575_vm10, %v1577_v48, %v1573_v56  ;;  %v3541_v56 = vld [vmem:[%s5972_s1 + $0x48] sm:$0xff] }
 0x97a   :  { %v1579_v41 = vmul.f32 %v1578_v15, %v1554_v50  ;;  %v3540_v50 = vld [vmem:[%s5972_s1 + $0x40] sm:$0xff]  ;;  %v3542_v15 = vld [vmem:[%s5972_s1 + $0x50] sm:$0xff] }
 0x97c   :  { %v3334_v0 = vclamps-f32 %v1579_v41, 1.0  ;;  %v3543_v41 = vld [vmem:[%s5972_s1 + $0x58] sm:$0xff] }
 0x97e   :  { %v1583_v8 = vadd.f32 1.0, %v3334_v0 }
 0x980   :  { %v1585_v30 = vmul.f32 %v1583_v8, %v1499_v32  ;;  %v3361_v8 = vld [vmem:[%s5973_s2 + $0x88] sm:$0xff] }
 0x982   :  { %v1586_v39 = vpack.c.bf16 %v1585_v30, %v1584_v54 }
 0x984   :  { %3347 = vmatmul.msk.bf16.vlgmr.msrb.gmra.mxu3 %vm152_vm0, %v1586_v39 }
 0xa07   :  { %v1619_v4 = vpop.f32.mrf.mxu3 }
 0xa08   :  { %v1620_v57 = vadd.f32 %v1619_v4, %v1593_v3 }
 0xa0a   :  { %v4921_v14 = vadd.f32 %v1620_v57, %v4862_v36 }
 0xa0c   :  { %6034 = vst [vmem:[#allocation22_spill] sm:$0xff] %v4921_v14  ;;  %v1632_v38 = vsel %vm152_vm0, %v4921_v14, 0.0 }
 0xa0d   :  { %1633 = vadd.xlane.f32.xlu1 %v1632_v38 }
 0xa0f   :  { %v1621_v31 = vpop.f32.mrf.mxu3 }
 0xa10   :  { %v1622_v20 = vadd.f32 %v1621_v31, %v1594_v60  ;;  %v3362_v60 = vld [vmem:[%s5973_s2 + $0x90] sm:$0xff] }
 0xa12   :  { %v4926_v33 = vadd.f32 %v1622_v20, %v4870_v52 }
 0xa14   :  { %6035 = vst [vmem:[#allocation20_spill] sm:$0xff] %v4926_v33  ;;  %v1635_v22 = vsel %vm152_vm0, %v4926_v33, 0.0 }
 0xa15   :  { %1636 = vadd.xlane.f32.xlu2 %v1635_v22 }
 0xa80   :  { %v1634_v9 = vpop.xlane.xlu1 %1633 }
 0xa81   :  { %v1638_v37 = vmul.f32 %v1634_v9, %v6033_v53  ;;  %v3363_v9 = vld [vmem:[%s5973_s2 + $0x98] sm:$0xff] }
 0xa83   :  { %v1640_v36 = vsub.f32 %v4921_v14, %v1638_v37 }
 0xa85   :  { %v1642_v51 = vmul.f32 %v1640_v36, %v1640_v36 }
 0xa87   :  { %v1644_v47 = vsel %vm152_vm0, %v1642_v51, 0.0 }
 0xa88   :  { %v1637_v49 = vpop.xlane.xlu2 %1636  ;;  %1645 = vadd.xlane.f32.xlu0 %v1644_v47 }
 0xa89   :  { %v1639_v24 = vmul.f32 %v1637_v49, %v6033_v53 }
 0xa8b   :  { %v1641_v12 = vsub.f32 %v4926_v33, %v1639_v24 }
 0xa8d   :  { %v1643_v52 = vmul.f32 %v1641_v12, %v1641_v12 }
 0xa8f   :  { %v1647_v62 = vsel %vm152_vm0, %v1643_v52, 0.0 }
 0xa90   :  { %1648 = vadd.xlane.f32.xlu1 %v1647_v62 }
 0xafb   :  { %v1646_v58 = vpop.xlane.xlu0 %1645 }
 0xafc   :  { %v1650_v40 = vmul.f32 %v1646_v58, %v6033_v53 }
 0xafe   :  { %v1652_v13 = vadd.f32 1e-05, %v1650_v40 }
 0xb00   :  { %3628 = vrsqrt.f32 %v1652_v13  ;;  %vm1660_vm1 = vweird.f32 %v1652_v13 }
 0xb03   :  { %v1649_v34 = vpop.xlane.xlu1 %1648 }
 0xb04   :  { %v1651_v55 = vmul.f32 %v1649_v34, %v6033_v53 }
 0xb06   :  { %v3629_v63 = vpop.eup %3628  ;;  %v1653_v59 = vadd.f32 1e-05, %v1651_v55 }
 0xb07   :  { %v1655_v28 = vmul.f32 %v3629_v63, %v1652_v13  ;;  %vm1661_vm12 = vweird.f32 %v3629_v63 }
 0xb08   :  { %3630 = vrsqrt.f32 %v1653_v59  ;;  %vm1662_vm3 = vmor %vm1660_vm1, %vm1661_vm12  ;;  %vm1670_vm6 = vweird.f32 %v1653_v59 }
 0xb09   :  { %v1656_v6 = vmul.f32 %v3629_v63, %v1655_v28 }
 0xb0b   :  { %v1657_v11 = vmul.f32 0.5, %v1656_v6  ;;  %v3364_v6 = vld [vmem:[%s5973_s2 + $0xa0] sm:$0xff] }
 0xb0d   :  { %v1658_v18 = vsub.f32 1.5, %v1657_v11 }
 0xb0e   :  { %v3631_v21 = vpop.eup %3630 }
 0xb0f   :  { %v1659_v44 = vmul.f32 %v3629_v63, %v1658_v18  ;;  %v1665_v17 = vmul.f32 %v3631_v21, %v1653_v59  ;;  %vm1671_vm5 = vweird.f32 %v3631_v21 }
 0xb10   :  { %vm1672_vm9 = vmor %vm1670_vm6, %vm1671_vm5 }
 0xb11   :  { %v1666_v7 = vmul.f32 %v3631_v21, %v1665_v17  ;;  %v1663_v25 = vsel %vm1662_vm3, %v3629_v63, %v1659_v44 }
 0xb12   :  { %v1674_v5 = vmul.f32 %v1663_v25, %v1640_v36 }
 0xb13   :  { %v1667_v61 = vmul.f32 0.5, %v1666_v7 }
 0xb14   :  { %v1676_v45 = vmul.f32 %v3348_v2, %v1674_v5 }
 0xb15   :  { %v1668_v46 = vsub.f32 1.5, %v1667_v61 }
 0xb16   :  { %v1678_v1 = vadd.f32 %v3350_v27, %v1676_v45 }
 0xb17   :  { %v1669_v43 = vmul.f32 %v3631_v21, %v1668_v46 }
 0xb19   :  { %v1673_v29 = vsel %vm1672_vm9, %v3631_v21, %v1669_v43 }
 0xb1a   :  { %v1675_v19 = vmul.f32 %v1673_v29, %v1641_v12 }
 0xb1c   :  { %v1677_v23 = vmul.f32 %v3349_v42, %v1675_v19  ;;  %v3365_v19 = vld [vmem:[%s5973_s2 + $0xa8] sm:$0xff] }
 0xb1e   :  { %v1679_v48 = vadd.f32 %v3351_v16, %v1677_v23 }
 0xb20   :  { %v1689_v35 = vpack.c.bf16 %v1679_v48, %v1678_v1 }
 0xb22   :  { %1738 = vmatpush.bf16.msra.mxu1 %v1689_v35 }
 0xb25   :  { %3384 = vmatmul.msk.bf16.vlgmr.msra.gmra.mxu1 %vm245_vm8, %v3540_v50 }
 0xb35   :  { %3385 = vmatmul.msk.bf16.gmra.mxu1 %vm245_vm8, %v3541_v56 }
 0xb45   :  { %3386 = vmatmul.msk.bf16.gmra.mxu1 %vm245_vm8, %v3542_v15 }
 0xb55   :  { %3387 = vmatmul.msk.bf16.gmra.mxu1 %vm245_vm8, %v3543_v41 }
 0xba2   :  { %v1740_v0 = vpop.f32.mrf.mxu1 }
 0xba3   :  { %v4969_v10 = vadd.f32 %v3360_v26, %v1740_v0 }
 0xba5   :  { %6036 = vst [vmem:[#allocation21_spill] sm:$0xff] %v4969_v10  ;;  %v4972_v32 = vmul.f32 0.70710677, %v4969_v10 }
 0xba7   :  { %v1776_v30 = vmul.f32 %v4972_v32, %v4972_v32 }
 0xba9   :  { %v4981_v3 = vmin.f32 %v1776_v30, 16.0 }
 0xbaa   :  { %v1742_v54 = vpop.f32.mrf.mxu1 }
 0xbab   :  { %v4979_v39 = vadd.f32 %v3361_v8, %v1742_v54  ;;  %v1789_v38 = vmul.f32 3.8918573e-05, %v4981_v3  ;;  %v1778_v13 = vmul.f32 2.1237322e-06, %v4981_v3 }
 0xbad   :  { %v4984_v4 = vmul.f32 0.70710677, %v4979_v39  ;;  %v1790_v20 = vadd.f32 0.001143296, %v1789_v38  ;;  %v1779_v11 = vadd.f32 0.00028619796, %v1778_v13 }
 0xbaf   :  { %v1816_v31 = vmul.f32 %v4984_v4, %v4984_v4  ;;  %v1791_v51 = vmul.f32 %v1790_v20, %v4981_v3  ;;  %v1780_v25 = vmul.f32 %v1779_v11, %v4981_v3 }
 0xbb1   :  { %v4997_v37 = vmin.f32 %v1816_v31, 16.0  ;;  %v1792_v52 = vadd.f32 0.014752088, %v1791_v51  ;;  %v1781_v45 = vadd.f32 0.0036580483, %v1780_v25 }
 0xbb2   :  { %v1745_v57 = vpop.f32.mrf.mxu1 }
 0xbb3   :  { %v4992_v22 = vadd.f32 %v3362_v60, %v1745_v57  ;;  %v1829_v24 = vmul.f32 3.8918573e-05, %v4997_v37  ;;  %v1793_v55 = vmul.f32 %v1792_v52, %v4981_v3  ;;  %v1818_v61 = vmul.f32 2.1237322e-06, %v4997_v37 }
 0xbb4   :  { %v1782_v15 = vmul.f32 %v1781_v45, %v4981_v3 }
 0xbb5   :  { %v5001_v47 = vmul.f32 0.70710677, %v4992_v22  ;;  %v1830_v58 = vadd.f32 0.001143296, %v1829_v24  ;;  %v1794_v18 = vadd.f32 0.112945676, %v1793_v55 }
 0xbb6   :  { %v1819_v27 = vadd.f32 0.00028619796, %v1818_v61  ;;  %v1783_v31 = vadd.f32 0.05243302, %v1782_v15 }
 0xbb7   :  { %v1856_v62 = vmul.f32 %v5001_v47, %v5001_v47  ;;  %v1831_v28 = vmul.f32 %v1830_v58, %v4997_v37  ;;  %v1795_v5 = vmul.f32 %v1794_v18, %v4981_v3 }
 0xbb8   :  { %v1820_v41 = vmul.f32 %v1819_v27, %v4997_v37  ;;  %v1784_v13 = vmul.f32 %v1783_v31, %v4981_v3 }
 0xbb9   :  { %v5015_v63 = vmin.f32 %v1856_v62, 16.0  ;;  %v1832_v7 = vadd.f32 0.014752088, %v1831_v28  ;;  %v1796_v23 = vadd.f32 0.4994258, %v1795_v5 }
 0xbba   :  { %v1747_v36 = vpop.f32.mrf.mxu1  ;;  %v1821_v20 = vadd.f32 0.0036580483, %v1820_v41 }
 0xbbb   :  { %v5003_v49 = vadd.f32 %v3363_v9, %v1747_v36  ;;  %v1869_v21 = vmul.f32 3.8918573e-05, %v5015_v63  ;;  %v1833_v42 = vmul.f32 %v1832_v7, %v4997_v37  ;;  %v1797_v26 = vmul.f32 %v1796_v23, %v4981_v3 }
 0xbbc   :  { %v1858_v0 = vmul.f32 2.1237322e-06, %v5015_v63 }
 0xbbd   :  { %v5007_v12 = vmul.f32 0.70710677, %v5003_v49  ;;  %v1870_v43 = vadd.f32 0.001143296, %v1869_v21  ;;  %v1834_v50 = vadd.f32 0.112945676, %v1833_v42 }
 0xbbe   :  { %v5054_v36 = vadd.f32 1.0, %v1797_v26  ;;  %v1859_v51 = vadd.f32 0.00028619796, %v1858_v0 }
 0xbbf   :  { %v1896_v40 = vmul.f32 %v5007_v12, %v5007_v12  ;;  %v1871_v1 = vmul.f32 %v1870_v43, %v5015_v63  ;;  %v1835_v60 = vmul.f32 %v1834_v50, %v4997_v37  ;;  %v1785_v43 = vadd.f32 0.18741608, %v1784_v13 }
 0xbc0   :  { %3632 = vrcp.f32 %v5054_v36  ;;  %v1860_v11 = vmul.f32 %v1859_v51, %v5015_v63  ;;  %vm1804_vm11 = vweird.f32 %v5054_v36 }
 0xbc1   :  { %v5017_v59 = vmin.f32 %v1896_v40, 16.0  ;;  %v1872_v8 = vadd.f32 0.014752088, %v1871_v1  ;;  %v1836_v40 = vadd.f32 0.4994258, %v1835_v60 }
 0xbc2   :  { %v1750_v34 = vpop.f32.mrf.mxu1 }
 0xbc3   :  { %v1909_v44 = vmul.f32 3.8918573e-05, %v5017_v59  ;;  %v5025_v17 = vadd.f32 %v3364_v6, %v1750_v34  ;;  %v1873_v24 = vmul.f32 %v1872_v8, %v5015_v63  ;;  %v1822_v34 = vmul.f32 %v1821_v20, %v4997_v37  ;;  %v3366_v6 = vld [vmem:[%s5973_s2 + $0xb0] sm:$0xff] }
 0xbc4   :  { %v1898_v21 = vmul.f32 2.1237322e-06, %v5017_v59  ;;  %v1837_v7 = vmul.f32 %v1836_v40, %v4997_v37 }
 0xbc5   :  { %v1910_v2 = vadd.f32 0.001143296, %v1909_v44  ;;  %v5031_v29 = vmul.f32 0.70710677, %v5025_v17  ;;  %v1874_v18 = vadd.f32 0.112945676, %v1873_v24 }
 0xbc6   :  { %v1899_v27 = vadd.f32 0.00028619796, %v1898_v21  ;;  %v5083_v50 = vpop.eup %3632  ;;  %v5085_v15 = vadd.f32 1.0, %v1837_v7 }
 0xbc7   :  { %v1936_v16 = vmul.f32 %v5031_v29, %v5031_v29  ;;  %v1911_v48 = vmul.f32 %v1910_v2, %v5017_v59  ;;  %v1823_v2 = vadd.f32 0.05243302, %v1822_v34  ;;  %v1875_v45 = vmul.f32 %v1874_v18, %v5015_v63 }
 0xbc8   :  { %v1900_v20 = vmul.f32 %v1899_v27, %v5017_v59  ;;  %3634 = vrcp.f32 %v5085_v15  ;;  %vm1805_vm14 = vweird.f32 %v5083_v50  ;;  %vm1844_vm15 = vweird.f32 %v5085_v15 }
 0xbc9   :  { %v5043_v56 = vmin.f32 %v1936_v16, 16.0  ;;  %v1912_v57 = vadd.f32 0.014752088, %v1911_v48  ;;  %v1824_v8 = vmul.f32 %v1823_v2, %v4997_v37  ;;  %v1876_v31 = vadd.f32 0.4994258, %v1875_v45  ;;  %vm5175_vm2 = vmor %vm1804_vm11, %vm1805_vm14 }
 0xbca   :  { %v1752_v46 = vpop.f32.mrf.mxu1 }
 0xbcb   :  { %v5041_v35 = vadd.f32 %v3365_v19, %v1752_v46  ;;  %v1949_v54 = vmul.f32 3.8918573e-05, %v5043_v56  ;;  %v1913_v52 = vmul.f32 %v1912_v57, %v5017_v59  ;;  %v3367_v46 = vld [vmem:[%s5973_s2 + $0xb8] sm:$0xff]  ;;  %v1861_v19 = vadd.f32 0.0036580483, %v1860_v11 }
 0xbcc   :  { %v1938_v41 = vmul.f32 2.1237322e-06, %v5043_v56  ;;  %v1786_v57 = vmul.f32 %v1785_v43, %v4981_v3  ;;  %v1825_v3 = vadd.f32 0.18741608, %v1824_v8  ;;  %v1901_v11 = vadd.f32 0.0036580483, %v1900_v20 }
 0xbcd   :  { %v5051_v38 = vmul.f32 0.70710677, %v5041_v35  ;;  %v1950_v9 = vadd.f32 0.001143296, %v1949_v54  ;;  %v1914_v44 = vadd.f32 0.112945676, %v1913_v52  ;;  %v1862_v60 = vmul.f32 %v1861_v19, %v5015_v63 }
 0xbce   :  { %v5122_v27 = vpop.eup %3634 }
 0xbcf   :  { %v1951_v62 = vmul.f32 %v1950_v9, %v5043_v56  ;;  %v1976_v58 = vmul.f32 %v5051_v38, %v5051_v38  ;;  %v1915_v23 = vmul.f32 %v1914_v44, %v5017_v59  ;;  %v1800_v9 = vmul.f32 %v5083_v50, %v5054_v36 }
 0xbd0   :  { %vm1845_vm7 = vweird.f32 %v5122_v27 }
 0xbd1   :  { %v1952_v55 = vadd.f32 0.014752088, %v1951_v62  ;;  %v5063_v28 = vmin.f32 %v1976_v58, 16.0  ;;  %v1916_v51 = vadd.f32 0.4994258, %v1915_v23  ;;  %v1801_v21 = vsub.f32 1.0, %v1800_v9  ;;  %vm5220_vm4 = vmor %vm1844_vm15, %vm1845_vm7 }
 0xbd2   :  { %v1755_v30 = vpop.f32.mrf.mxu1  ;;  %v1939_v62 = vadd.f32 0.00028619796, %v1938_v41  ;;  %v1840_v9 = vmul.f32 %v5122_v27, %v5085_v15 }
 0xbd3   :  { %v1953_v25 = vmul.f32 %v1952_v55, %v5043_v56  ;;  %v5073_v61 = vadd.f32 %v3366_v6, %v1755_v30  ;;  %v1989_v42 = vmul.f32 3.8918573e-05, %v5063_v28  ;;  %v1978_v58 = vmul.f32 2.1237322e-06, %v5063_v28 }
 0xbd4   :  { %v1863_v55 = vadd.f32 0.05243302, %v1862_v60  ;;  %v1877_v6 = vmul.f32 %v1876_v31, %v5015_v63  ;;  %v1917_v44 = vmul.f32 %v1916_v51, %v5017_v59 }
 0xbd5   :  { %v1954_v16 = vadd.f32 0.112945676, %v1953_v25  ;;  %v1990_v1 = vadd.f32 0.001143296, %v1989_v42  ;;  %v5090_v0 = vmul.f32 0.70710677, %v5073_v61 }
 0xbd6   :  { %v1979_v43 = vadd.f32 0.00028619796, %v1978_v58  ;;  %v1810_v42 = vand.u32 2147483648, %v5054_v36  ;;  %v5125_v23 = vadd.f32 1.0, %v1877_v6  ;;  %v1864_v8 = vmul.f32 %v1863_v55, %v5015_v63 }
 0xbd7   :  { %v1955_v26 = vmul.f32 %v1954_v16, %v5043_v56  ;;  %v1991_v54 = vmul.f32 %v1990_v1, %v5063_v28  ;;  %v2016_v40 = vmul.f32 %v5090_v0, %v5090_v0  ;;  %v1826_v16 = vmul.f32 %v1825_v3, %v4997_v37 }
 0xbd8   :  { %v1902_v1 = vmul.f32 %v1901_v11, %v5017_v59  ;;  %v1980_v31 = vmul.f32 %v1979_v43, %v5063_v28  ;;  %3636 = vrcp.f32 %v5125_v23  ;;  %v1865_v55 = vadd.f32 0.18741608, %v1864_v8 }
 0xbd9   :  { %v1956_v24 = vadd.f32 0.4994258, %v1955_v26  ;;  %v1992_v52 = vadd.f32 0.014752088, %v1991_v54  ;;  %v5110_v18 = vmin.f32 %v2016_v40, 16.0  ;;  %v1802_v26 = vmul.f32 %v5083_v50, %v1801_v21 }
 0xbda   :  { %v1757_v5 = vpop.f32.mrf.mxu1  ;;  %v5131_v54 = vadd.f32 1.0, %v1917_v44  ;;  %v1981_v11 = vadd.f32 0.0036580483, %v1980_v31  ;;  %vm1884_vm10 = vweird.f32 %v5125_v23 }
 0xbdb   :  { %v5081_v48 = vadd.f32 %v3367_v46, %v1757_v5  ;;  %v1993_v13 = vmul.f32 %v1992_v52, %v5063_v28  ;;  %v1957_v7 = vmul.f32 %v1956_v24, %v5043_v56  ;;  %v5114_v46 = vadd.f32 1.1283791, %v1786_v57 }
 0xbdc   :  { %v1940_v5 = vmul.f32 %v1939_v62, %v5043_v56  ;;  %v2018_v19 = vmul.f32 2.1237322e-06, %v5110_v18  ;;  %v2029_v20 = vmul.f32 3.8918573e-05, %v5110_v18  ;;  %v1903_v62 = vadd.f32 0.05243302, %v1902_v1 }
 0xbdd   :  { %v5095_v30 = vmul.f32 0.70710677, %v5081_v48  ;;  %v1994_v25 = vadd.f32 0.112945676, %v1993_v13  ;;  %v5133_v57 = vadd.f32 1.0, %v1957_v7  ;;  %v5158_v1 = vor.u32 1.1754944e-38, %v1810_v42 }
 0xbde   :  { %v1941_v60 = vadd.f32 0.0036580483, %v1940_v5  ;;  %v2019_v51 = vadd.f32 0.00028619796, %v2018_v19  ;;  %v2030_v40 = vadd.f32 0.001143296, %v2029_v20  ;;  %v1904_v43 = vmul.f32 %v1903_v62, %v5017_v59 }
 0xbdf   :  { %v2056_v34 = vmul.f32 %v5095_v30, %v5095_v30  ;;  %v1995_v41 = vmul.f32 %v1994_v25, %v5063_v28  ;;  %3638 = vrcp.f32 %v5133_v57  ;;  %v5154_v25 = vadd.f32 %v5083_v50, %v1802_v26 }
 0xbe0   :  { %v1942_v6 = vmul.f32 %v1941_v60, %v5043_v56  ;;  %3640 = vrcp.f32 %v5131_v54  ;;  %v2020_v44 = vmul.f32 %v2019_v51, %v5110_v18  ;;  %v2031_v7 = vmul.f32 %v2030_v40, %v5110_v18  ;;  %v5164_v60 = vpop.eup %3636 }
 0xbe1   :  { %v5120_v45 = vmin.f32 %v2056_v34, 16.0  ;;  %v1996_v37 = vadd.f32 0.4994258, %v1995_v41  ;;  %v1850_v34 = vand.u32 2147483648, %v5085_v15  ;;  %v1841_v5 = vsub.f32 1.0, %v1840_v9 }
 0xbe2   :  { %v5160_v41 = vadd.f32 1.1283791, %v1826_v16  ;;  %v1943_v31 = vadd.f32 0.05243302, %v1942_v6  ;;  %v2032_v20 = vadd.f32 0.014752088, %v2031_v7  ;;  %v1866_v51 = vmul.f32 %v1865_v55, %v5015_v63 }
 0xbe3   :  { %v2058_v24 = vmul.f32 2.1237322e-06, %v5120_v45  ;;  %v2069_v52 = vmul.f32 3.8918573e-05, %v5120_v45  ;;  %v1997_v58 = vmul.f32 %v1996_v37, %v5063_v28  ;;  %v1982_v37 = vmul.f32 %v1981_v11, %v5063_v28 }
 0xbe4   :  { %v5179_v16 = vor.u32 1.1754944e-38, %v1850_v34  ;;  %v1905_v40 = vadd.f32 0.18741608, %v1904_v43  ;;  %v1880_v34 = vmul.f32 %v5164_v60, %v5125_v23  ;;  %v1944_v6 = vmul.f32 %v1943_v31, %v5043_v56 }
 0xbe5   :  { %v2059_v3 = vadd.f32 0.00028619796, %v2058_v24  ;;  %v2070_v13 = vadd.f32 0.001143296, %v2069_v52  ;;  %v5149_v21 = vadd.f32 1.0, %v1997_v58  ;;  %v5169_v9 = vpop.eup %3638  ;;  %v1842_v58 = vmul.f32 %v5122_v27, %v1841_v5 }
 0xbe6   :  { %v2021_v24 = vadd.f32 0.0036580483, %v2020_v44  ;;  %v1960_v11 = vmul.f32 %v5169_v9, %v5133_v57  ;;  %v1983_v44 = vadd.f32 0.05243302, %v1982_v37  ;;  %v5199_v43 = vadd.f32 1.1283791, %v1866_v51 }
 0xbe7   :  { %v2071_v19 = vmul.f32 %v2070_v13, %v5120_v45  ;;  %3642 = vrcp.f32 %v5149_v21  ;;  %v2060_v8 = vmul.f32 %v2059_v3, %v5120_v45  ;;  %v2033_v3 = vmul.f32 %v2032_v20, %v5110_v18  ;;  %v5188_v13 = vpop.eup %3640 }
 0xbe8   :  { %v2022_v20 = vmul.f32 %v2021_v24, %v5110_v18  ;;  %v1920_v31 = vmul.f32 %v5188_v13, %v5131_v54  ;;  %v1945_v26 = vadd.f32 0.18741608, %v1944_v6  ;;  %vm1885_vm12 = vweird.f32 %v5164_v60 }
 0xbe9   :  { %v2072_v52 = vadd.f32 0.014752088, %v2071_v19  ;;  %v2061_v63 = vadd.f32 0.0036580483, %v2060_v8  ;;  %v2034_v7 = vadd.f32 0.112945676, %v2033_v3  ;;  %v5204_v8 = vadd.f32 %v5122_v27, %v1842_v58  ;;  %vm5264_vm6 = vmor %vm1884_vm10, %vm1885_vm12 }
 0xbea   :  { %v1890_v3 = vand.u32 2147483648, %v5125_v23  ;;  %v1961_v58 = vsub.f32 1.0, %v1960_v11  ;;  %v1984_v19 = vmul.f32 %v1983_v44, %v5063_v28  ;;  %v1921_v6 = vsub.f32 1.0, %v1920_v31 }
 0xbeb   :  { %v2073_v55 = vmul.f32 %v2072_v52, %v5120_v45  ;;  %v1906_v52 = vmul.f32 %v1905_v40, %v5017_v59  ;;  %v2035_v51 = vmul.f32 %v2034_v7, %v5110_v18  ;;  %v2062_v2 = vmul.f32 %v2061_v63, %v5120_v45 }
 0xbec   :  { %v2023_v40 = vadd.f32 0.05243302, %v2022_v20  ;;  %v5229_v44 = vor.u32 1.1754944e-38, %v1890_v3  ;;  %v1946_v20 = vmul.f32 %v1945_v26, %v5043_v56  ;;  %vm1924_vm1 = vweird.f32 %v5131_v54 }
 0xbed   :  { %v5197_v5 = vpop.eup %3642  ;;  %v2074_v62 = vadd.f32 0.112945676, %v2073_v55  ;;  %v1881_v55 = vsub.f32 1.0, %v1880_v34  ;;  %v2036_v7 = vadd.f32 0.4994258, %v2035_v51  ;;  %v1930_v26 = vand.u32 2147483648, %v5131_v54 }
 0xbee   :  { %v2000_v37 = vmul.f32 %v5197_v5, %v5149_v21  ;;  %v1907_v34 = vadd.f32 1.1283791, %v1906_v52  ;;  %v2063_v33 = vadd.f32 0.05243302, %v2062_v2  ;;  %v1985_v51 = vadd.f32 0.18741608, %v1984_v19 }
 0xbef   :  { %v2075_v24 = vmul.f32 %v2074_v62, %v5120_v45  ;;  %v1847_v62 = vsel %vm5220_vm4, %v5122_v27, %v5204_v8  ;;  %v2037_v53 = vmul.f32 %v2036_v7, %v5110_v18  ;;  %v1882_v10 = vmul.f32 %v5164_v60, %v1881_v55 }
 0xbf0   :  { %v2001_v11 = vsub.f32 1.0, %v2000_v37  ;;  %v2024_v52 = vmul.f32 %v2023_v40, %v5110_v18  ;;  %v5243_v3 = vmul.f32 %v1907_v34, %v5007_v12  ;;  %v1922_v2 = vmul.f32 %v5188_v13, %v1921_v6 }
 0xbf1   :  { %v2076_v63 = vadd.f32 0.4994258, %v2075_v24  ;;  %v1962_v24 = vmul.f32 %v5169_v9, %v1961_v58  ;;  %v5238_v31 = vadd.f32 1.0, %v2037_v53  ;;  %v1928_v56 = vand.u32 2147483647, %v5131_v54 }
 0xbf2   :  { %v2002_v55 = vmul.f32 %v5197_v5, %v2001_v11  ;;  %v2064_v53 = vmul.f32 %v2063_v33, %v5120_v45  ;;  %vm1925_vm3 = vweird.f32 %v5188_v13  ;;  %v1986_v12 = vmul.f32 %v1985_v51, %v5063_v28 }
 0xbf3   :  { %v2077_v14 = vmul.f32 %v2076_v63, %v5120_v45  ;;  %3644 = vrcp.f32 %v5238_v31  ;;  %v1947_v19 = vadd.f32 1.1283791, %v1946_v20  ;;  %v1963_v58 = vadd.f32 %v5169_v9, %v1962_v24  ;;  %vm5274_vm11 = vmor %vm1924_vm1, %vm1925_vm3 }
 0xbf4   :  { %vm1965_vm5 = vweird.f32 %v5169_v9  ;;  %v2025_v40 = vadd.f32 0.18741608, %v2024_v52  ;;  %v1970_v28 = vand.u32 2147483648, %v5133_v57  ;;  %v2003_v7 = vadd.f32 %v5197_v5, %v2002_v55 }
 0xbf5   :  { %v5240_v37 = vadd.f32 1.0, %v2077_v14  ;;  %v5253_v14 = vadd.f32 %v5164_v60, %v1882_v10  ;;  %v1923_v10 = vadd.f32 %v5188_v13, %v1922_v2  ;;  %vm2005_vm9 = vweird.f32 %v5197_v5 }
 0xbf6   :  { %vm5278_vm14 = vcmp.eq.f32.partialorder %v1928_v56, 8.507059e+37  ;;  %vm1964_vm15 = vweird.f32 %v5133_v57  ;;  %v1968_v6 = vand.u32 2147483647, %v5133_v57  ;;  %v2010_v11 = vand.u32 2147483648, %v5149_v21 }
 0xbf7   :  { %3646 = vrcp.f32 %v5240_v37  ;;  %v2065_v20 = vadd.f32 0.18741608, %v2064_v53  ;;  %v1931_v51 = vor.u32 1.1754944e-38, %v1930_v26  ;;  %vm5285_vm7 = vmor %vm1964_vm15, %vm1965_vm5  ;;  %v1987_v54 = vadd.f32 1.1283791, %v1986_v12 }
 0xbf8   :  { %vm2004_vm10 = vweird.f32 %v5149_v21  ;;  %v2008_v52 = vand.u32 2147483647, %v5149_v21  ;;  %v1887_v55 = vsel %vm5264_vm6, %v5164_v60, %v5253_v14  ;;  %v1948_v57 = vmul.f32 %v1947_v19, %v5031_v29 }
 0xbf9   :  { %v3645_v2 = vpop.eup %3644  ;;  %v1967_v56 = vsel %vm5285_vm7, %v5169_v9, %v1963_v58  ;;  %vm5301_vm12 = vmor %vm2004_vm10, %vm2005_vm9  ;;  %v2026_v21 = vmul.f32 %v2025_v40, %v5110_v18  ;;  %v1927_v12 = vsel %vm5274_vm11, %v5188_v13, %v1923_v10  ;;  %v1971_v60 = vor.u32 1.1754944e-38, %v1970_v28 }
 0xbfa   :  { %v2007_v29 = vsel %vm5301_vm12, %v5197_v5, %v2003_v7  ;;  %v2040_v9 = vmul.f32 %v3645_v2, %v5238_v31  ;;  %v6051_v14 = vand.u32 2147483647, %v5125_v23  ;;  %vm1969_vm3 = vcmp.eq.f32.partialorder %v1968_v6, 8.507059e+37 }
 0xbfb   :  { %v2011_v18 = vor.u32 1.1754944e-38, %v2010_v11  ;;  %v2066_v58 = vmul.f32 %v2065_v20, %v5120_v45  ;;  %v6054_v13 = vand.u32 2147483647, %v5085_v15  ;;  %v1972_v5 = vsel %vm1969_vm3, %v1971_v60, %v1967_v56 }
 0xbfc   :  { %vm5315_vm1 = vcmp.eq.f32.partialorder %v6051_v14, 8.507059e+37  ;;  %v1988_v10 = vmul.f32 %v1987_v54, %v5051_v38  ;;  %vm2009_vm6 = vcmp.eq.f32.partialorder %v2008_v52, 8.507059e+37  ;;  %v2041_v23 = vsub.f32 1.0, %v2040_v9 }
 0xbfd   :  { %v3647_v53 = vpop.eup %3646  ;;  %vm5323_vm5 = vcmp.eq.f32.partialorder %v6054_v13, 8.507059e+37  ;;  %v2012_v28 = vsel %vm2009_vm6, %v2011_v18, %v2007_v29  ;;  %v2027_v7 = vadd.f32 1.1283791, %v2026_v21  ;;  %v2050_v63 = vand.u32 2147483648, %v5238_v31 }
 0xbfe   :  { %v2080_v40 = vmul.f32 %v3647_v53, %v5240_v37  ;;  %v2042_v11 = vmul.f32 %v3645_v2, %v2041_v23  ;;  %vm2045_vm9 = vweird.f32 %v3645_v2  ;;  %v2048_v45 = vand.u32 2147483647, %v5238_v31 }
 0xbff   :  { %v2090_v15 = vand.u32 2147483648, %v5240_v37  ;;  %v2067_v20 = vadd.f32 1.1283791, %v2066_v58  ;;  %vm2085_vm11 = vweird.f32 %v3647_v53  ;;  %v2088_v56 = vand.u32 2147483647, %v5240_v37 }
 0xc00   :  { %v2081_v6 = vsub.f32 1.0, %v2080_v40  ;;  %v1932_v38 = vsel %vm5278_vm14, %v1931_v51, %v1927_v12  ;;  %v1973_v54 = vmul.f32 %v1972_v5, %v1948_v57  ;;  %v2043_v52 = vadd.f32 %v3645_v2, %v2042_v11 }
 0xc01   :  { %vm2044_vm15 = vweird.f32 %v5238_v31  ;;  %v2013_v26 = vmul.f32 %v2012_v28, %v1988_v10  ;;  %v2051_v21 = vor.u32 1.1754944e-38, %v2050_v63  ;;  %vm2084_vm10 = vweird.f32 %v5240_v37 }
 0xc02   :  { %v2082_v24 = vmul.f32 %v3647_v53, %v2081_v6  ;;  %vm2046_vm7 = vmor %vm2044_vm15, %vm2045_vm9  ;;  %v2028_v29 = vmul.f32 %v2027_v7, %v5090_v0  ;;  %vm2049_vm12 = vcmp.eq.f32.partialorder %v2048_v45, 8.507059e+37  ;;  %v2091_v14 = vor.u32 1.1754944e-38, %v2090_v15 }
 0xc03   :  { %v2047_v9 = vsel %vm2046_vm7, %v3645_v2, %v2043_v52  ;;  %vm2086_vm3 = vmor %vm2084_vm10, %vm2085_vm11  ;;  %v2068_v34 = vmul.f32 %v2067_v20, %v5095_v30  ;;  %vm2089_vm14 = vcmp.eq.f32.partialorder %v2088_v56, 8.507059e+37  ;;  %v1868_v31 = vmul.f32 %v5199_v43, %v5001_v47 }
 0xc04   :  { %v2083_v60 = vadd.f32 %v3647_v53, %v2082_v24  ;;  %v2052_v18 = vsel %vm2049_vm12, %v2051_v21, %v2047_v9  ;;  %v1892_v57 = vsel %vm5315_vm1, %v5229_v44, %v1887_v55  ;;  %v1852_v0 = vsel %vm5323_vm5, %v5179_v16, %v1847_v62  ;;  %v6060_v21 = vld [vmem:[#allocation22_spill] sm:$0xff] }
 0xc05   :  { %v2053_v12 = vmul.f32 %v2052_v18, %v2028_v29  ;;  %v1933_v30 = vmul.f32 %v1932_v38, %v5243_v3  ;;  %v3393_v2 = vclamps-f32 %v2013_v26, 1.0  ;;  %v6057_v47 = vand.u32 2147483647, %v5054_v36  ;;  %v3399_v9 = vld [vmem:[%s5975_s4 + $0x28] sm:$0xff] }
 0xc06   :  { %v2087_v51 = vsel %vm2086_vm3, %v3647_v53, %v2083_v60  ;;  %v1828_v43 = vmul.f32 %v5160_v41, %v4984_v4  ;;  %v6058_v27 = vsel %vm5175_vm2, %v5083_v50, %v5154_v25  ;;  %v1893_v59 = vmul.f32 %v1892_v57, %v1868_v31 }
 0xc07   :  { %v2092_v37 = vsel %vm2089_vm14, %v2091_v14, %v2087_v51  ;;  %vm1809_vm6 = vcmp.eq.f32.partialorder %v6057_v47, 8.507059e+37  ;;  %v3394_v44 = vclamps-f32 %v2053_v12, 1.0  ;;  %v3392_v16 = vclamps-f32 %v1973_v54, 1.0  ;;  %v6062_v12 = vld [vmem:[#allocation19_spill] sm:$0xff] }
 0xc08   :  { %v2093_v53 = vmul.f32 %v2092_v37, %v2068_v34  ;;  %v1812_v8 = vsel %vm1809_vm6, %v5158_v1, %v6058_v27  ;;  %v1788_v3 = vmul.f32 %v5114_v46, %v4972_v32  ;;  %v1853_v55 = vmul.f32 %v1852_v0, %v1828_v43  ;;  %v6061_v34 = vld [vmem:[#allocation20_spill] sm:$0xff] }
 0xc09   :  { %v1766_v36 = vmul.f32 0.5, %v5073_v61  ;;  %v2102_v19 = vadd.f32 1.0, %v3394_v44  ;;  %v3391_v58 = vclamps-f32 %v1933_v30, 1.0  ;;  %v2101_v4 = vadd.f32 1.0, %v3393_v2 }
 0xc0a   :  { %v3395_v62 = vclamps-f32 %v2093_v53, 1.0  ;;  %v1767_v41 = vmul.f32 0.5, %v5081_v48  ;;  %v1813_v40 = vmul.f32 %v1812_v8, %v1788_v3  ;;  %v1765_v50 = vmul.f32 0.5, %v5041_v35  ;;  %v3545_v3 = vld [vmem:[%s5978_s7 + $0x20] sm:$0xff] }
 0xc0b   :  { %v3390_v25 = vclamps-f32 %v1893_v59, 1.0  ;;  %v2100_v1 = vadd.f32 1.0, %v3392_v16  ;;  %v2110_v13 = vmul.f32 %v2102_v19, %v1766_v36  ;;  %v1764_v5 = vmul.f32 0.5, %v5025_v17  ;;  %v6059_v17 = vld [vmem:[#allocation21_spill] sm:$0xff] }
 0xc0c   :  { %v2103_v42 = vadd.f32 1.0, %v3395_v62  ;;  %v3389_v10 = vclamps-f32 %v1853_v55, 1.0  ;;  %v2099_v32 = vadd.f32 1.0, %v3391_v58  ;;  %v2109_v46 = vmul.f32 %v2101_v4, %v1765_v50  ;;  %v3546_v62 = vld [vmem:[%s5978_s7 + $0x28] sm:$0xff] }
 0xc0d   :  { %v3388_v61 = vclamps-f32 %v1813_v40, 1.0  ;;  %v2098_v28 = vadd.f32 1.0, %v3390_v25  ;;  %v1763_v7 = vmul.f32 0.5, %v5003_v49  ;;  %v2108_v63 = vmul.f32 %v2100_v1, %v1764_v5  ;;  %v3544_v49 = vld [vmem:[%s5974_s3 + $0x10] sm:$0xff]  ;;  %2230 = vmatpush.bf16.msrb.mxu1 %v3546_v62 }
 0xc0e   :  { %v2111_v33 = vmul.f32 %v2103_v42, %v1767_v41  ;;  %v2097_v48 = vadd.f32 1.0, %v3389_v10  ;;  %v1762_v6 = vmul.f32 0.5, %v4992_v22  ;;  %v1761_v15 = vmul.f32 0.5, %v4979_v39  ;;  %v3398_v39 = vld [vmem:[%s5975_s4 + $0x20] sm:$0xff] }
 0xc0f   :  { %v2107_v35 = vmul.f32 %v2099_v32, %v1763_v7  ;;  %v2117_v11 = vpack.c.bf16 %v2109_v46, %v2108_v63  ;;  %v2096_v45 = vadd.f32 1.0, %v3388_v61  ;;  %v1760_v24 = vmul.f32 0.5, %v6059_v17  ;;  %v2147_v46 = vld [vmem:[#allocation7 + $0x20] sm:$0xff]  ;;  %v2148_v61 = vld [vmem:[#allocation7 + $0x28] sm:$0xff] }
 0xc10   :  { %v2118_v23 = vpack.c.bf16 %v2111_v33, %v2110_v13  ;;  %v2106_v20 = vmul.f32 %v2098_v28, %v1762_v6  ;;  %v2105_v56 = vmul.f32 %v2097_v48, %v1761_v15  ;;  %v2150_v48 = vld [vmem:[#allocation8 + $0x20] sm:$0xff]  ;;  %v2151_v6 = vld [vmem:[#allocation8 + $0x28] sm:$0xff] }
 0xc11   :  { %v2104_v54 = vmul.f32 %v2096_v45, %v1760_v24  ;;  %2231 = vmatpush.bf16.msrb.mxu1 %v3545_v3 }
 0xc12   :  { %2134 = vmatpush.bf16.msra.mxu3 %v2118_v23  ;;  %v2116_v38 = vpack.c.bf16 %v2107_v35, %v2106_v20  ;;  %v3409_v20 = vld [vmem:[%s5979_s8 + $0x20] sm:$0xff] }
 0xc13   :  { %v2115_v52 = vpack.c.bf16 %v2105_v56, %v2104_v54  ;;  %v3410_v54 = vld [vmem:[%s5979_s8 + $0x28] sm:$0xff] }
 0xc16   :  { %2135 = vmatpush.bf16.msra.mxu3 %v2117_v11 }
 0xc1a   :  { %2136 = vmatpush.bf16.msra.mxu3 %v2116_v38 }
 0xc1e   :  { %2137 = vmatpush.bf16.msra.mxu3 %v2115_v52 }
 0xc21   :  { %3404 = vmatmul.msk.bf16.vlgmr.msra.gmra.mxu3 %vm652_vm13, %v3544_v49 }
 0xca4   :  { %v2139_v22 = vpop.f32.mrf.mxu3 }
 0xca5   :  { %v2140_v26 = vadd.f32 %v3398_v39, %v2139_v22 }
 0xca7   :  { %v5380_v60 = vadd.f32 %v2140_v26, %v6060_v21 }
 0xca9   :  { %v2152_v29 = vsel %vm152_vm0, %v5380_v60, 0.0 }
 0xcaa   :  { %2153 = vadd.xlane.f32.xlu2 %v2152_v29 }
 0xcac   :  { %v2141_v14 = vpop.f32.mrf.mxu3 }
 0xcad   :  { %v2142_v18 = vadd.f32 %v3399_v9, %v2141_v14 }
 0xcaf   :  { %v5388_v51 = vadd.f32 %v2142_v18, %v6061_v34 }
 0xcb1   :  { %v2155_v31 = vsel %vm152_vm0, %v5388_v51, 0.0 }
 0xcb2   :  { %2156 = vadd.xlane.f32.xlu0 %v2155_v31 }
 0xd1d   :  { %v2154_v57 = vpop.xlane.xlu2 %2153 }
 0xd1e   :  { %v2158_v37 = vmul.f32 %v2154_v57, %v6062_v12 }
 0xd20   :  { %v2160_v0 = vsub.f32 %v5380_v60, %v2158_v37 }
 0xd22   :  { %v2162_v30 = vmul.f32 %v2160_v0, %v2160_v0 }
 0xd24   :  { %v2164_v2 = vsel %vm152_vm0, %v2162_v30, 0.0 }
 0xd25   :  { %v2157_v53 = vpop.xlane.xlu0 %2156  ;;  %2165 = vadd.xlane.f32.xlu1 %v2164_v2 }
 0xd26   :  { %v2159_v47 = vmul.f32 %v2157_v53, %v6062_v12 }
 0xd28   :  { %v2161_v43 = vsub.f32 %v5388_v51, %v2159_v47 }
 0xd2a   :  { %v2163_v44 = vmul.f32 %v2161_v43, %v2161_v43 }
 0xd2c   :  { %v2167_v27 = vsel %vm152_vm0, %v2163_v44, 0.0 }
 0xd2d   :  { %2168 = vadd.xlane.f32.xlu2 %v2167_v27 }
 0xd98   :  { %v2166_v8 = vpop.xlane.xlu1 %2165 }
 0xd99   :  { %v2170_v59 = vmul.f32 %v2166_v8, %v6062_v12 }
 0xd9b   :  { %v2172_v16 = vadd.f32 1e-05, %v2170_v59 }
 0xd9d   :  { %3648 = vrsqrt.f32 %v2172_v16  ;;  %vm2180_vm4 = vweird.f32 %v2172_v16 }
 0xda0   :  { %v2169_v55 = vpop.xlane.xlu2 %2168 }
 0xda1   :  { %v2171_v36 = vmul.f32 %v2169_v55, %v6062_v12 }
 0xda3   :  { %v3649_v19 = vpop.eup %3648  ;;  %v2173_v58 = vadd.f32 1e-05, %v2171_v36 }
 0xda4   :  { %v2175_v4 = vmul.f32 %v3649_v19, %v2172_v16  ;;  %vm2181_vm2 = vweird.f32 %v3649_v19 }
 0xda5   :  { %3650 = vrsqrt.f32 %v2173_v58  ;;  %vm2182_vm1 = vmor %vm2180_vm4, %vm2181_vm2  ;;  %vm2190_vm9 = vweird.f32 %v2173_v58 }
 0xda6   :  { %v2176_v41 = vmul.f32 %v3649_v19, %v2175_v4 }
 0xda8   :  { %v2177_v42 = vmul.f32 0.5, %v2176_v41 }
 0xdaa   :  { %v2178_v40 = vsub.f32 1.5, %v2177_v42 }
 0xdab   :  { %v3651_v50 = vpop.eup %3650 }
 0xdac   :  { %v2179_v25 = vmul.f32 %v3649_v19, %v2178_v40  ;;  %v2185_v1 = vmul.f32 %v3651_v50, %v2173_v58  ;;  %vm2191_vm5 = vweird.f32 %v3651_v50 }
 0xdad   :  { %vm2192_vm11 = vmor %vm2190_vm9, %vm2191_vm5 }
 0xdae   :  { %v2186_v13 = vmul.f32 %v3651_v50, %v2185_v1  ;;  %v2183_v33 = vsel %vm2182_vm1, %v3649_v19, %v2179_v25 }
 0xdaf   :  { %v2194_v32 = vmul.f32 %v2183_v33, %v2160_v0 }
 0xdb0   :  { %v2187_v5 = vmul.f32 0.5, %v2186_v13  ;;  %v3547_v13 = vld [vmem:[%s5980_s9 + $0x20] sm:$0xff] }
 0xdb1   :  { %v2196_v7 = vmul.f32 %v2194_v32, %v2147_v46 }
 0xdb2   :  { %v2188_v10 = vsub.f32 1.5, %v2187_v5 }
 0xdb3   :  { %v2198_v11 = vadd.f32 %v2196_v7, %v2150_v48 }
 0xdb4   :  { %v2189_v23 = vmul.f32 %v3651_v50, %v2188_v10 }
 0xdb6   :  { %v2193_v28 = vsel %vm2192_vm11, %v3651_v50, %v2189_v23  ;;  %v3548_v50 = vld [vmem:[%s5980_s9 + $0x28] sm:$0xff] }
 0xdb7   :  { %v2195_v63 = vmul.f32 %v2193_v28, %v2161_v43  ;;  %2356 = vmatpush.bf16.msrb.mxu3 %v3548_v50 }
 0xdb9   :  { %v2197_v35 = vmul.f32 %v2195_v63, %v2148_v61 }
 0xdbb   :  { %v2199_v45 = vadd.f32 %v2197_v35, %v2151_v6  ;;  %2357 = vmatpush.bf16.msrb.mxu3 %v3547_v13 }
 0xdbd   :  { %v2200_v15 = vpack.c.bf16 %v2199_v45, %v2198_v11 }
 0xdbf   :  { %3419 = vmatmul.msk.bf16.vlgmr.msrb.gmra.mxu1 %vm152_vm0, %v2200_v15 }
 0xe3c   :  { %v2233_v17 = vpop.f32.mrf.mxu1 }
 0xe3d   :  { %v5410_v24 = vadd.f32 %v3409_v20, %v2233_v17 }
 0xe3f   :  { %v5413_v56 = vmul.f32 0.70710677, %v5410_v24 }
 0xe41   :  { %v2242_v38 = vmul.f32 %v5413_v56, %v5413_v56 }
 0xe43   :  { %v2243_v52 = vmin.f32 %v2242_v38, 16.0 }
 0xe44   :  { %v2235_v49 = vpop.f32.mrf.mxu1 }
 0xe45   :  { %v2244_v39 = vmul.f32 2.1237322e-06, %v2243_v52  ;;  %v2255_v22 = vmul.f32 3.8918573e-05, %v2243_v52  ;;  %v5420_v26 = vadd.f32 %v3410_v54, %v2235_v49 }
 0xe47   :  { %v2245_v21 = vadd.f32 0.00028619796, %v2244_v39  ;;  %v2256_v29 = vadd.f32 0.001143296, %v2255_v22  ;;  %v5423_v9 = vmul.f32 0.70710677, %v5420_v26 }
 0xe49   :  { %v2257_v14 = vmul.f32 %v2256_v29, %v2243_v52  ;;  %v2282_v18 = vmul.f32 %v5423_v9, %v5423_v9  ;;  %v2246_v34 = vmul.f32 %v2245_v21, %v2243_v52 }
 0xe4b   :  { %v2258_v31 = vadd.f32 0.014752088, %v2257_v14  ;;  %v2283_v57 = vmin.f32 %v2282_v18, 16.0  ;;  %v2247_v2 = vadd.f32 0.0036580483, %v2246_v34 }
 0xe4d   :  { %v2259_v37 = vmul.f32 %v2258_v31, %v2243_v52  ;;  %v2284_v0 = vmul.f32 2.1237322e-06, %v2283_v57  ;;  %v2295_v30 = vmul.f32 3.8918573e-05, %v2283_v57  ;;  %v2248_v59 = vmul.f32 %v2247_v2, %v2243_v52 }
 0xe4f   :  { %v2260_v53 = vadd.f32 0.112945676, %v2259_v37  ;;  %v2285_v47 = vadd.f32 0.00028619796, %v2284_v0  ;;  %v2296_v43 = vadd.f32 0.001143296, %v2295_v30 }
 0xe50   :  { %v2249_v19 = vadd.f32 0.05243302, %v2248_v59  ;;  %v2333_v59 = vld [vmem:[#allocation5 + $0x20] sm:$0xff] }
 0xe51   :  { %v2261_v44 = vmul.f32 %v2260_v53, %v2243_v52  ;;  %v2286_v27 = vmul.f32 %v2285_v47, %v2283_v57  ;;  %v2297_v8 = vmul.f32 %v2296_v43, %v2283_v57  ;;  %v2238_v53 = vmul.f32 0.5, %v5410_v24 }
 0xe52   :  { %v2250_v40 = vmul.f32 %v2249_v19, %v2243_v52  ;;  %v2239_v47 = vmul.f32 0.5, %v5420_v26 }
 0xe53   :  { %v2262_v16 = vadd.f32 0.4994258, %v2261_v44  ;;  %v2287_v62 = vadd.f32 0.0036580483, %v2286_v27  ;;  %v2298_v3 = vadd.f32 0.014752088, %v2297_v8 }
 0xe54   :  { %v2251_v10 = vadd.f32 0.18741608, %v2250_v40 }
 0xe55   :  { %v2263_v55 = vmul.f32 %v2262_v16, %v2243_v52  ;;  %v2299_v36 = vmul.f32 %v2298_v3, %v2283_v57  ;;  %v2288_v4 = vmul.f32 %v2287_v62, %v2283_v57 }
 0xe56   :  { %v2252_v28 = vmul.f32 %v2251_v10, %v2243_v52 }
 0xe57   :  { %v2264_v58 = vadd.f32 1.0, %v2263_v55  ;;  %v2300_v41 = vadd.f32 0.112945676, %v2299_v36  ;;  %v2289_v25 = vadd.f32 0.05243302, %v2288_v4  ;;  %v2334_v55 = vld [vmem:[#allocation5 + $0x28] sm:$0xff] }
 0xe58   :  { %v2253_v11 = vadd.f32 1.1283791, %v2252_v28 }
 0xe59   :  { %3652 = vrcp.f32 %v2264_v58  ;;  %v2301_v42 = vmul.f32 %v2300_v41, %v2283_v57  ;;  %v2290_v46 = vmul.f32 %v2289_v25, %v2283_v57  ;;  %v2276_v63 = vand.u32 2147483648, %v2264_v58 }
 0xe5a   :  { %v2274_v6 = vand.u32 2147483647, %v2264_v58  ;;  %vm2270_vm7 = vweird.f32 %v2264_v58  ;;  %v2254_v49 = vmul.f32 %v2253_v11, %v5413_v56 }
 0xe5b   :  { %v2302_v1 = vadd.f32 0.4994258, %v2301_v42  ;;  %v2291_v48 = vadd.f32 0.18741608, %v2290_v46  ;;  %v2277_v20 = vor.u32 1.1754944e-38, %v2276_v63 }
 0xe5c   :  { %vm2275_vm12 = vcmp.eq.f32.partialorder %v2274_v6, 8.507059e+37 }
 0xe5d   :  { %v2303_v33 = vmul.f32 %v2302_v1, %v2283_v57  ;;  %v2292_v17 = vmul.f32 %v2291_v48, %v2283_v57 }
 0xe5f   :  { %v3653_v5 = vpop.eup %3652  ;;  %v2304_v23 = vadd.f32 1.0, %v2303_v33  ;;  %v2293_v52 = vadd.f32 1.1283791, %v2292_v17 }
 0xe60   :  { %v2266_v32 = vmul.f32 %v3653_v5, %v2264_v58  ;;  %vm2271_vm15 = vweird.f32 %v3653_v5 }
 0xe61   :  { %3654 = vrcp.f32 %v2304_v23  ;;  %vm2272_vm10 = vmor %vm2270_vm7, %vm2271_vm15  ;;  %v2316_v22 = vand.u32 2147483648, %v2304_v23  ;;  %v2314_v14 = vand.u32 2147483647, %v2304_v23  ;;  %vm2310_vm14 = vweird.f32 %v2304_v23 }
 0xe62   :  { %v2267_v61 = vsub.f32 1.0, %v2266_v32  ;;  %v2294_v37 = vmul.f32 %v2293_v52, %v5423_v9 }
 0xe63   :  { %v2317_v34 = vor.u32 1.1754944e-38, %v2316_v22  ;;  %vm2315_vm2 = vcmp.eq.f32.partialorder %v2314_v14, 8.507059e+37 }
 0xe64   :  { %v2268_v7 = vmul.f32 %v3653_v5, %v2267_v61 }
 0xe66   :  { %v2269_v35 = vadd.f32 %v3653_v5, %v2268_v7 }
 0xe67   :  { %v3655_v45 = vpop.eup %3654 }
 0xe68   :  { %v2273_v15 = vsel %vm2272_vm10, %v3653_v5, %v2269_v35  ;;  %v2306_v38 = vmul.f32 %v3655_v45, %v2304_v23  ;;  %vm2311_vm3 = vweird.f32 %v3655_v45 }
 0xe69   :  { %v2278_v54 = vsel %vm2275_vm12, %v2277_v20, %v2273_v15  ;;  %vm2312_vm6 = vmor %vm2310_vm14, %vm2311_vm3 }
 0xe6a   :  { %v2307_v39 = vsub.f32 1.0, %v2306_v38  ;;  %v2279_v21 = vmul.f32 %v2278_v54, %v2254_v49  ;;  %v3435_v54 = vld [vmem:[%s5976_s5 + $0x30] sm:$0xff]  ;;  %v3436_v49 = vld [vmem:[%s5976_s5 + $0x38] sm:$0xff] }
 0xe6c   :  { %v2308_v29 = vmul.f32 %v3655_v45, %v2307_v39  ;;  %v3420_v31 = vclamps-f32 %v2279_v21, 1.0  ;;  %v3437_v21 = vld [vmem:[%s5977_s6 + $0x30] sm:$0xff] }
 0xe6e   :  { %v2309_v18 = vadd.f32 %v3655_v45, %v2308_v29  ;;  %v2322_v2 = vadd.f32 1.0, %v3420_v31  ;;  %v3438_v29 = vld [vmem:[%s5977_s6 + $0x38] sm:$0xff] }
 0xe70   :  { %v2313_v57 = vsel %vm2312_vm6, %v3655_v45, %v2309_v18  ;;  %v2324_v44 = vmul.f32 %v2322_v2, %v2238_v53  ;;  %v3447_v2 = vld [vmem:[%s5973_s2 + $0xc0] sm:$0xff] }
 0xe71   :  { %v2318_v0 = vsel %vm2315_vm2, %v2317_v34, %v2313_v57  ;;  %v3550_v57 = vld [vmem:[%s5972_s1 + $0x68] sm:$0xff] }
 0xe72   :  { %v2319_v30 = vmul.f32 %v2318_v0, %v2294_v37  ;;  %v3549_v37 = vld [vmem:[%s5972_s1 + $0x60] sm:$0xff]  ;;  %v3551_v0 = vld [vmem:[%s5972_s1 + $0x70] sm:$0xff] }
 0xe74   :  { %v3421_v56 = vclamps-f32 %v2319_v30, 1.0  ;;  %v3552_v30 = vld [vmem:[%s5972_s1 + $0x78] sm:$0xff] }
 0xe76   :  { %v2323_v43 = vadd.f32 1.0, %v3421_v56 }
 0xe78   :  { %v2325_v27 = vmul.f32 %v2323_v43, %v2239_v47  ;;  %v3448_v43 = vld [vmem:[%s5973_s2 + $0xc8] sm:$0xff] }
 0xe7a   :  { %v2326_v8 = vpack.c.bf16 %v2325_v27, %v2324_v44 }
 0xe7c   :  { %3434 = vmatmul.msk.bf16.vlgmr.msrb.gmra.mxu3 %vm152_vm0, %v2326_v8 }
 0xeff   :  { %v2359_v16 = vpop.f32.mrf.mxu3 }
 0xf00   :  { %v2360_v62 = vadd.f32 %v2359_v16, %v2333_v59 }
 0xf02   :  { %v5439_v9 = vadd.f32 %v2360_v62, %v5380_v60 }
 0xf04   :  { %6063 = vst [vmem:[#allocation21_spill] sm:$0xff] %v5439_v9  ;;  %v2372_v3 = vsel %vm152_vm0, %v5439_v9, 0.0 }
 0xf05   :  { %2373 = vadd.xlane.f32.xlu0 %v2372_v3 }
 0xf07   :  { %v2361_v24 = vpop.f32.mrf.mxu3 }
 0xf08   :  { %v2362_v36 = vadd.f32 %v2361_v24, %v2334_v55  ;;  %v3449_v55 = vld [vmem:[%s5973_s2 + $0xd0] sm:$0xff] }
 0xf0a   :  { %v5444_v26 = vadd.f32 %v2362_v36, %v5388_v51 }
 0xf0c   :  { %6064 = vst [vmem:[#allocation22_spill] sm:$0xff] %v5444_v26  ;;  %v2375_v19 = vsel %vm152_vm0, %v5444_v26, 0.0 }
 0xf0d   :  { %2376 = vadd.xlane.f32.xlu1 %v2375_v19 }
 0xf78   :  { %v2374_v58 = vpop.xlane.xlu0 %2373 }
 0xf79   :  { %v2378_v4 = vmul.f32 %v2374_v58, %v6062_v12  ;;  %v3450_v58 = vld [vmem:[%s5973_s2 + $0xd8] sm:$0xff] }
 0xf7b   :  { %v2380_v60 = vsub.f32 %v5439_v9, %v2378_v4 }
 0xf7d   :  { %v2382_v41 = vmul.f32 %v2380_v60, %v2380_v60 }
 0xf7f   :  { %v2384_v42 = vsel %vm152_vm0, %v2382_v41, 0.0 }
 0xf80   :  { %v2377_v40 = vpop.xlane.xlu1 %2376  ;;  %2385 = vadd.xlane.f32.xlu2 %v2384_v42 }
 0xf81   :  { %v2379_v50 = vmul.f32 %v2377_v40, %v6062_v12 }
 0xf83   :  { %v2381_v25 = vsub.f32 %v5444_v26, %v2379_v50 }
 0xf85   :  { %v2383_v51 = vmul.f32 %v2381_v25, %v2381_v25 }
 0xf87   :  { %v2387_v1 = vsel %vm152_vm0, %v2383_v51, 0.0 }
 0xf88   :  { %2388 = vadd.xlane.f32.xlu0 %v2387_v1 }
 0xff3   :  { %v2386_v13 = vpop.xlane.xlu2 %2385 }
 0xff4   :  { %v2390_v33 = vmul.f32 %v2386_v13, %v6062_v12 }
 0xff6   :  { %v2392_v5 = vadd.f32 1e-05, %v2390_v33 }
 0xff8   :  { %3656 = vrsqrt.f32 %v2392_v5  ;;  %vm2400_vm1 = vweird.f32 %v2392_v5 }
 0xffb   :  { %v2389_v10 = vpop.xlane.xlu0 %2388 }
 0xffc   :  { %v2391_v32 = vmul.f32 %v2389_v10, %v6062_v12 }
 0xffe   :  { %v3657_v46 = vpop.eup %3656  ;;  %v2393_v23 = vadd.f32 1e-05, %v2391_v32 }
 0xfff   :  { %v2395_v61 = vmul.f32 %v3657_v46, %v2392_v5  ;;  %vm2401_vm4 = vweird.f32 %v3657_v46 }
0x1000   :  { %3658 = vrsqrt.f32 %v2393_v23  ;;  %vm2402_vm5 = vmor %vm2400_vm1, %vm2401_vm4  ;;  %vm2410_vm11 = vweird.f32 %v2393_v23 }
0x1001   :  { %v2396_v28 = vmul.f32 %v3657_v46, %v2395_v61 }
0x1003   :  { %v2397_v7 = vmul.f32 0.5, %v2396_v28  ;;  %v3451_v28 = vld [vmem:[%s5973_s2 + $0xe0] sm:$0xff] }
0x1005   :  { %v2398_v63 = vsub.f32 1.5, %v2397_v7 }
0x1006   :  { %v3659_v48 = vpop.eup %3658 }
0x1007   :  { %v2399_v6 = vmul.f32 %v3657_v46, %v2398_v63  ;;  %v2405_v35 = vmul.f32 %v3659_v48, %v2393_v23  ;;  %vm2411_vm9 = vweird.f32 %v3659_v48 }
0x1008   :  { %vm2412_vm15 = vmor %vm2410_vm11, %vm2411_vm9 }
0x1009   :  { %v2406_v11 = vmul.f32 %v3659_v48, %v2405_v35  ;;  %v2403_v15 = vsel %vm2402_vm5, %v3657_v46, %v2399_v6 }
0x100a   :  { %v2414_v17 = vmul.f32 %v2403_v15, %v2380_v60 }
0x100b   :  { %v2407_v45 = vmul.f32 0.5, %v2406_v11 }
0x100c   :  { %v2416_v22 = vmul.f32 %v3435_v54, %v2414_v17 }
0x100d   :  { %v2408_v20 = vsub.f32 1.5, %v2407_v45 }
0x100e   :  { %v2418_v18 = vadd.f32 %v3437_v21, %v2416_v22 }
0x100f   :  { %v2409_v38 = vmul.f32 %v3659_v48, %v2408_v20 }
0x1011   :  { %v2413_v39 = vsel %vm2412_vm15, %v3659_v48, %v2409_v38 }
0x1012   :  { %v2415_v52 = vmul.f32 %v2413_v39, %v2381_v25 }
0x1014   :  { %v2417_v14 = vmul.f32 %v3436_v49, %v2415_v52  ;;  %v3452_v52 = vld [vmem:[%s5973_s2 + $0xe8] sm:$0xff] }
0x1016   :  { %v2419_v34 = vadd.f32 %v3438_v29, %v2417_v14 }
0x1018   :  { %v2429_v31 = vpack.c.bf16 %v2419_v34, %v2418_v18 }
0x101a   :  { %2478 = vmatpush.bf16.msrb.mxu0 %v2429_v31 }
0x101d   :  { %3471 = vmatmul.msk.bf16.vlgmr.msrb.gmra.mxu0 %vm245_vm8, %v3549_v37 }
0x102d   :  { %3472 = vmatmul.msk.bf16.gmra.mxu0 %vm245_vm8, %v3550_v57 }
0x103d   :  { %3473 = vmatmul.msk.bf16.gmra.mxu0 %vm245_vm8, %v3551_v0 }
0x104d   :  { %3474 = vmatmul.msk.bf16.gmra.mxu0 %vm245_vm8, %v3552_v30 }
0x109a   :  { %v2480_v56 = vpop.f32.mrf.mxu0 }
0x109b   :  { %v5487_v53 = vadd.f32 %v3447_v2, %v2480_v56 }
0x109d   :  { %6065 = vst [vmem:[#allocation20_spill] sm:$0xff] %v5487_v53  ;;  %v5490_v47 = vmul.f32 0.70710677, %v5487_v53 }
0x109f   :  { %v2516_v27 = vmul.f32 %v5490_v47, %v5490_v47 }
0x10a1   :  { %v5499_v59 = vmin.f32 %v2516_v27, 16.0 }
0x10a2   :  { %v2482_v44 = vpop.f32.mrf.mxu0 }
0x10a3   :  { %v5497_v8 = vadd.f32 %v3448_v43, %v2482_v44  ;;  %v2529_v3 = vmul.f32 3.8918573e-05, %v5499_v59  ;;  %v2518_v5 = vmul.f32 2.1237322e-06, %v5499_v59 }
0x10a5   :  { %v5502_v16 = vmul.f32 0.70710677, %v5497_v8  ;;  %v2530_v36 = vadd.f32 0.001143296, %v2529_v3  ;;  %v2519_v7 = vadd.f32 0.00028619796, %v2518_v5 }
0x10a7   :  { %v2556_v24 = vmul.f32 %v5502_v16, %v5502_v16  ;;  %v2531_v41 = vmul.f32 %v2530_v36, %v5499_v59  ;;  %v2520_v45 = vmul.f32 %v2519_v7, %v5499_v59 }
0x10a9   :  { %v5515_v4 = vmin.f32 %v2556_v24, 16.0  ;;  %v2532_v51 = vadd.f32 0.014752088, %v2531_v41  ;;  %v2521_v22 = vadd.f32 0.0036580483, %v2520_v45 }
0x10aa   :  { %v2485_v62 = vpop.f32.mrf.mxu0 }
0x10ab   :  { %v5510_v19 = vadd.f32 %v3449_v55, %v2485_v62  ;;  %v2569_v50 = vmul.f32 3.8918573e-05, %v5515_v4  ;;  %v2533_v32 = vmul.f32 %v2532_v51, %v5499_v59  ;;  %v2558_v15 = vmul.f32 2.1237322e-06, %v5515_v4 }
0x10ac   :  { %v2522_v0 = vmul.f32 %v2521_v22, %v5499_v59 }
0x10ad   :  { %v5519_v42 = vmul.f32 0.70710677, %v5510_v19  ;;  %v2570_v13 = vadd.f32 0.001143296, %v2569_v50  ;;  %v2534_v63 = vadd.f32 0.112945676, %v2533_v32 }
0x10ae   :  { %v2559_v21 = vadd.f32 0.00028619796, %v2558_v15  ;;  %v2523_v24 = vadd.f32 0.05243302, %v2522_v0 }
0x10af   :  { %v2596_v1 = vmul.f32 %v5519_v42, %v5519_v42  ;;  %v2571_v61 = vmul.f32 %v2570_v13, %v5515_v4  ;;  %v2535_v17 = vmul.f32 %v2534_v63, %v5499_v59 }
0x10b0   :  { %v2560_v30 = vmul.f32 %v2559_v21, %v5515_v4  ;;  %v2524_v5 = vmul.f32 %v2523_v24, %v5499_v59 }
0x10b1   :  { %v5533_v46 = vmin.f32 %v2596_v1, 16.0  ;;  %v2572_v11 = vadd.f32 0.014752088, %v2571_v61  ;;  %v2536_v14 = vadd.f32 0.4994258, %v2535_v17 }
0x10b2   :  { %v2487_v60 = vpop.f32.mrf.mxu0  ;;  %v2561_v36 = vadd.f32 0.0036580483, %v2560_v30 }
0x10b3   :  { %v5521_v40 = vadd.f32 %v3450_v58, %v2487_v60  ;;  %v2609_v48 = vmul.f32 3.8918573e-05, %v5533_v46  ;;  %v2573_v39 = vmul.f32 %v2572_v11, %v5515_v4  ;;  %v2537_v2 = vmul.f32 %v2536_v14, %v5499_v59 }
0x10b4   :  { %v2598_v56 = vmul.f32 2.1237322e-06, %v5533_v46 }
0x10b5   :  { %v5525_v25 = vmul.f32 0.70710677, %v5521_v40  ;;  %v2610_v38 = vadd.f32 0.001143296, %v2609_v48  ;;  %v2574_v37 = vadd.f32 0.112945676, %v2573_v39 }
0x10b6   :  { %v5572_v60 = vadd.f32 1.0, %v2537_v2  ;;  %v2599_v41 = vadd.f32 0.00028619796, %v2598_v56 }
0x10b7   :  { %v2636_v33 = vmul.f32 %v5525_v25, %v5525_v25  ;;  %v2611_v18 = vmul.f32 %v2610_v38, %v5533_v46  ;;  %v2575_v55 = vmul.f32 %v2574_v37, %v5515_v4  ;;  %v2525_v38 = vadd.f32 0.18741608, %v2524_v5 }
0x10b8   :  { %3660 = vrcp.f32 %v5572_v60  ;;  %v2600_v7 = vmul.f32 %v2599_v41, %v5533_v46  ;;  %vm2544_vm8 = vweird.f32 %v5572_v60 }
0x10b9   :  { %v5535_v23 = vmin.f32 %v2636_v33, 16.0  ;;  %v2612_v43 = vadd.f32 0.014752088, %v2611_v18  ;;  %v2576_v33 = vadd.f32 0.4994258, %v2575_v55 }
0x10ba   :  { %v2490_v10 = vpop.f32.mrf.mxu0 }
0x10bb   :  { %v2649_v6 = vmul.f32 3.8918573e-05, %v5535_v23  ;;  %v5543_v35 = vadd.f32 %v3451_v28, %v2490_v10  ;;  %v2613_v50 = vmul.f32 %v2612_v43, %v5533_v46  ;;  %v2562_v10 = vmul.f32 %v2561_v36, %v5515_v4  ;;  %v3453_v28 = vld [vmem:[%s5973_s2 + $0xf0] sm:$0xff] }
0x10bc   :  { %v2638_v48 = vmul.f32 2.1237322e-06, %v5535_v23  ;;  %v2577_v11 = vmul.f32 %v2576_v33, %v5515_v4 }
0x10bd   :  { %v2650_v54 = vadd.f32 0.001143296, %v2649_v6  ;;  %v5549_v49 = vmul.f32 0.70710677, %v5543_v35  ;;  %v2614_v63 = vadd.f32 0.112945676, %v2613_v50 }
0x10be   :  { %v2639_v21 = vadd.f32 0.00028619796, %v2638_v48  ;;  %v5601_v37 = vpop.eup %3660  ;;  %v5603_v0 = vadd.f32 1.0, %v2577_v11 }
0x10bf   :  { %v2676_v29 = vmul.f32 %v5549_v49, %v5549_v49  ;;  %v2651_v34 = vmul.f32 %v2650_v54, %v5535_v23  ;;  %v2563_v54 = vadd.f32 0.05243302, %v2562_v10  ;;  %v2615_v22 = vmul.f32 %v2614_v63, %v5533_v46 }
0x10c0   :  { %v2640_v36 = vmul.f32 %v2639_v21, %v5535_v23  ;;  %3662 = vrcp.f32 %v5603_v0  ;;  %vm2545_vm7 = vweird.f32 %v5601_v37  ;;  %vm2584_vm10 = vweird.f32 %v5603_v0 }
0x10c1   :  { %v5561_v57 = vmin.f32 %v2676_v29, 16.0  ;;  %v2652_v62 = vadd.f32 0.014752088, %v2651_v34  ;;  %v2564_v43 = vmul.f32 %v2563_v54, %v5515_v4  ;;  %v2616_v24 = vadd.f32 0.4994258, %v2615_v22  ;;  %vm5693_vm12 = vmor %vm2544_vm8, %vm2545_vm7 }
0x10c2   :  { %v2492_v20 = vpop.f32.mrf.mxu0 }
0x10c3   :  { %v5559_v31 = vadd.f32 %v3452_v52, %v2492_v20  ;;  %v2689_v44 = vmul.f32 3.8918573e-05, %v5561_v57  ;;  %v2653_v51 = vmul.f32 %v2652_v62, %v5535_v23  ;;  %v3454_v20 = vld [vmem:[%s5973_s2 + $0xf8] sm:$0xff]  ;;  %v2601_v52 = vadd.f32 0.0036580483, %v2600_v7 }
0x10c4   :  { %v2678_v30 = vmul.f32 2.1237322e-06, %v5561_v57  ;;  %v2526_v62 = vmul.f32 %v2525_v38, %v5499_v59  ;;  %v2565_v59 = vadd.f32 0.18741608, %v2564_v43  ;;  %v2641_v7 = vadd.f32 0.0036580483, %v2640_v36 }
0x10c5   :  { %v5569_v3 = vmul.f32 0.70710677, %v5559_v31  ;;  %v2690_v58 = vadd.f32 0.001143296, %v2689_v44  ;;  %v2654_v6 = vadd.f32 0.112945676, %v2653_v51  ;;  %v2602_v55 = vmul.f32 %v2601_v52, %v5533_v46 }
0x10c6   :  { %v5640_v21 = vpop.eup %3662 }
0x10c7   :  { %v2691_v1 = vmul.f32 %v2690_v58, %v5561_v57  ;;  %v2716_v13 = vmul.f32 %v5569_v3, %v5569_v3  ;;  %v2655_v14 = vmul.f32 %v2654_v6, %v5535_v23  ;;  %v2540_v58 = vmul.f32 %v5601_v37, %v5572_v60 }
0x10c8   :  { %vm2585_vm3 = vweird.f32 %v5640_v21 }
0x10c9   :  { %v2692_v32 = vadd.f32 0.014752088, %v2691_v1  ;;  %v5581_v61 = vmin.f32 %v2716_v13, 16.0  ;;  %v2656_v41 = vadd.f32 0.4994258, %v2655_v14  ;;  %v2541_v48 = vsub.f32 1.0, %v2540_v58  ;;  %vm5738_vm14 = vmor %vm2584_vm10, %vm2585_vm3 }
0x10ca   :  { %v2495_v27 = vpop.f32.mrf.mxu0  ;;  %v2679_v1 = vadd.f32 0.00028619796, %v2678_v30  ;;  %v2580_v58 = vmul.f32 %v5640_v21, %v5603_v0 }
0x10cb   :  { %v2693_v45 = vmul.f32 %v2692_v32, %v5561_v57  ;;  %v5591_v15 = vadd.f32 %v3453_v28, %v2495_v27  ;;  %v2729_v39 = vmul.f32 3.8918573e-05, %v5581_v61  ;;  %v2718_v13 = vmul.f32 2.1237322e-06, %v5581_v61 }
0x10cc   :  { %v2603_v32 = vadd.f32 0.05243302, %v2602_v55  ;;  %v2617_v28 = vmul.f32 %v2616_v24, %v5533_v46  ;;  %v2657_v6 = vmul.f32 %v2656_v41, %v5535_v23 }
0x10cd   :  { %v2694_v29 = vadd.f32 0.112945676, %v2693_v45  ;;  %v2730_v18 = vadd.f32 0.001143296, %v2729_v39  ;;  %v5608_v56 = vmul.f32 0.70710677, %v5591_v15 }
0x10ce   :  { %v2719_v38 = vadd.f32 0.00028619796, %v2718_v13  ;;  %v2550_v39 = vand.u32 2147483648, %v5572_v60  ;;  %v5643_v14 = vadd.f32 1.0, %v2617_v28  ;;  %v2604_v43 = vmul.f32 %v2603_v32, %v5533_v46 }
0x10cf   :  { %v2695_v2 = vmul.f32 %v2694_v29, %v5561_v57  ;;  %v2731_v44 = vmul.f32 %v2730_v18, %v5581_v61  ;;  %v2756_v33 = vmul.f32 %v5608_v56, %v5608_v56  ;;  %v2566_v29 = vmul.f32 %v2565_v59, %v5515_v4 }
0x10d0   :  { %v2642_v18 = vmul.f32 %v2641_v7, %v5535_v23  ;;  %v2720_v24 = vmul.f32 %v2719_v38, %v5581_v61  ;;  %3664 = vrcp.f32 %v5643_v14  ;;  %v2605_v32 = vadd.f32 0.18741608, %v2604_v43 }
0x10d1   :  { %v2696_v50 = vadd.f32 0.4994258, %v2695_v2  ;;  %v2732_v51 = vadd.f32 0.014752088, %v2731_v44  ;;  %v5628_v63 = vmin.f32 %v2756_v33, 16.0  ;;  %v2542_v2 = vmul.f32 %v5601_v37, %v2541_v48 }
0x10d2   :  { %v2497_v17 = vpop.f32.mrf.mxu0  ;;  %v5649_v44 = vadd.f32 1.0, %v2657_v6  ;;  %v2721_v7 = vadd.f32 0.0036580483, %v2720_v24  ;;  %vm2624_vm6 = vweird.f32 %v5643_v14 }
0x10d3   :  { %v5599_v34 = vadd.f32 %v3454_v20, %v2497_v17  ;;  %v2733_v5 = vmul.f32 %v2732_v51, %v5581_v61  ;;  %v2697_v11 = vmul.f32 %v2696_v50, %v5561_v57  ;;  %v5632_v20 = vadd.f32 1.1283791, %v2526_v62 }
0x10d4   :  { %v2680_v17 = vmul.f32 %v2679_v1, %v5561_v57  ;;  %v2758_v52 = vmul.f32 2.1237322e-06, %v5628_v63  ;;  %v2769_v36 = vmul.f32 3.8918573e-05, %v5628_v63  ;;  %v2643_v1 = vadd.f32 0.05243302, %v2642_v18 }
0x10d5   :  { %v5613_v27 = vmul.f32 0.70710677, %v5599_v34  ;;  %v2734_v45 = vadd.f32 0.112945676, %v2733_v5  ;;  %v5651_v62 = vadd.f32 1.0, %v2697_v11  ;;  %v5676_v18 = vor.u32 1.1754944e-38, %v2550_v39 }
0x10d6   :  { %v2681_v55 = vadd.f32 0.0036580483, %v2680_v17  ;;  %v2759_v41 = vadd.f32 0.00028619796, %v2758_v52  ;;  %v2770_v33 = vadd.f32 0.001143296, %v2769_v36  ;;  %v2644_v38 = vmul.f32 %v2643_v1, %v5535_v23 }
0x10d7   :  { %v2796_v10 = vmul.f32 %v5613_v27, %v5613_v27  ;;  %v2735_v30 = vmul.f32 %v2734_v45, %v5581_v61  ;;  %3666 = vrcp.f32 %v5651_v62  ;;  %v5672_v45 = vadd.f32 %v5601_v37, %v2542_v2 }
0x10d8   :  { %v2682_v28 = vmul.f32 %v2681_v55, %v5561_v57  ;;  %3668 = vrcp.f32 %v5649_v44  ;;  %v2760_v6 = vmul.f32 %v2759_v41, %v5628_v63  ;;  %v2771_v11 = vmul.f32 %v2770_v33, %v5628_v63  ;;  %v5682_v55 = vpop.eup %3664 }
0x10d9   :  { %v5638_v22 = vmin.f32 %v2796_v10, 16.0  ;;  %v2736_v4 = vadd.f32 0.4994258, %v2735_v30  ;;  %v2590_v10 = vand.u32 2147483648, %v5603_v0  ;;  %v2581_v17 = vsub.f32 1.0, %v2580_v58 }
0x10da   :  { %v5678_v30 = vadd.f32 1.1283791, %v2566_v29  ;;  %v2683_v24 = vadd.f32 0.05243302, %v2682_v28  ;;  %v2772_v36 = vadd.f32 0.014752088, %v2771_v11  ;;  %v2606_v41 = vmul.f32 %v2605_v32, %v5533_v46 }
0x10db   :  { %v2798_v50 = vmul.f32 2.1237322e-06, %v5638_v22  ;;  %v2809_v51 = vmul.f32 3.8918573e-05, %v5638_v22  ;;  %v2737_v13 = vmul.f32 %v2736_v4, %v5581_v61  ;;  %v2722_v4 = vmul.f32 %v2721_v7, %v5581_v61 }
0x10dc   :  { %v5697_v29 = vor.u32 1.1754944e-38, %v2590_v10  ;;  %v2645_v33 = vadd.f32 0.18741608, %v2644_v38  ;;  %v2620_v10 = vmul.f32 %v5682_v55, %v5643_v14  ;;  %v2684_v28 = vmul.f32 %v2683_v24, %v5561_v57 }
0x10dd   :  { %v2799_v59 = vadd.f32 0.00028619796, %v2798_v50  ;;  %v2810_v5 = vadd.f32 0.001143296, %v2809_v51  ;;  %v5667_v48 = vadd.f32 1.0, %v2737_v13  ;;  %v5687_v58 = vpop.eup %3666  ;;  %v2582_v13 = vmul.f32 %v5640_v21, %v2581_v17 }
0x10de   :  { %v2761_v50 = vadd.f32 0.0036580483, %v2760_v6  ;;  %v2700_v7 = vmul.f32 %v5687_v58, %v5651_v62  ;;  %v2723_v6 = vadd.f32 0.05243302, %v2722_v4  ;;  %v5717_v38 = vadd.f32 1.1283791, %v2606_v41 }
0x10df   :  { %v2811_v52 = vmul.f32 %v2810_v5, %v5638_v22  ;;  %3670 = vrcp.f32 %v5667_v48  ;;  %v2800_v43 = vmul.f32 %v2799_v59, %v5638_v22  ;;  %v2773_v59 = vmul.f32 %v2772_v36, %v5628_v63  ;;  %v5706_v5 = vpop.eup %3668 }
0x10e0   :  { %v2762_v36 = vmul.f32 %v2761_v50, %v5628_v63  ;;  %v2660_v24 = vmul.f32 %v5706_v5, %v5649_v44  ;;  %v2685_v2 = vadd.f32 0.18741608, %v2684_v28  ;;  %vm2625_vm2 = vweird.f32 %v5682_v55 }
0x10e1   :  { %v2812_v51 = vadd.f32 0.014752088, %v2811_v52  ;;  %v2801_v46 = vadd.f32 0.0036580483, %v2800_v43  ;;  %v2774_v11 = vadd.f32 0.112945676, %v2773_v59  ;;  %v5722_v43 = vadd.f32 %v5640_v21, %v2582_v13  ;;  %vm5782_vm9 = vmor %vm2624_vm6, %vm2625_vm2 }
0x10e2   :  { %v2630_v59 = vand.u32 2147483648, %v5643_v14  ;;  %v2701_v13 = vsub.f32 1.0, %v2700_v7  ;;  %v2724_v52 = vmul.f32 %v2723_v6, %v5581_v61  ;;  %v2661_v28 = vsub.f32 1.0, %v2660_v24 }
0x10e3   :  { %v2813_v32 = vmul.f32 %v2812_v51, %v5638_v22  ;;  %v2646_v51 = vmul.f32 %v2645_v33, %v5535_v23  ;;  %v2775_v41 = vmul.f32 %v2774_v11, %v5628_v63  ;;  %v2802_v54 = vmul.f32 %v2801_v46, %v5638_v22 }
0x10e4   :  { %v2763_v33 = vadd.f32 0.05243302, %v2762_v36  ;;  %v5747_v6 = vor.u32 1.1754944e-38, %v2630_v59  ;;  %v2686_v36 = vmul.f32 %v2685_v2, %v5561_v57  ;;  %vm2664_vm4 = vweird.f32 %v5649_v44 }
0x10e5   :  { %v5715_v17 = vpop.eup %3670  ;;  %v2814_v1 = vadd.f32 0.112945676, %v2813_v32  ;;  %v2621_v32 = vsub.f32 1.0, %v2620_v10  ;;  %v2776_v11 = vadd.f32 0.4994258, %v2775_v41  ;;  %v2670_v2 = vand.u32 2147483648, %v5649_v44 }
0x10e6   :  { %v2740_v4 = vmul.f32 %v5715_v17, %v5667_v48  ;;  %v2647_v10 = vadd.f32 1.1283791, %v2646_v51  ;;  %v2803_v26 = vadd.f32 0.05243302, %v2802_v54  ;;  %v2725_v41 = vadd.f32 0.18741608, %v2724_v52 }
0x10e7   :  { %v2815_v50 = vmul.f32 %v2814_v1, %v5638_v22  ;;  %v2587_v1 = vsel %vm5738_vm14, %v5640_v21, %v5722_v43  ;;  %v2777_v12 = vmul.f32 %v2776_v11, %v5628_v63  ;;  %v2622_v53 = vmul.f32 %v5682_v55, %v2621_v32 }
0x10e8   :  { %v2741_v7 = vsub.f32 1.0, %v2740_v4  ;;  %v2764_v51 = vmul.f32 %v2763_v33, %v5628_v63  ;;  %v5761_v59 = vmul.f32 %v2647_v10, %v5525_v25  ;;  %v2662_v54 = vmul.f32 %v5706_v5, %v2661_v28 }
0x10e9   :  { %v2816_v46 = vadd.f32 0.4994258, %v2815_v50  ;;  %v2702_v50 = vmul.f32 %v5687_v58, %v2701_v13  ;;  %v5756_v24 = vadd.f32 1.0, %v2777_v12  ;;  %v2668_v57 = vand.u32 2147483647, %v5649_v44 }
0x10ea   :  { %v2742_v32 = vmul.f32 %v5715_v17, %v2741_v7  ;;  %v2804_v12 = vmul.f32 %v2803_v26, %v5638_v22  ;;  %vm2665_vm1 = vweird.f32 %v5706_v5  ;;  %v2726_v25 = vmul.f32 %v2725_v41, %v5581_v61 }
0x10eb   :  { %v2817_v9 = vmul.f32 %v2816_v46, %v5638_v22  ;;  %3672 = vrcp.f32 %v5756_v24  ;;  %v2687_v52 = vadd.f32 1.1283791, %v2686_v36  ;;  %v2703_v13 = vadd.f32 %v5687_v58, %v2702_v50  ;;  %vm5792_vm15 = vmor %vm2664_vm4, %vm2665_vm1 }
0x10ec   :  { %vm2705_vm5 = vweird.f32 %v5687_v58  ;;  %v2765_v33 = vadd.f32 0.18741608, %v2764_v51  ;;  %v2710_v61 = vand.u32 2147483648, %v5651_v62  ;;  %v2743_v11 = vadd.f32 %v5715_v17, %v2742_v32 }
0x10ed   :  { %v5758_v4 = vadd.f32 1.0, %v2817_v9  ;;  %v5771_v9 = vadd.f32 %v5682_v55, %v2622_v53  ;;  %v2663_v53 = vadd.f32 %v5706_v5, %v2662_v54  ;;  %vm2745_vm11 = vweird.f32 %v5715_v17 }
0x10ee   :  { %vm5796_vm8 = vcmp.eq.f32.partialorder %v2668_v57, 8.507059e+37  ;;  %vm2704_vm7 = vweird.f32 %v5651_v62  ;;  %v2708_v28 = vand.u32 2147483647, %v5651_v62  ;;  %v2750_v7 = vand.u32 2147483648, %v5667_v48 }
0x10ef   :  { %3674 = vrcp.f32 %v5758_v4  ;;  %v2805_v36 = vadd.f32 0.18741608, %v2804_v12  ;;  %v2671_v41 = vor.u32 1.1754944e-38, %v2670_v2  ;;  %vm5803_vm10 = vmor %vm2704_vm7, %vm2705_vm5  ;;  %v2727_v44 = vadd.f32 1.1283791, %v2726_v25 }
0x10f0   :  { %vm2744_vm3 = vweird.f32 %v5667_v48  ;;  %v2748_v51 = vand.u32 2147483647, %v5667_v48  ;;  %v2627_v32 = vsel %vm5782_vm9, %v5682_v55, %v5771_v9  ;;  %v2688_v62 = vmul.f32 %v2687_v52, %v5549_v49 }
0x10f1   :  { %v3673_v54 = vpop.eup %3672  ;;  %v2707_v57 = vsel %vm5803_vm10, %v5687_v58, %v2703_v13  ;;  %vm5819_vm6 = vmor %vm2744_vm3, %vm2745_vm11  ;;  %v2766_v48 = vmul.f32 %v2765_v33, %v5628_v63  ;;  %v2667_v25 = vsel %vm5792_vm15, %v5706_v5, %v2663_v53  ;;  %v2711_v55 = vor.u32 1.1754944e-38, %v2710_v61 }
0x10f2   :  { %v2747_v49 = vsel %vm5819_vm6, %v5715_v17, %v2743_v11  ;;  %v2780_v58 = vmul.f32 %v3673_v54, %v5756_v24  ;;  %v6080_v9 = vand.u32 2147483647, %v5643_v14  ;;  %vm2709_vm4 = vcmp.eq.f32.partialorder %v2708_v28, 8.507059e+37 }
0x10f3   :  { %v2751_v63 = vor.u32 1.1754944e-38, %v2750_v7  ;;  %v2806_v13 = vmul.f32 %v2805_v36, %v5638_v22  ;;  %v6083_v5 = vand.u32 2147483647, %v5603_v0  ;;  %v2712_v17 = vsel %vm2709_vm4, %v2711_v55, %v2707_v57 }
0x10f4   :  { %vm5833_vm2 = vcmp.eq.f32.partialorder %v6080_v9, 8.507059e+37  ;;  %v2728_v53 = vmul.f32 %v2727_v44, %v5569_v3  ;;  %vm2749_vm5 = vcmp.eq.f32.partialorder %v2748_v51, 8.507059e+37  ;;  %v2781_v14 = vsub.f32 1.0, %v2780_v58 }
0x10f5   :  { %v3675_v12 = vpop.eup %3674  ;;  %vm5841_vm1 = vcmp.eq.f32.partialorder %v6083_v5, 8.507059e+37  ;;  %v2752_v61 = vsel %vm2749_vm5, %v2751_v63, %v2747_v49  ;;  %v2767_v11 = vadd.f32 1.1283791, %v2766_v48  ;;  %v2790_v46 = vand.u32 2147483648, %v5756_v24 }
0x10f6   :  { %v2820_v33 = vmul.f32 %v3675_v12, %v5758_v4  ;;  %v2782_v7 = vmul.f32 %v3673_v54, %v2781_v14  ;;  %vm2785_vm9 = vweird.f32 %v3673_v54  ;;  %v2788_v22 = vand.u32 2147483647, %v5756_v24 }
0x10f7   :  { %v2830_v0 = vand.u32 2147483648, %v5758_v4  ;;  %v2807_v36 = vadd.f32 1.1283791, %v2806_v13  ;;  %vm2825_vm11 = vweird.f32 %v3675_v12  ;;  %v2828_v57 = vand.u32 2147483647, %v5758_v4 }
0x10f8   :  { %v2821_v28 = vsub.f32 1.0, %v2820_v33  ;;  %v2672_v3 = vsel %vm5796_vm8, %v2671_v41, %v2667_v25  ;;  %v2713_v44 = vmul.f32 %v2712_v17, %v2688_v62  ;;  %v2783_v51 = vadd.f32 %v3673_v54, %v2782_v7 }
0x10f9   :  { %vm2784_vm15 = vweird.f32 %v5756_v24  ;;  %v2753_v2 = vmul.f32 %v2752_v61, %v2728_v53  ;;  %v2791_v48 = vor.u32 1.1754944e-38, %v2790_v46  ;;  %vm2824_vm10 = vweird.f32 %v5758_v4 }
0x10fa   :  { %v2822_v50 = vmul.f32 %v3675_v12, %v2821_v28  ;;  %vm2786_vm7 = vmor %vm2784_vm15, %vm2785_vm9  ;;  %v2768_v49 = vmul.f32 %v2767_v11, %v5608_v56  ;;  %vm2789_vm3 = vcmp.eq.f32.partialorder %v2788_v22, 8.507059e+37  ;;  %v2831_v9 = vor.u32 1.1754944e-38, %v2830_v0 }
0x10fb   :  { %v2787_v58 = vsel %vm2786_vm7, %v3673_v54, %v2783_v51  ;;  %vm2826_vm6 = vmor %vm2824_vm10, %vm2825_vm11  ;;  %v2808_v10 = vmul.f32 %v2807_v36, %v5613_v27  ;;  %vm2829_vm8 = vcmp.eq.f32.partialorder %v2828_v57, 8.507059e+37  ;;  %v2608_v24 = vmul.f32 %v5717_v38, %v5519_v42 }
0x10fc   :  { %v2823_v55 = vadd.f32 %v3675_v12, %v2822_v50  ;;  %v2792_v63 = vsel %vm2789_vm3, %v2791_v48, %v2787_v58  ;;  %v2632_v62 = vsel %vm5833_vm2, %v5747_v6, %v2627_v32  ;;  %v2592_v56 = vsel %vm5841_vm1, %v5697_v29, %v2587_v1  ;;  %v6089_v48 = vld [vmem:[#allocation21_spill] sm:$0xff]  ;;  %v3486_v58 = vld [vmem:[%s5975_s4 + $0x38] sm:$0xff] }
0x10fd   :  { %v2793_v25 = vmul.f32 %v2792_v63, %v2768_v49  ;;  %v2673_v27 = vmul.f32 %v2672_v3, %v5761_v59  ;;  %v3480_v54 = vclamps-f32 %v2753_v2, 1.0  ;;  %v6086_v42 = vand.u32 2147483647, %v5572_v60 }
0x10fe   :  { %v2827_v41 = vsel %vm2826_vm6, %v3675_v12, %v2823_v55  ;;  %v2568_v38 = vmul.f32 %v5678_v30, %v5502_v16  ;;  %v6087_v21 = vsel %vm5693_vm12, %v5601_v37, %v5672_v45  ;;  %v2633_v23 = vmul.f32 %v2632_v62, %v2608_v24 }
0x10ff   :  { %v2832_v4 = vsel %vm2829_vm8, %v2831_v9, %v2827_v41  ;;  %vm2549_vm4 = vcmp.eq.f32.partialorder %v6086_v42, 8.507059e+37  ;;  %v3481_v6 = vclamps-f32 %v2793_v25, 1.0  ;;  %v3479_v29 = vclamps-f32 %v2713_v44, 1.0  ;;  %v6091_v25 = vld [vmem:[#allocation19_spill] sm:$0xff] }
0x1100   :  { %v2833_v12 = vmul.f32 %v2832_v4, %v2808_v10  ;;  %v2552_v43 = vsel %vm2549_vm4, %v5676_v18, %v6087_v21  ;;  %v2528_v59 = vmul.f32 %v5632_v20, %v5490_v47  ;;  %v2593_v32 = vmul.f32 %v2592_v56, %v2568_v38  ;;  %v6090_v10 = vld [vmem:[#allocation22_spill] sm:$0xff] }
0x1101   :  { %v2506_v60 = vmul.f32 0.5, %v5591_v15  ;;  %v2842_v52 = vadd.f32 1.0, %v3481_v6  ;;  %v3478_v13 = vclamps-f32 %v2673_v27, 1.0  ;;  %v2841_v16 = vadd.f32 1.0, %v3480_v54 }
0x1102   :  { %v3482_v1 = vclamps-f32 %v2833_v12, 1.0  ;;  %v2507_v30 = vmul.f32 0.5, %v5599_v34  ;;  %v2553_v33 = vmul.f32 %v2552_v43, %v2528_v59  ;;  %v2505_v37 = vmul.f32 0.5, %v5559_v31  ;;  %v3554_v59 = vld [vmem:[%s5978_s7 + $0x30] sm:$0xff] }
0x1103   :  { %v3477_v45 = vclamps-f32 %v2633_v23, 1.0  ;;  %v2840_v18 = vadd.f32 1.0, %v3479_v29  ;;  %v2850_v5 = vmul.f32 %v2842_v52, %v2506_v60  ;;  %v2504_v17 = vmul.f32 0.5, %v5543_v35  ;;  %v6088_v35 = vld [vmem:[#allocation20_spill] sm:$0xff] }
0x1104   :  { %v2843_v39 = vadd.f32 1.0, %v3482_v1  ;;  %v3476_v53 = vclamps-f32 %v2593_v32, 1.0  ;;  %v2839_v47 = vadd.f32 1.0, %v3478_v13  ;;  %v2849_v20 = vmul.f32 %v2841_v16, %v2505_v37  ;;  %v3555_v1 = vld [vmem:[%s5978_s7 + $0x38] sm:$0xff] }
0x1105   :  { %v3475_v15 = vclamps-f32 %v2553_v33, 1.0  ;;  %v2838_v61 = vadd.f32 1.0, %v3477_v45  ;;  %v2503_v11 = vmul.f32 0.5, %v5521_v40  ;;  %v2848_v46 = vmul.f32 %v2840_v18, %v2504_v17  ;;  %v3553_v40 = vld [vmem:[%s5974_s3 + $0x18] sm:$0xff]  ;;  %2970 = vmatpush.bf16.msra.mxu3 %v3555_v1 }
0x1106   :  { %v2851_v26 = vmul.f32 %v2843_v39, %v2507_v30  ;;  %v2837_v34 = vadd.f32 1.0, %v3476_v53  ;;  %v2502_v28 = vmul.f32 0.5, %v5510_v19  ;;  %v2501_v0 = vmul.f32 0.5, %v5497_v8  ;;  %v3485_v8 = vld [vmem:[%s5975_s4 + $0x30] sm:$0xff] }
0x1107   :  { %v2847_v31 = vmul.f32 %v2839_v47, %v2503_v11  ;;  %v2857_v7 = vpack.c.bf16 %v2849_v20, %v2848_v46  ;;  %v2836_v22 = vadd.f32 1.0, %v3475_v15  ;;  %v2500_v50 = vmul.f32 0.5, %v6088_v35  ;;  %v2887_v20 = vld [vmem:[#allocation7 + $0x30] sm:$0xff]  ;;  %v2888_v15 = vld [vmem:[#allocation7 + $0x38] sm:$0xff] }
0x1108   :  { %v2858_v14 = vpack.c.bf16 %v2851_v26, %v2850_v5  ;;  %v2846_v36 = vmul.f32 %v2838_v61, %v2502_v28  ;;  %v2845_v57 = vmul.f32 %v2837_v34, %v2501_v0  ;;  %v2890_v34 = vld [vmem:[#allocation8 + $0x30] sm:$0xff]  ;;  %v2891_v28 = vld [vmem:[#allocation8 + $0x38] sm:$0xff] }
0x1109   :  { %v2844_v44 = vmul.f32 %v2836_v22, %v2500_v50  ;;  %2971 = vmatpush.bf16.msra.mxu3 %v3554_v59 }
0x110a   :  { %2874 = vmatpush.bf16.msra.mxu2 %v2858_v14  ;;  %v2856_v3 = vpack.c.bf16 %v2847_v31, %v2846_v36  ;;  %v3496_v36 = vld [vmem:[%s5979_s8 + $0x30] sm:$0xff] }
0x110b   :  { %v2855_v51 = vpack.c.bf16 %v2845_v57, %v2844_v44  ;;  %v3497_v44 = vld [vmem:[%s5979_s8 + $0x38] sm:$0xff] }
0x110e   :  { %2875 = vmatpush.bf16.msra.mxu2 %v2857_v7 }
0x1112   :  { %2876 = vmatpush.bf16.msra.mxu2 %v2856_v3 }
0x1116   :  { %2877 = vmatpush.bf16.msra.mxu2 %v2855_v51 }
0x1119   :  { %3491 = vmatmul.msk.bf16.vlgmr.msra.gmra.mxu2 %vm652_vm13, %v3553_v40 }
0x119c   :  { %v2879_v19 = vpop.f32.mrf.mxu2 }
0x119d   :  { %v2880_v2 = vadd.f32 %v3485_v8, %v2879_v19 }
0x119f   :  { %v5898_v55 = vadd.f32 %v2880_v2, %v6089_v48 }
0x11a1   :  { %v2892_v49 = vsel %vm152_vm0, %v5898_v55, 0.0 }
0x11a2   :  { %2893 = vadd.xlane.f32.xlu1 %v2892_v49 }
0x11a4   :  { %v2881_v9 = vpop.f32.mrf.mxu2 }
0x11a5   :  { %v2882_v63 = vadd.f32 %v3486_v58, %v2881_v9 }
0x11a7   :  { %v5906_v41 = vadd.f32 %v2882_v63, %v6090_v10 }
0x11a9   :  { %v2895_v24 = vsel %vm152_vm0, %v5906_v41, 0.0 }
0x11aa   :  { %2896 = vadd.xlane.f32.xlu2 %v2895_v24 }
0x1215   :  { %v2894_v62 = vpop.xlane.xlu1 %2893 }
0x1216   :  { %v2898_v4 = vmul.f32 %v2894_v62, %v6091_v25 }
0x1218   :  { %v2900_v56 = vsub.f32 %v5898_v55, %v2898_v4 }
0x121a   :  { %v2902_v27 = vmul.f32 %v2900_v56, %v2900_v56 }
0x121c   :  { %v2904_v54 = vsel %vm152_vm0, %v2902_v27, 0.0 }
0x121d   :  { %v2897_v12 = vpop.xlane.xlu2 %2896  ;;  %2905 = vadd.xlane.f32.xlu0 %v2904_v54 }
0x121e   :  { %v2899_v42 = vmul.f32 %v2897_v12, %v6091_v25 }
0x1220   :  { %v2901_v38 = vsub.f32 %v5906_v41, %v2899_v42 }
0x1222   :  { %v2903_v6 = vmul.f32 %v2901_v38, %v2901_v38 }
0x1224   :  { %v2907_v21 = vsel %vm152_vm0, %v2903_v6, 0.0 }
0x1225   :  { %2908 = vadd.xlane.f32.xlu1 %v2907_v21 }
0x1290   :  { %v2906_v43 = vpop.xlane.xlu0 %2905 }
0x1291   :  { %v2910_v23 = vmul.f32 %v2906_v43, %v6091_v25 }
0x1293   :  { %v2912_v29 = vadd.f32 1e-05, %v2910_v23 }
0x1295   :  { %3676 = vrsqrt.f32 %v2912_v29  ;;  %vm2920_vm12 = vweird.f32 %v2912_v29 }
0x1298   :  { %v2909_v32 = vpop.xlane.xlu1 %2908 }
0x1299   :  { %v2911_v60 = vmul.f32 %v2909_v32, %v6091_v25 }
0x129b   :  { %v3677_v52 = vpop.eup %3676  ;;  %v2913_v13 = vadd.f32 1e-05, %v2911_v60 }
0x129c   :  { %v2915_v16 = vmul.f32 %v3677_v52, %v2912_v29  ;;  %vm2921_vm13 = vweird.f32 %v3677_v52 }
0x129d   :  { %3678 = vrsqrt.f32 %v2913_v13  ;;  %vm2922_vm14 = vmor %vm2920_vm12, %vm2921_vm13  ;;  %vm2930_vm1 = vweird.f32 %v2913_v13 }
0x129e   :  { %v2916_v30 = vmul.f32 %v3677_v52, %v2915_v16 }
0x12a0   :  { %v2917_v39 = vmul.f32 0.5, %v2916_v30 }
0x12a2   :  { %v2918_v33 = vsub.f32 1.5, %v2917_v39 }
0x12a3   :  { %v3679_v37 = vpop.eup %3678 }
0x12a4   :  { %v2919_v45 = vmul.f32 %v3677_v52, %v2918_v33  ;;  %v2925_v18 = vmul.f32 %v3679_v37, %v2913_v13  ;;  %vm2931_vm2 = vweird.f32 %v3679_v37 }
0x12a5   :  { %vm2932_vm5 = vmor %vm2930_vm1, %vm2931_vm2 }
0x12a6   :  { %v2926_v5 = vmul.f32 %v3679_v37, %v2925_v18  ;;  %v2923_v26 = vsel %vm2922_vm14, %v3677_v52, %v2919_v45 }
0x12a7   :  { %v2934_v47 = vmul.f32 %v2923_v26, %v2900_v56 }
0x12a8   :  { %v2927_v17 = vmul.f32 0.5, %v2926_v5  ;;  %v3556_v5 = vld [vmem:[%s5980_s9 + $0x30] sm:$0xff] }
0x12a9   :  { %v2936_v11 = vmul.f32 %v2934_v47, %v2887_v20 }
0x12aa   :  { %v2928_v53 = vsub.f32 1.5, %v2927_v17 }
0x12ab   :  { %v2938_v7 = vadd.f32 %v2936_v11, %v2890_v34 }
0x12ac   :  { %v2929_v14 = vmul.f32 %v3679_v37, %v2928_v53 }
0x12ae   :  { %v2933_v61 = vsel %vm2932_vm5, %v3679_v37, %v2929_v14  ;;  %v3557_v37 = vld [vmem:[%s5980_s9 + $0x38] sm:$0xff]  ;;  %s3878_s9 = smov [#allocation13]  }
0x12af   :  { %v2935_v46 = vmul.f32 %v2933_v61, %v2901_v38  ;;  %3096 = vmatpush.bf16.msrb.mxu2 %v3557_v37  ;;  %s3193_s14 = sshll.u32 %s3878_s9, 4  ;;  %s3194_s14 = int_to_ptr.vmem [resolvable:$true] %s3193_s14 }
0x12b1   :  { %v2937_v31 = vmul.f32 %v2935_v46, %v2888_v15 }
0x12b3   :  { %v2939_v22 = vadd.f32 %v2937_v31, %v2891_v28  ;;  %3097 = vmatpush.bf16.msrb.mxu2 %v3556_v5 }
0x12b5   :  { %v2940_v0 = vpack.c.bf16 %v2939_v22, %v2938_v7 }
0x12b7   :  { %3506 = vmatmul.msk.bf16.vlgmr.msra.gmra.mxu3 %vm152_vm0, %v2940_v0 }
0x133a   :  { %v2973_v35 = vpop.f32.mrf.mxu3 }
0x133b   :  { %v5928_v50 = vadd.f32 %v3496_v36, %v2973_v35 }
0x133d   :  { %v5931_v57 = vmul.f32 0.70710677, %v5928_v50 }
0x133f   :  { %v2982_v3 = vmul.f32 %v5931_v57, %v5931_v57 }
0x1341   :  { %v2983_v51 = vmin.f32 %v2982_v3, 16.0 }
0x1342   :  { %v2975_v40 = vpop.f32.mrf.mxu3 }
0x1343   :  { %v2984_v8 = vmul.f32 2.1237322e-06, %v2983_v51  ;;  %v2995_v19 = vmul.f32 3.8918573e-05, %v2983_v51  ;;  %v5938_v2 = vadd.f32 %v3497_v44, %v2975_v40 }
0x1345   :  { %v2985_v48 = vadd.f32 0.00028619796, %v2984_v8  ;;  %v2996_v49 = vadd.f32 0.001143296, %v2995_v19  ;;  %v5941_v58 = vmul.f32 0.70710677, %v5938_v2 }
0x1347   :  { %v2997_v9 = vmul.f32 %v2996_v49, %v2983_v51  ;;  %v3022_v63 = vmul.f32 %v5941_v58, %v5941_v58  ;;  %v2986_v10 = vmul.f32 %v2985_v48, %v2983_v51 }
0x1349   :  { %v2998_v24 = vadd.f32 0.014752088, %v2997_v9  ;;  %v3023_v62 = vmin.f32 %v3022_v63, 16.0  ;;  %v2987_v54 = vadd.f32 0.0036580483, %v2986_v10 }
0x134b   :  { %v2999_v4 = vmul.f32 %v2998_v24, %v2983_v51  ;;  %v3024_v56 = vmul.f32 2.1237322e-06, %v3023_v62  ;;  %v3035_v27 = vmul.f32 3.8918573e-05, %v3023_v62  ;;  %v2988_v23 = vmul.f32 %v2987_v54, %v2983_v51 }
0x134d   :  { %v3000_v12 = vadd.f32 0.112945676, %v2999_v4  ;;  %v3025_v42 = vadd.f32 0.00028619796, %v3024_v56  ;;  %v3036_v38 = vadd.f32 0.001143296, %v3035_v27 }
0x134e   :  { %v2989_v52 = vadd.f32 0.05243302, %v2988_v23  ;;  %v3073_v23 = vld [vmem:[#allocation5 + $0x30] sm:$0xff] }
0x134f   :  { %v3001_v6 = vmul.f32 %v3000_v12, %v2983_v51  ;;  %v3026_v21 = vmul.f32 %v3025_v42, %v3023_v62  ;;  %v3037_v43 = vmul.f32 %v3036_v38, %v3023_v62  ;;  %v2978_v12 = vmul.f32 0.5, %v5928_v50 }
0x1350   :  { %v2990_v33 = vmul.f32 %v2989_v52, %v2983_v51  ;;  %v2979_v42 = vmul.f32 0.5, %v5938_v2 }
0x1351   :  { %v3002_v29 = vadd.f32 0.4994258, %v3001_v6  ;;  %v3027_v1 = vadd.f32 0.0036580483, %v3026_v21  ;;  %v3038_v59 = vadd.f32 0.014752088, %v3037_v43 }
0x1352   :  { %v2991_v53 = vadd.f32 0.18741608, %v2990_v33 }
0x1353   :  { %v3003_v32 = vmul.f32 %v3002_v29, %v2983_v51  ;;  %v3039_v60 = vmul.f32 %v3038_v59, %v3023_v62  ;;  %v3028_v16 = vmul.f32 %v3027_v1, %v3023_v62 }
0x1354   :  { %v2992_v61 = vmul.f32 %v2991_v53, %v2983_v51 }
0x1355   :  { %v3004_v13 = vadd.f32 1.0, %v3003_v32  ;;  %v3040_v30 = vadd.f32 0.112945676, %v3039_v60  ;;  %v3029_v45 = vadd.f32 0.05243302, %v3028_v16  ;;  %v3074_v32 = vld [vmem:[#allocation5 + $0x38] sm:$0xff] }
0x1356   :  { %v2993_v7 = vadd.f32 1.1283791, %v2992_v61 }
0x1357   :  { %3680 = vrcp.f32 %v3004_v13  ;;  %v3041_v39 = vmul.f32 %v3040_v30, %v3023_v62  ;;  %v3030_v20 = vmul.f32 %v3029_v45, %v3023_v62  ;;  %v3016_v46 = vand.u32 2147483648, %v3004_v13 }
0x1358   :  { %v3014_v28 = vand.u32 2147483647, %v3004_v13  ;;  %vm3010_vm11 = vweird.f32 %v3004_v13  ;;  %v2994_v40 = vmul.f32 %v2993_v7, %v5931_v57  ;;  %v3106_v7 = vld [vmem:[#allocation10] sm:$0xff] }
0x1359   :  { %v3042_v18 = vadd.f32 0.4994258, %v3041_v39  ;;  %v3031_v34 = vadd.f32 0.18741608, %v3030_v20  ;;  %v3017_v36 = vor.u32 1.1754944e-38, %v3016_v46 }
0x135a   :  { %vm3015_vm7 = vcmp.eq.f32.partialorder %v3014_v28, 8.507059e+37 }
0x135b   :  { %v3043_v26 = vmul.f32 %v3042_v18, %v3023_v62  ;;  %v3032_v35 = vmul.f32 %v3031_v34, %v3023_v62 }
0x135d   :  { %v3681_v17 = vpop.eup %3680  ;;  %v3044_v14 = vadd.f32 1.0, %v3043_v26  ;;  %v3033_v51 = vadd.f32 1.1283791, %v3032_v35 }
0x135e   :  { %v3006_v47 = vmul.f32 %v3681_v17, %v3004_v13  ;;  %vm3011_vm9 = vweird.f32 %v3681_v17 }
0x135f   :  { %3682 = vrcp.f32 %v3044_v14  ;;  %vm3012_vm15 = vmor %vm3010_vm11, %vm3011_vm9  ;;  %v3056_v19 = vand.u32 2147483648, %v3044_v14  ;;  %v3054_v9 = vand.u32 2147483647, %v3044_v14  ;;  %vm3050_vm3 = vweird.f32 %v3044_v14 }
0x1360   :  { %v3007_v15 = vsub.f32 1.0, %v3006_v47  ;;  %v3034_v4 = vmul.f32 %v3033_v51, %v5941_v58  ;;  %vm3186_vm9 = vcmask 254976  }
0x1361   :  { %v3057_v10 = vor.u32 1.1754944e-38, %v3056_v19  ;;  %vm3055_vm8 = vcmp.eq.f32.partialorder %v3054_v9, 8.507059e+37  ;;  %v3107_v9 = vld [vmem:[#allocation10 + $0x8] sm:$0xff] }
0x1362   :  { %v3008_v11 = vmul.f32 %v3681_v17, %v3007_v15 }
0x1364   :  { %v3009_v31 = vadd.f32 %v3681_v17, %v3008_v11 }
0x1365   :  { %v3683_v22 = vpop.eup %3682 }
0x1366   :  { %v3013_v0 = vsel %vm3012_vm15, %v3681_v17, %v3009_v31  ;;  %v3046_v3 = vmul.f32 %v3683_v22, %v3044_v14  ;;  %vm3051_vm10 = vweird.f32 %v3683_v22 }
0x1367   :  { %v3018_v44 = vsel %vm3015_vm7, %v3017_v36, %v3013_v0  ;;  %vm3052_vm6 = vmor %vm3050_vm3, %vm3051_vm10  ;;  %v3877_v36 = vmov 8.0  }
0x1368   :  { %v3047_v8 = vsub.f32 1.0, %v3046_v3  ;;  %v3019_v48 = vmul.f32 %v3018_v44, %v2994_v40 }
0x136a   :  { %v3048_v49 = vmul.f32 %v3683_v22, %v3047_v8  ;;  %v3507_v24 = vclamps-f32 %v3019_v48, 1.0 }
0x136c   :  { %v3049_v63 = vadd.f32 %v3683_v22, %v3048_v49  ;;  %v3062_v54 = vadd.f32 1.0, %v3507_v24 }
0x136e   :  { %v3053_v62 = vsel %vm3052_vm6, %v3683_v22, %v3049_v63  ;;  %v3064_v6 = vmul.f32 %v3062_v54, %v2978_v12 }
0x136f   :  { %v3058_v56 = vsel %vm3055_vm8, %v3057_v10, %v3053_v62 }
0x1370   :  { %v3059_v27 = vmul.f32 %v3058_v56, %v3034_v4  ;;  %v3109_v4 = vld [vmem:[#allocation11 + $0x8] sm:$0xff] }
0x1372   :  { %v3508_v57 = vclamps-f32 %v3059_v27, 1.0 }
0x1374   :  { %v3063_v38 = vadd.f32 1.0, %v3508_v57 }
0x1376   :  { %v3065_v21 = vmul.f32 %v3063_v38, %v2979_v42 }
0x1378   :  { %v3066_v43 = vpack.c.bf16 %v3065_v21, %v3064_v6 }
0x137a   :  { %3521 = vmatmul.msk.bf16.vlgmr.msrb.gmra.mxu2 %vm152_vm0, %v3066_v43 }
0x13fd   :  { %v3099_v29 = vpop.f32.mrf.mxu2 }
0x13fe   :  { %v3100_v1 = vadd.f32 %v3099_v29, %v3073_v23 }
0x1400   :  { %v3104_v58 = vadd.f32 %v3100_v1, %v5898_v55 }
0x1402   :  { %v3110_v59 = vsel %vm152_vm0, %v3104_v58, 0.0 }
0x1403   :  { %3111 = vadd.xlane.f32.xlu2 %v3110_v59 }
0x1405   :  { %v3101_v60 = vpop.f32.mrf.mxu2 }
0x1406   :  { %v3102_v52 = vadd.f32 %v3101_v60, %v3074_v32 }
0x1408   :  { %v3105_v50 = vadd.f32 %v3102_v52, %v5906_v41 }
0x140a   :  { %v3113_v2 = vsel %vm152_vm0, %v3105_v50, 0.0 }
0x140b   :  { %3114 = vadd.xlane.f32.xlu0 %v3113_v2 }
0x1476   :  { %v3112_v13 = vpop.xlane.xlu2 %3111 }
0x1477   :  { %v3116_v16 = vmul.f32 %v3112_v13, %v6091_v25 }
0x1479   :  { %v3118_v30 = vsub.f32 %v3104_v58, %v3116_v16 }
0x147b   :  { %v3120_v39 = vmul.f32 %v3118_v30, %v3118_v30 }
0x147d   :  { %v3122_v33 = vsel %vm152_vm0, %v3120_v39, 0.0 }
0x147e   :  { %v3115_v37 = vpop.xlane.xlu0 %3114  ;;  %3123 = vadd.xlane.f32.xlu1 %v3122_v33 }
0x147f   :  { %v3117_v55 = vmul.f32 %v3115_v37, %v6091_v25 }
0x1481   :  { %v3119_v45 = vsub.f32 %v3105_v50, %v3117_v55 }
0x1483   :  { %v3121_v18 = vmul.f32 %v3119_v45, %v3119_v45 }
0x1485   :  { %v3125_v5 = vsel %vm152_vm0, %v3121_v18, 0.0 }
0x1486   :  { %3126 = vadd.xlane.f32.xlu2 %v3125_v5 }
0x14f1   :  { %v3124_v41 = vpop.xlane.xlu1 %3123 }
0x14f2   :  { %v3128_v26 = vmul.f32 %v3124_v41, %v6091_v25 }
0x14f4   :  { %v3130_v17 = vadd.f32 1e-05, %v3128_v26 }
0x14f6   :  { %3684 = vrsqrt.f32 %v3130_v17  ;;  %vm3138_vm13 = vweird.f32 %v3130_v17 }
0x14f9   :  { %v3127_v53 = vpop.xlane.xlu2 %3126 }
0x14fa   :  { %v3129_v47 = vmul.f32 %v3127_v53, %v6091_v25  ;;  %v3108_v25 = vld [vmem:[#allocation11] sm:$0xff] }
0x14fc   :  { %v3685_v20 = vpop.eup %3684  ;;  %v3131_v14 = vadd.f32 1e-05, %v3129_v47 }
0x14fd   :  { %v3133_v15 = vmul.f32 %v3685_v20, %v3130_v17  ;;  %vm3139_vm4 = vweird.f32 %v3685_v20 }
0x14fe   :  { %3686 = vrsqrt.f32 %v3131_v14  ;;  %vm3140_vm12 = vmor %vm3138_vm13, %vm3139_vm4  ;;  %vm3148_vm2 = vweird.f32 %v3131_v14 }
0x14ff   :  { %v3134_v61 = vmul.f32 %v3685_v20, %v3133_v15  ;;  %3688 = vrcp.f32 %v3877_v36 }
0x1501   :  { %v3135_v11 = vmul.f32 0.5, %v3134_v61 }
0x1503   :  { %v3136_v46 = vsub.f32 1.5, %v3135_v11 }
0x1504   :  { %v3687_v34 = vpop.eup %3686 }
0x1505   :  { %v3137_v28 = vmul.f32 %v3685_v20, %v3136_v46  ;;  %v3143_v31 = vmul.f32 %v3687_v34, %v3131_v14  ;;  %vm3149_vm14 = vweird.f32 %v3687_v34  ;;  %v3689_v51 = vpop.eup %3688 }
0x1506   :  { %vm3150_vm1 = vmor %vm3148_vm2, %vm3149_vm14  ;;  %v3173_v24 = vmul.f32 8.0, %v3689_v51  ;;  %vm3177_vm5 = vweird.f32 %v3689_v51 }
0x1507   :  { %v3141_v22 = vsel %vm3140_vm12, %v3685_v20, %v3137_v28  ;;  %v3144_v0 = vmul.f32 %v3687_v34, %v3143_v31 }
0x1508   :  { %v3152_v35 = vmul.f32 %v3141_v22, %v3118_v30  ;;  %v3174_v57 = vsub.f32 1.0, %v3173_v24 }
0x1509   :  { %v3145_v3 = vmul.f32 0.5, %v3144_v0 }
0x150a   :  { %v3154_v44 = vmul.f32 %v3152_v35, %v3106_v7  ;;  %v3175_v6 = vmul.f32 %v3689_v51, %v3174_v57 }
0x150b   :  { %v3146_v40 = vsub.f32 1.5, %v3145_v3 }
0x150c   :  { %v3156_v8 = vadd.f32 %v3154_v44, %v3108_v25  ;;  %v3176_v29 = vadd.f32 %v3689_v51, %v3175_v6 }
0x150d   :  { %v3147_v19 = vmul.f32 %v3687_v34, %v3146_v40 }
0x150e   :  { %v3158_v48 = vsel %vm152_vm0, %v3156_v8, 0.0  ;;  %v3178_v32 = vsel %vm3177_vm5, %v3689_v51, %v3176_v29 }
0x150f   :  { %v3159_v49 = vrot.slane %v3158_v48, 4  ;;  %v3151_v63 = vsel %vm3150_vm1, %v3687_v34, %v3147_v19 }
0x1510   :  { %v3153_v10 = vmul.f32 %v3151_v63, %v3119_v45 }
0x1511   :  { %v3160_v62 = vadd.f32 %v3159_v49, %v3158_v48 }
0x1512   :  { %v3155_v56 = vmul.f32 %v3153_v10, %v3107_v9 }
0x1513   :  { %v3161_v27 = vrot.slane %v3160_v62, 2 }
0x1514   :  { %v3157_v54 = vadd.f32 %v3155_v56, %v3109_v4 }
0x1515   :  { %v3162_v38 = vadd.f32 %v3161_v27, %v3160_v62 }
0x1516   :  { %v3165_v12 = vsel %vm152_vm0, %v3157_v54, 0.0  ;;  %vm3183_vm0 = vcmask 1041409  }
0x1517   :  { %v3166_v42 = vrot.slane %v3165_v12, 4  ;;  %v3163_v43 = vrot.slane %v3162_v38, 1 }
0x1519   :  { %v3167_v21 = vadd.f32 %v3166_v42, %v3165_v12  ;;  %v3164_v58 = vadd.f32 %v3163_v43, %v3162_v38 }
0x151b   :  { %v3168_v23 = vrot.slane %v3167_v21, 2  ;;  %v3179_v52 = vmul.f32 %v3178_v32, %v3164_v58 }
0x151d   :  { %v3169_v1 = vadd.f32 %v3168_v23, %v3167_v21 }
0x151f   :  { %v3170_v59 = vrot.slane %v3169_v1, 1 }
0x1521   :  { %v3171_v60 = vadd.f32 %v3170_v59, %v3169_v1 }
0x1523   :  { %v3180_v50 = vmul.f32 %v3178_v32, %v3171_v60 }
0x1525   :  { %v3184_v2 = vsel %vm3183_vm0, %v3180_v50, %v3179_v52 }
0x1526   :  { %3187 = vst.msk [vmem:[#allocation13] sm:$0x3] %vm3186_vm9, %v3184_v2 }
0x1527   :  { %3198 = dma.vmem_to_hbm [thread:$0]  %s3194_s14, 32, %s3196_s10, [#allocation4]  }
0x1528   :  { %3866 = dma.done.wait [#allocation4], 32  }
0x1529   :  { %3867 = vsyncadd [#allocation4], 4294967264 }
0x152a   :  { %3203 = vsyncpa [#allocation3], 1 }
0x152b   :  { %3204 = vsyncpa [#allocation6], 1 }
0x152c   :  { %3205 = vsyncpa [#allocation9], 1 }
0x152d   :  { %3206 = vsyncpa [#allocation12], 1 }
0x152e   :  { %3207 = vsyncpa [#allocation4], 1 }

</bundles_post_ra>
